<compile_context>
chip_gen: v7x
topology: tpu7x:2x2x1
jax: 0.10.0
libtpu: 0.0.40
codegen_flags: <defaults>
</compile_context>

<pallas_src>
import jax
import jax.numpy as jnp
from jax.experimental import pallas as pl
from jax.experimental.pallas import tpu as pltpu


# ----------------------------------------------------------------------------
# Fused CRLI forward kernel.
#
# PyTorch GRU gate convention (gate order r, z, n):
#   r = sigmoid(W_ir x + b_ir + W_hr h + b_hr)
#   z = sigmoid(W_iz x + b_iz + W_hz h + b_hz)
#   n = tanh  (W_in x + b_in + r * (W_hn h + b_hn))
#   h' = (1 - z) * n + z * h
# ----------------------------------------------------------------------------
def _crli_fused_kernel(
    x_ref, m_ref,
    wih1_ref, whh1_ref, bih1_ref, bhh1_ref,
    wih2_ref, whh2_ref, bih2_ref, bhh2_ref,
    w_out_ref, b_out_ref, w_fc_ref, b_fc_ref, ct_ref,
    imp_ref, lat_ref, lab_ref,
    gi_r_scr, gi_z_scr, gi_n_scr, h1_scr, h2_scr,
):
    B, H = h1_scr.shape
    TB, F = x_ref.shape
    T = TB // B
    K = ct_ref.shape[-1]

    f32 = jnp.float32
    bf16 = jnp.bfloat16

    # ---- hoisted layer-1 input projection: one big MXU matmul per gate ------
    x_bf = x_ref[...].astype(bf16)                                   # (T*B, F)
    gi_r_scr[...] = jnp.dot(x_bf, wih1_ref[0], preferred_element_type=f32) + bih1_ref[0]
    gi_z_scr[...] = jnp.dot(x_bf, wih1_ref[1], preferred_element_type=f32) + bih1_ref[1]
    gi_n_scr[...] = jnp.dot(x_bf, wih1_ref[2], preferred_element_type=f32) + bih1_ref[2]

    # ---- hidden states carried in VMEM scratch ------------------------------
    h1_scr[...] = jnp.zeros_like(h1_scr)
    h2_scr[...] = jnp.zeros_like(h2_scr)

    # Per-gate weights/biases loaded once, reused as loop constants
    # (lane-aligned per-gate blocks -> no (B,3H) vreg slicing in the loop).
    w1hr, w1hz, w1hn = whh1_ref[0], whh1_ref[1], whh1_ref[2]
    b1hr, b1hz, b1hn = bhh1_ref[0], bhh1_ref[1], bhh1_ref[2]
    w2ir, w2iz, w2in = wih2_ref[0], wih2_ref[1], wih2_ref[2]
    b2ir, b2iz, b2in = bih2_ref[0], bih2_ref[1], bih2_ref[2]
    w2hr, w2hz, w2hn = whh2_ref[0], whh2_ref[1], whh2_ref[2]
    b2hr, b2hz, b2hn = bhh2_ref[0], bhh2_ref[1], bhh2_ref[2]
    w_out = w_out_ref[...]
    b_out = b_out_ref[...]

    def step(t, carry):
        start = t * B
        if (B % 8 == 0) and not isinstance(start, int):
            start = pl.multiple_of(start, 8)
        rows = pl.ds(start, B)

        # ---- GRU layer 1 (input projection already hoisted) -----------------
        h1 = h1_scr[...]
        h1_bf = h1.astype(bf16)
        gh1_r = jnp.dot(h1_bf, w1hr, preferred_element_type=f32) + b1hr
        gh1_z = jnp.dot(h1_bf, w1hz, preferred_element_type=f32) + b1hz
        gh1_n = jnp.dot(h1_bf, w1hn, preferred_element_type=f32) + b1hn
        r1 = jax.nn.sigmoid(gi_r_scr[rows, :] + gh1_r)
        z1 = jax.nn.sigmoid(gi_z_scr[rows, :] + gh1_z)
        n1 = jnp.tanh(gi_n_scr[rows, :] + r1 * gh1_n)
        h1_new = (1.0 - z1) * n1 + z1 * h1
        h1_scr[...] = h1_new

        # ---- GRU layer 2 (input = fresh layer-1 hidden, same time step) -----
        h1n_bf = h1_new.astype(bf16)
        gi2_r = jnp.dot(h1n_bf, w2ir, preferred_element_type=f32) + b2ir
        gi2_z = jnp.dot(h1n_bf, w2iz, preferred_element_type=f32) + b2iz
        gi2_n = jnp.dot(h1n_bf, w2in, preferred_element_type=f32) + b2in
        h2 = h2_scr[...]
        h2_bf = h2.astype(bf16)
        gh2_r = jnp.dot(h2_bf, w2hr, preferred_element_type=f32) + b2hr
        gh2_z = jnp.dot(h2_bf, w2hz, preferred_element_type=f32) + b2hz
        gh2_n = jnp.dot(h2_bf, w2hn, preferred_element_type=f32) + b2hn
        r2 = jax.nn.sigmoid(gi2_r + gh2_r)
        z2 = jax.nn.sigmoid(gi2_z + gh2_z)
        n2 = jnp.tanh(gi2_n + r2 * gh2_n)
        h2_new = (1.0 - z2) * n2 + z2 * h2
        h2_scr[...] = h2_new

        # ---- imputation merge fused into the same step -----------------------
        gen = jnp.dot(h2_new.astype(bf16), w_out, preferred_element_type=f32) + b_out
        m = m_ref[rows, :]
        imp_ref[rows, :] = m * x_ref[rows, :] + (1.0 - m) * gen
        return carry

    # Short fixed trip count -> unrolled for LLO scheduler visibility.
    jax.lax.fori_loop(0, T, step, 0, unroll=True)

    # ---- fcn_latent + nearest-centroid assignment (fused head) --------------
    h2_final = h2_scr[...]
    z = (jnp.dot(h2_final.astype(bf16), w_fc_ref[...], preferred_element_type=f32)
         + b_fc_ref[...])                                            # (B, D)
    lat_ref[...] = z

    ct = ct_ref[...]                                                 # (D, K) f32
    zz = jnp.sum(z * z, axis=1, keepdims=True)                       # (B, 1)
    cc = jnp.sum(ct * ct, axis=0, keepdims=True)                     # (1, K)
    dists = zz - 2.0 * jnp.dot(z, ct, preferred_element_type=f32) + cc
    # argmin over K (=3) done in-kernel: trivial VPU select, no lane-sparse
    # (B, K) HBM output.
    dmin = jnp.min(dists, axis=1, keepdims=True)
    idx = jax.lax.broadcasted_iota(jnp.int32, dists.shape, 1).astype(f32)
    lab = jnp.min(jnp.where(dists <= dmin, idx, float(K)), axis=1, keepdims=True)
    lab_ref[...] = lab.astype(jnp.int32)


def crli_fused(x_flat, m_flat, params, *, T, B):
    """Run the fused CRLI forward kernel on flattened (T*B, F) inputs."""
    F = x_flat.shape[1]
    H = params["whh1"].shape[-1]
    D = params["w_fc"].shape[-1]

    out_shapes = (
        jax.ShapeDtypeStruct((T * B, F), jnp.float32),   # imputed (flat)
        jax.ShapeDtypeStruct((B, D), jnp.float32),       # fcn_latent
        jax.ShapeDtypeStruct((B, 1), jnp.int32),         # cluster labels
    )
    # TODO(synk): at production sizes (large T*B), chunk the hoisted GI matmul
    #             and the time loop over T-blocks to respect v7x's 64 MiB VMEM,
    #             and expose a 'parallel' batch-block grid axis (per-block h
    #             scratch) so both v7x TensorCores are used.
    return pl.pallas_call(
        _crli_fused_kernel,
        out_shape=out_shapes,
        scratch_shapes=[
            pltpu.VMEM((T * B, H), jnp.float32),  # hoisted gi1_r
            pltpu.VMEM((T * B, H), jnp.float32),  # hoisted gi1_z
            pltpu.VMEM((T * B, H), jnp.float32),  # hoisted gi1_n
            pltpu.VMEM((B, H), jnp.float32),      # h1 state
            pltpu.VMEM((B, H), jnp.float32),      # h2 state
        ],
    )(
        x_flat, m_flat,
        params["wih1"], params["whh1"], params["bih1"], params["bhh1"],
        params["wih2"], params["whh2"], params["bih2"], params["bhh2"],
        params["w_out"], params["b_out"], params["w_fc"], params["b_fc"],
        params["centroids_t"],
    )


# ----------------------------------------------------------------------------
# CRLI forward (inference path): 2-layer GRU generator -> imputation ->
# fcn_latent -> nearest-centroid cluster assignment. Single fused kernel.
# ----------------------------------------------------------------------------
@jax.jit
def crli_forward(x_tm, mask_tm, params):
    T, B, F = x_tm.shape
    x_flat = x_tm.reshape(T * B, F)
    m_flat = mask_tm.reshape(T * B, F)
    imputed_flat, fcn_latent, labels = crli_fused(x_flat, m_flat, params, T=T, B=B)
    imputed = imputed_flat.reshape(T, B, F)
    return imputed, fcn_latent, labels[:, 0]


# TODO(synk): crli.fit() adversarial training loop (generator/discriminator,
#             400 epochs) and the KMeans centroid fitting have no Pallas
#             forward-kernel equivalent here; centroids are synthetic params.
# TODO(synk): clustering metrics (rand index, ACC, purity, ARI, NMI, weighted
#             F1) and pandas DataFrame packaging are host-side sklearn/pandas.


def make_params(key, F, H, D, K):
    """Synthetic parameters. Per-gate weights stacked on a leading axis of 3
    in PyTorch gate order (r, z, n); weights are stored transposed (in, H)
    vs torch's (3H, in) and pre-cast to bf16 for the MXU (biases stay f32)."""
    ks = jax.random.split(key, 12)
    s = 0.1

    def w(k, shape):
        return (s * jax.random.normal(k, shape, jnp.float32)).astype(jnp.bfloat16)

    def b(k, shape):
        return s * jax.random.normal(k, shape, jnp.float32)

    return {
        "wih1": w(ks[0], (3, F, H)),
        "whh1": w(ks[1], (3, H, H)),
        "bih1": b(ks[2], (3, 1, H)),
        "bhh1": b(ks[3], (3, 1, H)),
        "wih2": w(ks[4], (3, H, H)),
        "whh2": w(ks[5], (3, H, H)),
        "bih2": b(ks[6], (3, 1, H)),
        "bhh2": b(ks[7], (3, 1, H)),
        "w_out": w(ks[8], (H, F)),
        "b_out": b(ks[9], (1, F)),
        "w_fc": w(ks[10], (H, D)),
        "b_fc": jnp.zeros((1, D), jnp.float32),
        # centroids stored transposed (D, K)
        "centroids_t": jax.random.normal(ks[11], (D, K), jnp.float32),
    }


if __name__ == "__main__":
    # Small shapes consistent with the module's hyper-parameters
    # (n_generator_layers=2, features_dims=4; hidden/latent sizes shrunk).
    B = 8      # batch
    T = 8      # n_steps
    F = 4      # n_features
    H = 32     # rnn_hidden_size (module uses 50; shrunk for a small test)
    D = 16     # d_hidden / latent dims (module uses 40)
    K = 3      # n_clusters

    key = jax.random.PRNGKey(0)
    k_x, k_m, k_p = jax.random.split(key, 3)

    # batch-major inputs (B, T, F), converted to time-major for the kernel
    x_btf = jax.random.normal(k_x, (B, T, F), jnp.float32)
    mask_btf = (jax.random.uniform(k_m, (B, T, F)) > 0.3).astype(jnp.float32)

    x_tm = jnp.transpose(x_btf, (1, 0, 2))       # (T, B, F)
    mask_tm = jnp.transpose(mask_btf, (1, 0, 2))

    params = make_params(k_p, F, H, D, K)

    imputed, fcn_latent, labels = crli_forward(x_tm, mask_tm, params)
    jax.block_until_ready((imputed, fcn_latent, labels))

    assert imputed.shape == (T, B, F)
    assert fcn_latent.shape == (B, D)
    assert labels.shape == (B,)
    assert labels.dtype == jnp.int32

    print("KERNEL_OK")
</pallas_src>

<mosaic_0001>
module attributes {stable_mosaic.version = 11 : i64} {
  func.func @_crli_fused_kernel(%arg0: memref<64x4xf32, #tpu.memory_space<vmem>>, %arg1: memref<64x4xf32, #tpu.memory_space<vmem>>, %arg2: memref<3x4x32xbf16, #tpu.memory_space<vmem>>, %arg3: memref<3x32x32xbf16, #tpu.memory_space<vmem>>, %arg4: memref<3x1x32xf32, #tpu.memory_space<vmem>>, %arg5: memref<3x1x32xf32, #tpu.memory_space<vmem>>, %arg6: memref<3x32x32xbf16, #tpu.memory_space<vmem>>, %arg7: memref<3x32x32xbf16, #tpu.memory_space<vmem>>, %arg8: memref<3x1x32xf32, #tpu.memory_space<vmem>>, %arg9: memref<3x1x32xf32, #tpu.memory_space<vmem>>, %arg10: memref<32x4xbf16, #tpu.memory_space<vmem>>, %arg11: memref<1x4xf32, #tpu.memory_space<vmem>>, %arg12: memref<32x16xbf16, #tpu.memory_space<vmem>>, %arg13: memref<1x16xf32, #tpu.memory_space<vmem>>, %arg14: memref<16x3xf32, #tpu.memory_space<vmem>>, %arg15: memref<64x4xf32, #tpu.memory_space<vmem>>, %arg16: memref<8x16xf32, #tpu.memory_space<vmem>>, %arg17: memref<8x1xi32, #tpu.memory_space<vmem>>, %arg18: memref<64x32xf32, #tpu.memory_space<vmem>>, %arg19: memref<64x32xf32, #tpu.memory_space<vmem>>, %arg20: memref<64x32xf32, #tpu.memory_space<vmem>>, %arg21: memref<8x32xf32, #tpu.memory_space<vmem>>, %arg22: memref<8x32xf32, #tpu.memory_space<vmem>>) attributes {dimension_semantics = [], scalar_prefetch = 0 : i64, scratch_operands = 5 : i64, tpu.core_type = #tpu.core_type<tc>} {
    %c0 = arith.constant 0 : index
    %c0_0 = arith.constant 0 : index
    %0 = vector.load %arg0[%c0, %c0_0] : memref<64x4xf32, #tpu.memory_space<vmem>>, vector<64x4xf32>
    %1 = arith.truncf %0 : vector<64x4xf32> to vector<64x4xbf16>
    %c0_1 = arith.constant 0 : index
    %c0_2 = arith.constant 0 : index
    %c0_3 = arith.constant 0 : index
    %2 = vector.load %arg2[%c0_1, %c0_2, %c0_3] : memref<3x4x32xbf16, #tpu.memory_space<vmem>>, vector<1x4x32xbf16>
    %3 = vector.shape_cast %2 : vector<1x4x32xbf16> to vector<4x32xbf16>
    %cst = arith.constant dense<0.000000e+00> : vector<64x32xf32>
    %4 = tpu.matmul %1, %3, %cst {dimension_numbers = #tpu.dot_dimension_numbers<[1], [0], [0], [1], [0, 0, 1, 1], [], []>} : vector<64x4xbf16>, vector<4x32xbf16>, vector<64x32xf32> -> vector<64x32xf32>
    %c0_4 = arith.constant 0 : index
    %c0_5 = arith.constant 0 : index
    %c0_6 = arith.constant 0 : index
    %5 = vector.load %arg4[%c0_4, %c0_5, %c0_6] : memref<3x1x32xf32, #tpu.memory_space<vmem>>, vector<1x1x32xf32>
    %6 = vector.shape_cast %5 : vector<1x1x32xf32> to vector<1x32xf32>
    %7 = vector.broadcast %6 : vector<1x32xf32> to vector<64x32xf32>
    %8 = arith.addf %4, %7 : vector<64x32xf32>
    %c0_7 = arith.constant 0 : index
    %c0_8 = arith.constant 0 : index
    %9 = vector.load %arg18[%c0_7, %c0_8] : memref<64x32xf32, #tpu.memory_space<vmem>>, vector<64x32xf32>
    tpu.vector_store %arg18[%c0_7, %c0_8], %8 {strides = array<i32>} : memref<64x32xf32, #tpu.memory_space<vmem>>, vector<64x32xf32>,
    %c1 = arith.constant 1 : index
    %c0_9 = arith.constant 0 : index
    %c0_10 = arith.constant 0 : index
    %10 = vector.load %arg2[%c1, %c0_9, %c0_10] : memref<3x4x32xbf16, #tpu.memory_space<vmem>>, vector<1x4x32xbf16>
    %11 = vector.shape_cast %10 : vector<1x4x32xbf16> to vector<4x32xbf16>
    %cst_11 = arith.constant dense<0.000000e+00> : vector<64x32xf32>
    %12 = tpu.matmul %1, %11, %cst_11 {dimension_numbers = #tpu.dot_dimension_numbers<[1], [0], [0], [1], [0, 0, 1, 1], [], []>} : vector<64x4xbf16>, vector<4x32xbf16>, vector<64x32xf32> -> vector<64x32xf32>
    %c1_12 = arith.constant 1 : index
    %c0_13 = arith.constant 0 : index
    %c0_14 = arith.constant 0 : index
    %13 = vector.load %arg4[%c1_12, %c0_13, %c0_14] : memref<3x1x32xf32, #tpu.memory_space<vmem>>, vector<1x1x32xf32>
    %14 = vector.shape_cast %13 : vector<1x1x32xf32> to vector<1x32xf32>
    %15 = vector.broadcast %14 : vector<1x32xf32> to vector<64x32xf32>
    %16 = arith.addf %12, %15 : vector<64x32xf32>
    %c0_15 = arith.constant 0 : index
    %c0_16 = arith.constant 0 : index
    %17 = vector.load %arg19[%c0_15, %c0_16] : memref<64x32xf32, #tpu.memory_space<vmem>>, vector<64x32xf32>
    tpu.vector_store %arg19[%c0_15, %c0_16], %16 {strides = array<i32>} : memref<64x32xf32, #tpu.memory_space<vmem>>, vector<64x32xf32>,
    %c2 = arith.constant 2 : index
    %c0_17 = arith.constant 0 : index
    %c0_18 = arith.constant 0 : index
    %18 = vector.load %arg2[%c2, %c0_17, %c0_18] : memref<3x4x32xbf16, #tpu.memory_space<vmem>>, vector<1x4x32xbf16>
    %19 = vector.shape_cast %18 : vector<1x4x32xbf16> to vector<4x32xbf16>
    %cst_19 = arith.constant dense<0.000000e+00> : vector<64x32xf32>
    %20 = tpu.matmul %1, %19, %cst_19 {dimension_numbers = #tpu.dot_dimension_numbers<[1], [0], [0], [1], [0, 0, 1, 1], [], []>} : vector<64x4xbf16>, vector<4x32xbf16>, vector<64x32xf32> -> vector<64x32xf32>
    %c2_20 = arith.constant 2 : index
    %c0_21 = arith.constant 0 : index
    %c0_22 = arith.constant 0 : index
    %21 = vector.load %arg4[%c2_20, %c0_21, %c0_22] : memref<3x1x32xf32, #tpu.memory_space<vmem>>, vector<1x1x32xf32>
    %22 = vector.shape_cast %21 : vector<1x1x32xf32> to vector<1x32xf32>
    %23 = vector.broadcast %22 : vector<1x32xf32> to vector<64x32xf32>
    %24 = arith.addf %20, %23 : vector<64x32xf32>
    %c0_23 = arith.constant 0 : index
    %c0_24 = arith.constant 0 : index
    %25 = vector.load %arg20[%c0_23, %c0_24] : memref<64x32xf32, #tpu.memory_space<vmem>>, vector<64x32xf32>
    tpu.vector_store %arg20[%c0_23, %c0_24], %24 {strides = array<i32>} : memref<64x32xf32, #tpu.memory_space<vmem>>, vector<64x32xf32>,
    %cst_25 = arith.constant 0.000000e+00 : f32
    %26 = vector.broadcast %cst_25 : f32 to vector<8x32xf32>
    %c0_26 = arith.constant 0 : index
    %c0_27 = arith.constant 0 : index
    %27 = vector.load %arg21[%c0_26, %c0_27] : memref<8x32xf32, #tpu.memory_space<vmem>>, vector<8x32xf32>
    tpu.vector_store %arg21[%c0_26, %c0_27], %26 {strides = array<i32>} : memref<8x32xf32, #tpu.memory_space<vmem>>, vector<8x32xf32>,
    %cst_28 = arith.constant 0.000000e+00 : f32
    %28 = vector.broadcast %cst_28 : f32 to vector<8x32xf32>
    %c0_29 = arith.constant 0 : index
    %c0_30 = arith.constant 0 : index
    %29 = vector.load %arg22[%c0_29, %c0_30] : memref<8x32xf32, #tpu.memory_space<vmem>>, vector<8x32xf32>
    tpu.vector_store %arg22[%c0_29, %c0_30], %28 {strides = array<i32>} : memref<8x32xf32, #tpu.memory_space<vmem>>, vector<8x32xf32>,
    %c0_31 = arith.constant 0 : index
    %c0_32 = arith.constant 0 : index
    %c0_33 = arith.constant 0 : index
    %30 = vector.load %arg3[%c0_31, %c0_32, %c0_33] : memref<3x32x32xbf16, #tpu.memory_space<vmem>>, vector<1x32x32xbf16>
    %31 = vector.shape_cast %30 : vector<1x32x32xbf16> to vector<32x32xbf16>
    %c1_34 = arith.constant 1 : index
    %c0_35 = arith.constant 0 : index
    %c0_36 = arith.constant 0 : index
    %32 = vector.load %arg3[%c1_34, %c0_35, %c0_36] : memref<3x32x32xbf16, #tpu.memory_space<vmem>>, vector<1x32x32xbf16>
    %33 = vector.shape_cast %32 : vector<1x32x32xbf16> to vector<32x32xbf16>
    %c2_37 = arith.constant 2 : index
    %c0_38 = arith.constant 0 : index
    %c0_39 = arith.constant 0 : index
    %34 = vector.load %arg3[%c2_37, %c0_38, %c0_39] : memref<3x32x32xbf16, #tpu.memory_space<vmem>>, vector<1x32x32xbf16>
    %35 = vector.shape_cast %34 : vector<1x32x32xbf16> to vector<32x32xbf16>
    %c0_40 = arith.constant 0 : index
    %c0_41 = arith.constant 0 : index
    %c0_42 = arith.constant 0 : index
    %36 = vector.load %arg5[%c0_40, %c0_41, %c0_42] : memref<3x1x32xf32, #tpu.memory_space<vmem>>, vector<1x1x32xf32>
    %37 = vector.shape_cast %36 : vector<1x1x32xf32> to vector<1x32xf32>
    %c1_43 = arith.constant 1 : index
    %c0_44 = arith.constant 0 : index
    %c0_45 = arith.constant 0 : index
    %38 = vector.load %arg5[%c1_43, %c0_44, %c0_45] : memref<3x1x32xf32, #tpu.memory_space<vmem>>, vector<1x1x32xf32>
    %39 = vector.shape_cast %38 : vector<1x1x32xf32> to vector<1x32xf32>
    %c2_46 = arith.constant 2 : index
    %c0_47 = arith.constant 0 : index
    %c0_48 = arith.constant 0 : index
    %40 = vector.load %arg5[%c2_46, %c0_47, %c0_48] : memref<3x1x32xf32, #tpu.memory_space<vmem>>, vector<1x1x32xf32>
    %41 = vector.shape_cast %40 : vector<1x1x32xf32> to vector<1x32xf32>
    %c0_49 = arith.constant 0 : index
    %c0_50 = arith.constant 0 : index
    %c0_51 = arith.constant 0 : index
    %42 = vector.load %arg6[%c0_49, %c0_50, %c0_51] : memref<3x32x32xbf16, #tpu.memory_space<vmem>>, vector<1x32x32xbf16>
    %43 = vector.shape_cast %42 : vector<1x32x32xbf16> to vector<32x32xbf16>
    %c1_52 = arith.constant 1 : index
    %c0_53 = arith.constant 0 : index
    %c0_54 = arith.constant 0 : index
    %44 = vector.load %arg6[%c1_52, %c0_53, %c0_54] : memref<3x32x32xbf16, #tpu.memory_space<vmem>>, vector<1x32x32xbf16>
    %45 = vector.shape_cast %44 : vector<1x32x32xbf16> to vector<32x32xbf16>
    %c2_55 = arith.constant 2 : index
    %c0_56 = arith.constant 0 : index
    %c0_57 = arith.constant 0 : index
    %46 = vector.load %arg6[%c2_55, %c0_56, %c0_57] : memref<3x32x32xbf16, #tpu.memory_space<vmem>>, vector<1x32x32xbf16>
    %47 = vector.shape_cast %46 : vector<1x32x32xbf16> to vector<32x32xbf16>
    %c0_58 = arith.constant 0 : index
    %c0_59 = arith.constant 0 : index
    %c0_60 = arith.constant 0 : index
    %48 = vector.load %arg8[%c0_58, %c0_59, %c0_60] : memref<3x1x32xf32, #tpu.memory_space<vmem>>, vector<1x1x32xf32>
    %49 = vector.shape_cast %48 : vector<1x1x32xf32> to vector<1x32xf32>
    %c1_61 = arith.constant 1 : index
    %c0_62 = arith.constant 0 : index
    %c0_63 = arith.constant 0 : index
    %50 = vector.load %arg8[%c1_61, %c0_62, %c0_63] : memref<3x1x32xf32, #tpu.memory_space<vmem>>, vector<1x1x32xf32>
    %51 = vector.shape_cast %50 : vector<1x1x32xf32> to vector<1x32xf32>
    %c2_64 = arith.constant 2 : index
    %c0_65 = arith.constant 0 : index
    %c0_66 = arith.constant 0 : index
    %52 = vector.load %arg8[%c2_64, %c0_65, %c0_66] : memref<3x1x32xf32, #tpu.memory_space<vmem>>, vector<1x1x32xf32>
    %53 = vector.shape_cast %52 : vector<1x1x32xf32> to vector<1x32xf32>
    %c0_67 = arith.constant 0 : index
    %c0_68 = arith.constant 0 : index
    %c0_69 = arith.constant 0 : index
    %54 = vector.load %arg7[%c0_67, %c0_68, %c0_69] : memref<3x32x32xbf16, #tpu.memory_space<vmem>>, vector<1x32x32xbf16>
    %55 = vector.shape_cast %54 : vector<1x32x32xbf16> to vector<32x32xbf16>
    %c1_70 = arith.constant 1 : index
    %c0_71 = arith.constant 0 : index
    %c0_72 = arith.constant 0 : index
    %56 = vector.load %arg7[%c1_70, %c0_71, %c0_72] : memref<3x32x32xbf16, #tpu.memory_space<vmem>>, vector<1x32x32xbf16>
    %57 = vector.shape_cast %56 : vector<1x32x32xbf16> to vector<32x32xbf16>
    %c2_73 = arith.constant 2 : index
    %c0_74 = arith.constant 0 : index
    %c0_75 = arith.constant 0 : index
    %58 = vector.load %arg7[%c2_73, %c0_74, %c0_75] : memref<3x32x32xbf16, #tpu.memory_space<vmem>>, vector<1x32x32xbf16>
    %59 = vector.shape_cast %58 : vector<1x32x32xbf16> to vector<32x32xbf16>
    %c0_76 = arith.constant 0 : index
    %c0_77 = arith.constant 0 : index
    %c0_78 = arith.constant 0 : index
    %60 = vector.load %arg9[%c0_76, %c0_77, %c0_78] : memref<3x1x32xf32, #tpu.memory_space<vmem>>, vector<1x1x32xf32>
    %61 = vector.shape_cast %60 : vector<1x1x32xf32> to vector<1x32xf32>
    %c1_79 = arith.constant 1 : index
    %c0_80 = arith.constant 0 : index
    %c0_81 = arith.constant 0 : index
    %62 = vector.load %arg9[%c1_79, %c0_80, %c0_81] : memref<3x1x32xf32, #tpu.memory_space<vmem>>, vector<1x1x32xf32>
    %63 = vector.shape_cast %62 : vector<1x1x32xf32> to vector<1x32xf32>
    %c2_82 = arith.constant 2 : index
    %c0_83 = arith.constant 0 : index
    %c0_84 = arith.constant 0 : index
    %64 = vector.load %arg9[%c2_82, %c0_83, %c0_84] : memref<3x1x32xf32, #tpu.memory_space<vmem>>, vector<1x1x32xf32>
    %65 = vector.shape_cast %64 : vector<1x1x32xf32> to vector<1x32xf32>
    %c0_85 = arith.constant 0 : index
    %c0_86 = arith.constant 0 : index
    %66 = vector.load %arg10[%c0_85, %c0_86] : memref<32x4xbf16, #tpu.memory_space<vmem>>, vector<32x4xbf16>
    %c0_87 = arith.constant 0 : index
    %c0_88 = arith.constant 0 : index
    %67 = vector.load %arg11[%c0_87, %c0_88] : memref<1x4xf32, #tpu.memory_space<vmem>>, vector<1x4xf32>
    %c0_i32 = arith.constant 0 : i32
    %c8_i32 = arith.constant 8 : i32
    %68 = arith.muli %c0_i32, %c8_i32 : i32
    %69 = tpu.assume_multiple %68, 8 : i32
    %c0_89 = arith.constant 0 : index
    %c0_90 = arith.constant 0 : index
    %70 = vector.load %arg21[%c0_89, %c0_90] : memref<8x32xf32, #tpu.memory_space<vmem>>, vector<8x32xf32>
    %71 = arith.truncf %70 : vector<8x32xf32> to vector<8x32xbf16>
    %cst_91 = arith.constant dense<0.000000e+00> : vector<8x32xf32>
    %72 = tpu.matmul %71, %31, %cst_91 {dimension_numbers = #tpu.dot_dimension_numbers<[1], [0], [0], [1], [0, 0, 1, 1], [], []>} : vector<8x32xbf16>, vector<32x32xbf16>, vector<8x32xf32> -> vector<8x32xf32>
    %73 = vector.broadcast %37 : vector<1x32xf32> to vector<8x32xf32>
    %74 = arith.addf %72, %73 : vector<8x32xf32>
    %cst_92 = arith.constant dense<0.000000e+00> : vector<8x32xf32>
    %75 = tpu.matmul %71, %33, %cst_92 {dimension_numbers = #tpu.dot_dimension_numbers<[1], [0], [0], [1], [0, 0, 1, 1], [], []>} : vector<8x32xbf16>, vector<32x32xbf16>, vector<8x32xf32> -> vector<8x32xf32>
    %76 = vector.broadcast %39 : vector<1x32xf32> to vector<8x32xf32>
    %77 = arith.addf %75, %76 : vector<8x32xf32>
    %cst_93 = arith.constant dense<0.000000e+00> : vector<8x32xf32>
    %78 = tpu.matmul %71, %35, %cst_93 {dimension_numbers = #tpu.dot_dimension_numbers<[1], [0], [0], [1], [0, 0, 1, 1], [], []>} : vector<8x32xbf16>, vector<32x32xbf16>, vector<8x32xf32> -> vector<8x32xf32>
    %79 = vector.broadcast %41 : vector<1x32xf32> to vector<8x32xf32>
    %80 = arith.addf %78, %79 : vector<8x32xf32>
    %81 = arith.index_cast %69 : i32 to index
    %c0_94 = arith.constant 0 : index
    %82 = vector.load %arg18[%81, %c0_94] : memref<64x32xf32, #tpu.memory_space<vmem>>, vector<8x32xf32>
    %83 = arith.addf %82, %74 : vector<8x32xf32>
    %84 = arith.negf %83 : vector<8x32xf32>
    %85 = math.exp %84 : vector<8x32xf32>
    %cst_95 = arith.constant 1.000000e+00 : f32
    %86 = vector.broadcast %cst_95 : f32 to vector<8x32xf32>
    %87 = arith.addf %86, %85 : vector<8x32xf32>
    %88 = arith.divf %86, %87 : vector<8x32xf32>
    %89 = arith.index_cast %69 : i32 to index
    %c0_96 = arith.constant 0 : index
    %90 = vector.load %arg19[%89, %c0_96] : memref<64x32xf32, #tpu.memory_space<vmem>>, vector<8x32xf32>
    %91 = arith.addf %90, %77 : vector<8x32xf32>
    %92 = arith.negf %91 : vector<8x32xf32>
    %93 = math.exp %92 : vector<8x32xf32>
    %cst_97 = arith.constant 1.000000e+00 : f32
    %94 = vector.broadcast %cst_97 : f32 to vector<8x32xf32>
    %95 = arith.addf %94, %93 : vector<8x32xf32>
    %96 = arith.divf %94, %95 : vector<8x32xf32>
    %97 = arith.index_cast %69 : i32 to index
    %c0_98 = arith.constant 0 : index
    %98 = vector.load %arg20[%97, %c0_98] : memref<64x32xf32, #tpu.memory_space<vmem>>, vector<8x32xf32>
    %99 = arith.mulf %88, %80 : vector<8x32xf32>
    %100 = arith.addf %98, %99 : vector<8x32xf32>
    %101 = math.tanh %100 : vector<8x32xf32>
    %cst_99 = arith.constant 1.000000e+00 : f32
    %102 = vector.broadcast %cst_99 : f32 to vector<8x32xf32>
    %103 = arith.subf %102, %96 : vector<8x32xf32>
    %104 = arith.mulf %103, %101 : vector<8x32xf32>
    %105 = arith.mulf %96, %70 : vector<8x32xf32>
    %106 = arith.addf %104, %105 : vector<8x32xf32>
    %c0_100 = arith.constant 0 : index
    %c0_101 = arith.constant 0 : index
    %107 = vector.load %arg21[%c0_100, %c0_101] : memref<8x32xf32, #tpu.memory_space<vmem>>, vector<8x32xf32>
    tpu.vector_store %arg21[%c0_100, %c0_101], %106 {strides = array<i32>} : memref<8x32xf32, #tpu.memory_space<vmem>>, vector<8x32xf32>,
    %108 = arith.truncf %106 : vector<8x32xf32> to vector<8x32xbf16>
    %cst_102 = arith.constant dense<0.000000e+00> : vector<8x32xf32>
    %109 = tpu.matmul %108, %43, %cst_102 {dimension_numbers = #tpu.dot_dimension_numbers<[1], [0], [0], [1], [0, 0, 1, 1], [], []>} : vector<8x32xbf16>, vector<32x32xbf16>, vector<8x32xf32> -> vector<8x32xf32>
    %110 = vector.broadcast %49 : vector<1x32xf32> to vector<8x32xf32>
    %111 = arith.addf %109, %110 : vector<8x32xf32>
    %cst_103 = arith.constant dense<0.000000e+00> : vector<8x32xf32>
    %112 = tpu.matmul %108, %45, %cst_103 {dimension_numbers = #tpu.dot_dimension_numbers<[1], [0], [0], [1], [0, 0, 1, 1], [], []>} : vector<8x32xbf16>, vector<32x32xbf16>, vector<8x32xf32> -> vector<8x32xf32>
    %113 = vector.broadcast %51 : vector<1x32xf32> to vector<8x32xf32>
    %114 = arith.addf %112, %113 : vector<8x32xf32>
    %cst_104 = arith.constant dense<0.000000e+00> : vector<8x32xf32>
    %115 = tpu.matmul %108, %47, %cst_104 {dimension_numbers = #tpu.dot_dimension_numbers<[1], [0], [0], [1], [0, 0, 1, 1], [], []>} : vector<8x32xbf16>, vector<32x32xbf16>, vector<8x32xf32> -> vector<8x32xf32>
    %116 = vector.broadcast %53 : vector<1x32xf32> to vector<8x32xf32>
    %117 = arith.addf %115, %116 : vector<8x32xf32>
    %c0_105 = arith.constant 0 : index
    %c0_106 = arith.constant 0 : index
    %118 = vector.load %arg22[%c0_105, %c0_106] : memref<8x32xf32, #tpu.memory_space<vmem>>, vector<8x32xf32>
    %119 = arith.truncf %118 : vector<8x32xf32> to vector<8x32xbf16>
    %cst_107 = arith.constant dense<0.000000e+00> : vector<8x32xf32>
    %120 = tpu.matmul %119, %55, %cst_107 {dimension_numbers = #tpu.dot_dimension_numbers<[1], [0], [0], [1], [0, 0, 1, 1], [], []>} : vector<8x32xbf16>, vector<32x32xbf16>, vector<8x32xf32> -> vector<8x32xf32>
    %121 = vector.broadcast %61 : vector<1x32xf32> to vector<8x32xf32>
    %122 = arith.addf %120, %121 : vector<8x32xf32>
    %cst_108 = arith.constant dense<0.000000e+00> : vector<8x32xf32>
    %123 = tpu.matmul %119, %57, %cst_108 {dimension_numbers = #tpu.dot_dimension_numbers<[1], [0], [0], [1], [0, 0, 1, 1], [], []>} : vector<8x32xbf16>, vector<32x32xbf16>, vector<8x32xf32> -> vector<8x32xf32>
    %124 = vector.broadcast %63 : vector<1x32xf32> to vector<8x32xf32>
    %125 = arith.addf %123, %124 : vector<8x32xf32>
    %cst_109 = arith.constant dense<0.000000e+00> : vector<8x32xf32>
    %126 = tpu.matmul %119, %59, %cst_109 {dimension_numbers = #tpu.dot_dimension_numbers<[1], [0], [0], [1], [0, 0, 1, 1], [], []>} : vector<8x32xbf16>, vector<32x32xbf16>, vector<8x32xf32> -> vector<8x32xf32>
    %127 = vector.broadcast %65 : vector<1x32xf32> to vector<8x32xf32>
    %128 = arith.addf %126, %127 : vector<8x32xf32>
    %129 = arith.addf %111, %122 : vector<8x32xf32>
    %130 = arith.negf %129 : vector<8x32xf32>
    %131 = math.exp %130 : vector<8x32xf32>
    %cst_110 = arith.constant 1.000000e+00 : f32
    %132 = vector.broadcast %cst_110 : f32 to vector<8x32xf32>
    %133 = arith.addf %132, %131 : vector<8x32xf32>
    %134 = arith.divf %132, %133 : vector<8x32xf32>
    %135 = arith.addf %114, %125 : vector<8x32xf32>
    %136 = arith.negf %135 : vector<8x32xf32>
    %137 = math.exp %136 : vector<8x32xf32>
    %cst_111 = arith.constant 1.000000e+00 : f32
    %138 = vector.broadcast %cst_111 : f32 to vector<8x32xf32>
    %139 = arith.addf %138, %137 : vector<8x32xf32>
    %140 = arith.divf %138, %139 : vector<8x32xf32>
    %141 = arith.mulf %134, %128 : vector<8x32xf32>
    %142 = arith.addf %117, %141 : vector<8x32xf32>
    %143 = math.tanh %142 : vector<8x32xf32>
    %cst_112 = arith.constant 1.000000e+00 : f32
    %144 = vector.broadcast %cst_112 : f32 to vector<8x32xf32>
    %145 = arith.subf %144, %140 : vector<8x32xf32>
    %146 = arith.mulf %145, %143 : vector<8x32xf32>
    %147 = arith.mulf %140, %118 : vector<8x32xf32>
    %148 = arith.addf %146, %147 : vector<8x32xf32>
    %c0_113 = arith.constant 0 : index
    %c0_114 = arith.constant 0 : index
    %149 = vector.load %arg22[%c0_113, %c0_114] : memref<8x32xf32, #tpu.memory_space<vmem>>, vector<8x32xf32>
    tpu.vector_store %arg22[%c0_113, %c0_114], %148 {strides = array<i32>} : memref<8x32xf32, #tpu.memory_space<vmem>>, vector<8x32xf32>,
    %150 = arith.truncf %148 : vector<8x32xf32> to vector<8x32xbf16>
    %cst_115 = arith.constant dense<0.000000e+00> : vector<8x4xf32>
    %151 = tpu.matmul %150, %66, %cst_115 {dimension_numbers = #tpu.dot_dimension_numbers<[1], [0], [0], [1], [0, 0, 1, 1], [], []>} : vector<8x32xbf16>, vector<32x4xbf16>, vector<8x4xf32> -> vector<8x4xf32>
    %152 = vector.broadcast %67 : vector<1x4xf32> to vector<8x4xf32>
    %153 = arith.addf %151, %152 : vector<8x4xf32>
    %154 = arith.index_cast %69 : i32 to index
    %c0_116 = arith.constant 0 : index
    %155 = vector.load %arg1[%154, %c0_116] : memref<64x4xf32, #tpu.memory_space<vmem>>, vector<8x4xf32>
    %156 = arith.index_cast %69 : i32 to index
    %c0_117 = arith.constant 0 : index
    %157 = vector.load %arg0[%156, %c0_117] : memref<64x4xf32, #tpu.memory_space<vmem>>, vector<8x4xf32>
    %158 = arith.mulf %155, %157 : vector<8x4xf32>
    %cst_118 = arith.constant 1.000000e+00 : f32
    %159 = vector.broadcast %cst_118 : f32 to vector<8x4xf32>
    %160 = arith.subf %159, %155 : vector<8x4xf32>
    %161 = arith.mulf %160, %153 : vector<8x4xf32>
    %162 = arith.addf %158, %161 : vector<8x4xf32>
    %163 = arith.index_cast %69 : i32 to index
    %c0_119 = arith.constant 0 : index
    %164 = vector.load %arg15[%163, %c0_119] : memref<64x4xf32, #tpu.memory_space<vmem>>, vector<8x4xf32>
    tpu.vector_store %arg15[%163, %c0_119], %162 {strides = array<i32>} : memref<64x4xf32, #tpu.memory_space<vmem>>, vector<8x4xf32>,
    %c1_i32 = arith.constant 1 : i32
    %c8_i32_120 = arith.constant 8 : i32
    %165 = arith.muli %c1_i32, %c8_i32_120 : i32
    %166 = tpu.assume_multiple %165, 8 : i32
    %c0_121 = arith.constant 0 : index
    %c0_122 = arith.constant 0 : index
    %167 = vector.load %arg21[%c0_121, %c0_122] : memref<8x32xf32, #tpu.memory_space<vmem>>, vector<8x32xf32>
    %168 = arith.truncf %167 : vector<8x32xf32> to vector<8x32xbf16>
    %cst_123 = arith.constant dense<0.000000e+00> : vector<8x32xf32>
    %169 = tpu.matmul %168, %31, %cst_123 {dimension_numbers = #tpu.dot_dimension_numbers<[1], [0], [0], [1], [0, 0, 1, 1], [], []>} : vector<8x32xbf16>, vector<32x32xbf16>, vector<8x32xf32> -> vector<8x32xf32>
    %170 = vector.broadcast %37 : vector<1x32xf32> to vector<8x32xf32>
    %171 = arith.addf %169, %170 : vector<8x32xf32>
    %cst_124 = arith.constant dense<0.000000e+00> : vector<8x32xf32>
    %172 = tpu.matmul %168, %33, %cst_124 {dimension_numbers = #tpu.dot_dimension_numbers<[1], [0], [0], [1], [0, 0, 1, 1], [], []>} : vector<8x32xbf16>, vector<32x32xbf16>, vector<8x32xf32> -> vector<8x32xf32>
    %173 = vector.broadcast %39 : vector<1x32xf32> to vector<8x32xf32>
    %174 = arith.addf %172, %173 : vector<8x32xf32>
    %cst_125 = arith.constant dense<0.000000e+00> : vector<8x32xf32>
    %175 = tpu.matmul %168, %35, %cst_125 {dimension_numbers = #tpu.dot_dimension_numbers<[1], [0], [0], [1], [0, 0, 1, 1], [], []>} : vector<8x32xbf16>, vector<32x32xbf16>, vector<8x32xf32> -> vector<8x32xf32>
    %176 = vector.broadcast %41 : vector<1x32xf32> to vector<8x32xf32>
    %177 = arith.addf %175, %176 : vector<8x32xf32>
    %178 = arith.index_cast %166 : i32 to index
    %c0_126 = arith.constant 0 : index
    %179 = vector.load %arg18[%178, %c0_126] : memref<64x32xf32, #tpu.memory_space<vmem>>, vector<8x32xf32>
    %180 = arith.addf %179, %171 : vector<8x32xf32>
    %181 = arith.negf %180 : vector<8x32xf32>
    %182 = math.exp %181 : vector<8x32xf32>
    %cst_127 = arith.constant 1.000000e+00 : f32
    %183 = vector.broadcast %cst_127 : f32 to vector<8x32xf32>
    %184 = arith.addf %183, %182 : vector<8x32xf32>
    %185 = arith.divf %183, %184 : vector<8x32xf32>
    %186 = arith.index_cast %166 : i32 to index
    %c0_128 = arith.constant 0 : index
    %187 = vector.load %arg19[%186, %c0_128] : memref<64x32xf32, #tpu.memory_space<vmem>>, vector<8x32xf32>
    %188 = arith.addf %187, %174 : vector<8x32xf32>
    %189 = arith.negf %188 : vector<8x32xf32>
    %190 = math.exp %189 : vector<8x32xf32>
    %cst_129 = arith.constant 1.000000e+00 : f32
    %191 = vector.broadcast %cst_129 : f32 to vector<8x32xf32>
    %192 = arith.addf %191, %190 : vector<8x32xf32>
    %193 = arith.divf %191, %192 : vector<8x32xf32>
    %194 = arith.index_cast %166 : i32 to index
    %c0_130 = arith.constant 0 : index
    %195 = vector.load %arg20[%194, %c0_130] : memref<64x32xf32, #tpu.memory_space<vmem>>, vector<8x32xf32>
    %196 = arith.mulf %185, %177 : vector<8x32xf32>
    %197 = arith.addf %195, %196 : vector<8x32xf32>
    %198 = math.tanh %197 : vector<8x32xf32>
    %cst_131 = arith.constant 1.000000e+00 : f32
    %199 = vector.broadcast %cst_131 : f32 to vector<8x32xf32>
    %200 = arith.subf %199, %193 : vector<8x32xf32>
    %201 = arith.mulf %200, %198 : vector<8x32xf32>
    %202 = arith.mulf %193, %167 : vector<8x32xf32>
    %203 = arith.addf %201, %202 : vector<8x32xf32>
    %c0_132 = arith.constant 0 : index
    %c0_133 = arith.constant 0 : index
    %204 = vector.load %arg21[%c0_132, %c0_133] : memref<8x32xf32, #tpu.memory_space<vmem>>, vector<8x32xf32>
    tpu.vector_store %arg21[%c0_132, %c0_133], %203 {strides = array<i32>} : memref<8x32xf32, #tpu.memory_space<vmem>>, vector<8x32xf32>,
    %205 = arith.truncf %203 : vector<8x32xf32> to vector<8x32xbf16>
    %cst_134 = arith.constant dense<0.000000e+00> : vector<8x32xf32>
    %206 = tpu.matmul %205, %43, %cst_134 {dimension_numbers = #tpu.dot_dimension_numbers<[1], [0], [0], [1], [0, 0, 1, 1], [], []>} : vector<8x32xbf16>, vector<32x32xbf16>, vector<8x32xf32> -> vector<8x32xf32>
    %207 = vector.broadcast %49 : vector<1x32xf32> to vector<8x32xf32>
    %208 = arith.addf %206, %207 : vector<8x32xf32>
    %cst_135 = arith.constant dense<0.000000e+00> : vector<8x32xf32>
    %209 = tpu.matmul %205, %45, %cst_135 {dimension_numbers = #tpu.dot_dimension_numbers<[1], [0], [0], [1], [0, 0, 1, 1], [], []>} : vector<8x32xbf16>, vector<32x32xbf16>, vector<8x32xf32> -> vector<8x32xf32>
    %210 = vector.broadcast %51 : vector<1x32xf32> to vector<8x32xf32>
    %211 = arith.addf %209, %210 : vector<8x32xf32>
    %cst_136 = arith.constant dense<0.000000e+00> : vector<8x32xf32>
    %212 = tpu.matmul %205, %47, %cst_136 {dimension_numbers = #tpu.dot_dimension_numbers<[1], [0], [0], [1], [0, 0, 1, 1], [], []>} : vector<8x32xbf16>, vector<32x32xbf16>, vector<8x32xf32> -> vector<8x32xf32>
    %213 = vector.broadcast %53 : vector<1x32xf32> to vector<8x32xf32>
    %214 = arith.addf %212, %213 : vector<8x32xf32>
    %c0_137 = arith.constant 0 : index
    %c0_138 = arith.constant 0 : index
    %215 = vector.load %arg22[%c0_137, %c0_138] : memref<8x32xf32, #tpu.memory_space<vmem>>, vector<8x32xf32>
    %216 = arith.truncf %215 : vector<8x32xf32> to vector<8x32xbf16>
    %cst_139 = arith.constant dense<0.000000e+00> : vector<8x32xf32>
    %217 = tpu.matmul %216, %55, %cst_139 {dimension_numbers = #tpu.dot_dimension_numbers<[1], [0], [0], [1], [0, 0, 1, 1], [], []>} : vector<8x32xbf16>, vector<32x32xbf16>, vector<8x32xf32> -> vector<8x32xf32>
    %218 = vector.broadcast %61 : vector<1x32xf32> to vector<8x32xf32>
    %219 = arith.addf %217, %218 : vector<8x32xf32>
    %cst_140 = arith.constant dense<0.000000e+00> : vector<8x32xf32>
    %220 = tpu.matmul %216, %57, %cst_140 {dimension_numbers = #tpu.dot_dimension_numbers<[1], [0], [0], [1], [0, 0, 1, 1], [], []>} : vector<8x32xbf16>, vector<32x32xbf16>, vector<8x32xf32> -> vector<8x32xf32>
    %221 = vector.broadcast %63 : vector<1x32xf32> to vector<8x32xf32>
    %222 = arith.addf %220, %221 : vector<8x32xf32>
    %cst_141 = arith.constant dense<0.000000e+00> : vector<8x32xf32>
    %223 = tpu.matmul %216, %59, %cst_141 {dimension_numbers = #tpu.dot_dimension_numbers<[1], [0], [0], [1], [0, 0, 1, 1], [], []>} : vector<8x32xbf16>, vector<32x32xbf16>, vector<8x32xf32> -> vector<8x32xf32>
    %224 = vector.broadcast %65 : vector<1x32xf32> to vector<8x32xf32>
    %225 = arith.addf %223, %224 : vector<8x32xf32>
    %226 = arith.addf %208, %219 : vector<8x32xf32>
    %227 = arith.negf %226 : vector<8x32xf32>
    %228 = math.exp %227 : vector<8x32xf32>
    %cst_142 = arith.constant 1.000000e+00 : f32
    %229 = vector.broadcast %cst_142 : f32 to vector<8x32xf32>
    %230 = arith.addf %229, %228 : vector<8x32xf32>
    %231 = arith.divf %229, %230 : vector<8x32xf32>
    %232 = arith.addf %211, %222 : vector<8x32xf32>
    %233 = arith.negf %232 : vector<8x32xf32>
    %234 = math.exp %233 : vector<8x32xf32>
    %cst_143 = arith.constant 1.000000e+00 : f32
    %235 = vector.broadcast %cst_143 : f32 to vector<8x32xf32>
    %236 = arith.addf %235, %234 : vector<8x32xf32>
    %237 = arith.divf %235, %236 : vector<8x32xf32>
    %238 = arith.mulf %231, %225 : vector<8x32xf32>
    %239 = arith.addf %214, %238 : vector<8x32xf32>
    %240 = math.tanh %239 : vector<8x32xf32>
    %cst_144 = arith.constant 1.000000e+00 : f32
    %241 = vector.broadcast %cst_144 : f32 to vector<8x32xf32>
    %242 = arith.subf %241, %237 : vector<8x32xf32>
    %243 = arith.mulf %242, %240 : vector<8x32xf32>
    %244 = arith.mulf %237, %215 : vector<8x32xf32>
    %245 = arith.addf %243, %244 : vector<8x32xf32>
    %c0_145 = arith.constant 0 : index
    %c0_146 = arith.constant 0 : index
    %246 = vector.load %arg22[%c0_145, %c0_146] : memref<8x32xf32, #tpu.memory_space<vmem>>, vector<8x32xf32>
    tpu.vector_store %arg22[%c0_145, %c0_146], %245 {strides = array<i32>} : memref<8x32xf32, #tpu.memory_space<vmem>>, vector<8x32xf32>,
    %247 = arith.truncf %245 : vector<8x32xf32> to vector<8x32xbf16>
    %cst_147 = arith.constant dense<0.000000e+00> : vector<8x4xf32>
    %248 = tpu.matmul %247, %66, %cst_147 {dimension_numbers = #tpu.dot_dimension_numbers<[1], [0], [0], [1], [0, 0, 1, 1], [], []>} : vector<8x32xbf16>, vector<32x4xbf16>, vector<8x4xf32> -> vector<8x4xf32>
    %249 = vector.broadcast %67 : vector<1x4xf32> to vector<8x4xf32>
    %250 = arith.addf %248, %249 : vector<8x4xf32>
    %251 = arith.index_cast %166 : i32 to index
    %c0_148 = arith.constant 0 : index
    %252 = vector.load %arg1[%251, %c0_148] : memref<64x4xf32, #tpu.memory_space<vmem>>, vector<8x4xf32>
    %253 = arith.index_cast %166 : i32 to index
    %c0_149 = arith.constant 0 : index
    %254 = vector.load %arg0[%253, %c0_149] : memref<64x4xf32, #tpu.memory_space<vmem>>, vector<8x4xf32>
    %255 = arith.mulf %252, %254 : vector<8x4xf32>
    %cst_150 = arith.constant 1.000000e+00 : f32
    %256 = vector.broadcast %cst_150 : f32 to vector<8x4xf32>
    %257 = arith.subf %256, %252 : vector<8x4xf32>
    %258 = arith.mulf %257, %250 : vector<8x4xf32>
    %259 = arith.addf %255, %258 : vector<8x4xf32>
    %260 = arith.index_cast %166 : i32 to index
    %c0_151 = arith.constant 0 : index
    %261 = vector.load %arg15[%260, %c0_151] : memref<64x4xf32, #tpu.memory_space<vmem>>, vector<8x4xf32>
    tpu.vector_store %arg15[%260, %c0_151], %259 {strides = array<i32>} : memref<64x4xf32, #tpu.memory_space<vmem>>, vector<8x4xf32>,
    %c2_i32 = arith.constant 2 : i32
    %c8_i32_152 = arith.constant 8 : i32
    %262 = arith.muli %c2_i32, %c8_i32_152 : i32
    %263 = tpu.assume_multiple %262, 8 : i32
    %c0_153 = arith.constant 0 : index
    %c0_154 = arith.constant 0 : index
    %264 = vector.load %arg21[%c0_153, %c0_154] : memref<8x32xf32, #tpu.memory_space<vmem>>, vector<8x32xf32>
    %265 = arith.truncf %264 : vector<8x32xf32> to vector<8x32xbf16>
    %cst_155 = arith.constant dense<0.000000e+00> : vector<8x32xf32>
    %266 = tpu.matmul %265, %31, %cst_155 {dimension_numbers = #tpu.dot_dimension_numbers<[1], [0], [0], [1], [0, 0, 1, 1], [], []>} : vector<8x32xbf16>, vector<32x32xbf16>, vector<8x32xf32> -> vector<8x32xf32>
    %267 = vector.broadcast %37 : vector<1x32xf32> to vector<8x32xf32>
    %268 = arith.addf %266, %267 : vector<8x32xf32>
    %cst_156 = arith.constant dense<0.000000e+00> : vector<8x32xf32>
    %269 = tpu.matmul %265, %33, %cst_156 {dimension_numbers = #tpu.dot_dimension_numbers<[1], [0], [0], [1], [0, 0, 1, 1], [], []>} : vector<8x32xbf16>, vector<32x32xbf16>, vector<8x32xf32> -> vector<8x32xf32>
    %270 = vector.broadcast %39 : vector<1x32xf32> to vector<8x32xf32>
    %271 = arith.addf %269, %270 : vector<8x32xf32>
    %cst_157 = arith.constant dense<0.000000e+00> : vector<8x32xf32>
    %272 = tpu.matmul %265, %35, %cst_157 {dimension_numbers = #tpu.dot_dimension_numbers<[1], [0], [0], [1], [0, 0, 1, 1], [], []>} : vector<8x32xbf16>, vector<32x32xbf16>, vector<8x32xf32> -> vector<8x32xf32>
    %273 = vector.broadcast %41 : vector<1x32xf32> to vector<8x32xf32>
    %274 = arith.addf %272, %273 : vector<8x32xf32>
    %275 = arith.index_cast %263 : i32 to index
    %c0_158 = arith.constant 0 : index
    %276 = vector.load %arg18[%275, %c0_158] : memref<64x32xf32, #tpu.memory_space<vmem>>, vector<8x32xf32>
    %277 = arith.addf %276, %268 : vector<8x32xf32>
    %278 = arith.negf %277 : vector<8x32xf32>
    %279 = math.exp %278 : vector<8x32xf32>
    %cst_159 = arith.constant 1.000000e+00 : f32
    %280 = vector.broadcast %cst_159 : f32 to vector<8x32xf32>
    %281 = arith.addf %280, %279 : vector<8x32xf32>
    %282 = arith.divf %280, %281 : vector<8x32xf32>
    %283 = arith.index_cast %263 : i32 to index
    %c0_160 = arith.constant 0 : index
    %284 = vector.load %arg19[%283, %c0_160] : memref<64x32xf32, #tpu.memory_space<vmem>>, vector<8x32xf32>
    %285 = arith.addf %284, %271 : vector<8x32xf32>
    %286 = arith.negf %285 : vector<8x32xf32>
    %287 = math.exp %286 : vector<8x32xf32>
    %cst_161 = arith.constant 1.000000e+00 : f32
    %288 = vector.broadcast %cst_161 : f32 to vector<8x32xf32>
    %289 = arith.addf %288, %287 : vector<8x32xf32>
    %290 = arith.divf %288, %289 : vector<8x32xf32>
    %291 = arith.index_cast %263 : i32 to index
    %c0_162 = arith.constant 0 : index
    %292 = vector.load %arg20[%291, %c0_162] : memref<64x32xf32, #tpu.memory_space<vmem>>, vector<8x32xf32>
    %293 = arith.mulf %282, %274 : vector<8x32xf32>
    %294 = arith.addf %292, %293 : vector<8x32xf32>
    %295 = math.tanh %294 : vector<8x32xf32>
    %cst_163 = arith.constant 1.000000e+00 : f32
    %296 = vector.broadcast %cst_163 : f32 to vector<8x32xf32>
    %297 = arith.subf %296, %290 : vector<8x32xf32>
    %298 = arith.mulf %297, %295 : vector<8x32xf32>
    %299 = arith.mulf %290, %264 : vector<8x32xf32>
    %300 = arith.addf %298, %299 : vector<8x32xf32>
    %c0_164 = arith.constant 0 : index
    %c0_165 = arith.constant 0 : index
    %301 = vector.load %arg21[%c0_164, %c0_165] : memref<8x32xf32, #tpu.memory_space<vmem>>, vector<8x32xf32>
    tpu.vector_store %arg21[%c0_164, %c0_165], %300 {strides = array<i32>} : memref<8x32xf32, #tpu.memory_space<vmem>>, vector<8x32xf32>,
    %302 = arith.truncf %300 : vector<8x32xf32> to vector<8x32xbf16>
    %cst_166 = arith.constant dense<0.000000e+00> : vector<8x32xf32>
    %303 = tpu.matmul %302, %43, %cst_166 {dimension_numbers = #tpu.dot_dimension_numbers<[1], [0], [0], [1], [0, 0, 1, 1], [], []>} : vector<8x32xbf16>, vector<32x32xbf16>, vector<8x32xf32> -> vector<8x32xf32>
    %304 = vector.broadcast %49 : vector<1x32xf32> to vector<8x32xf32>
    %305 = arith.addf %303, %304 : vector<8x32xf32>
    %cst_167 = arith.constant dense<0.000000e+00> : vector<8x32xf32>
    %306 = tpu.matmul %302, %45, %cst_167 {dimension_numbers = #tpu.dot_dimension_numbers<[1], [0], [0], [1], [0, 0, 1, 1], [], []>} : vector<8x32xbf16>, vector<32x32xbf16>, vector<8x32xf32> -> vector<8x32xf32>
    %307 = vector.broadcast %51 : vector<1x32xf32> to vector<8x32xf32>
    %308 = arith.addf %306, %307 : vector<8x32xf32>
    %cst_168 = arith.constant dense<0.000000e+00> : vector<8x32xf32>
    %309 = tpu.matmul %302, %47, %cst_168 {dimension_numbers = #tpu.dot_dimension_numbers<[1], [0], [0], [1], [0, 0, 1, 1], [], []>} : vector<8x32xbf16>, vector<32x32xbf16>, vector<8x32xf32> -> vector<8x32xf32>
    %310 = vector.broadcast %53 : vector<1x32xf32> to vector<8x32xf32>
    %311 = arith.addf %309, %310 : vector<8x32xf32>
    %c0_169 = arith.constant 0 : index
    %c0_170 = arith.constant 0 : index
    %312 = vector.load %arg22[%c0_169, %c0_170] : memref<8x32xf32, #tpu.memory_space<vmem>>, vector<8x32xf32>
    %313 = arith.truncf %312 : vector<8x32xf32> to vector<8x32xbf16>
    %cst_171 = arith.constant dense<0.000000e+00> : vector<8x32xf32>
    %314 = tpu.matmul %313, %55, %cst_171 {dimension_numbers = #tpu.dot_dimension_numbers<[1], [0], [0], [1], [0, 0, 1, 1], [], []>} : vector<8x32xbf16>, vector<32x32xbf16>, vector<8x32xf32> -> vector<8x32xf32>
    %315 = vector.broadcast %61 : vector<1x32xf32> to vector<8x32xf32>
    %316 = arith.addf %314, %315 : vector<8x32xf32>
    %cst_172 = arith.constant dense<0.000000e+00> : vector<8x32xf32>
    %317 = tpu.matmul %313, %57, %cst_172 {dimension_numbers = #tpu.dot_dimension_numbers<[1], [0], [0], [1], [0, 0, 1, 1], [], []>} : vector<8x32xbf16>, vector<32x32xbf16>, vector<8x32xf32> -> vector<8x32xf32>
    %318 = vector.broadcast %63 : vector<1x32xf32> to vector<8x32xf32>
    %319 = arith.addf %317, %318 : vector<8x32xf32>
    %cst_173 = arith.constant dense<0.000000e+00> : vector<8x32xf32>
    %320 = tpu.matmul %313, %59, %cst_173 {dimension_numbers = #tpu.dot_dimension_numbers<[1], [0], [0], [1], [0, 0, 1, 1], [], []>} : vector<8x32xbf16>, vector<32x32xbf16>, vector<8x32xf32> -> vector<8x32xf32>
    %321 = vector.broadcast %65 : vector<1x32xf32> to vector<8x32xf32>
    %322 = arith.addf %320, %321 : vector<8x32xf32>
    %323 = arith.addf %305, %316 : vector<8x32xf32>
    %324 = arith.negf %323 : vector<8x32xf32>
    %325 = math.exp %324 : vector<8x32xf32>
    %cst_174 = arith.constant 1.000000e+00 : f32
    %326 = vector.broadcast %cst_174 : f32 to vector<8x32xf32>
    %327 = arith.addf %326, %325 : vector<8x32xf32>
    %328 = arith.divf %326, %327 : vector<8x32xf32>
    %329 = arith.addf %308, %319 : vector<8x32xf32>
    %330 = arith.negf %329 : vector<8x32xf32>
    %331 = math.exp %330 : vector<8x32xf32>
    %cst_175 = arith.constant 1.000000e+00 : f32
    %332 = vector.broadcast %cst_175 : f32 to vector<8x32xf32>
    %333 = arith.addf %332, %331 : vector<8x32xf32>
    %334 = arith.divf %332, %333 : vector<8x32xf32>
    %335 = arith.mulf %328, %322 : vector<8x32xf32>
    %336 = arith.addf %311, %335 : vector<8x32xf32>
    %337 = math.tanh %336 : vector<8x32xf32>
    %cst_176 = arith.constant 1.000000e+00 : f32
    %338 = vector.broadcast %cst_176 : f32 to vector<8x32xf32>
    %339 = arith.subf %338, %334 : vector<8x32xf32>
    %340 = arith.mulf %339, %337 : vector<8x32xf32>
    %341 = arith.mulf %334, %312 : vector<8x32xf32>
    %342 = arith.addf %340, %341 : vector<8x32xf32>
    %c0_177 = arith.constant 0 : index
    %c0_178 = arith.constant 0 : index
    %343 = vector.load %arg22[%c0_177, %c0_178] : memref<8x32xf32, #tpu.memory_space<vmem>>, vector<8x32xf32>
    tpu.vector_store %arg22[%c0_177, %c0_178], %342 {strides = array<i32>} : memref<8x32xf32, #tpu.memory_space<vmem>>, vector<8x32xf32>,
    %344 = arith.truncf %342 : vector<8x32xf32> to vector<8x32xbf16>
    %cst_179 = arith.constant dense<0.000000e+00> : vector<8x4xf32>
    %345 = tpu.matmul %344, %66, %cst_179 {dimension_numbers = #tpu.dot_dimension_numbers<[1], [0], [0], [1], [0, 0, 1, 1], [], []>} : vector<8x32xbf16>, vector<32x4xbf16>, vector<8x4xf32> -> vector<8x4xf32>
    %346 = vector.broadcast %67 : vector<1x4xf32> to vector<8x4xf32>
    %347 = arith.addf %345, %346 : vector<8x4xf32>
    %348 = arith.index_cast %263 : i32 to index
    %c0_180 = arith.constant 0 : index
    %349 = vector.load %arg1[%348, %c0_180] : memref<64x4xf32, #tpu.memory_space<vmem>>, vector<8x4xf32>
    %350 = arith.index_cast %263 : i32 to index
    %c0_181 = arith.constant 0 : index
    %351 = vector.load %arg0[%350, %c0_181] : memref<64x4xf32, #tpu.memory_space<vmem>>, vector<8x4xf32>
    %352 = arith.mulf %349, %351 : vector<8x4xf32>
    %cst_182 = arith.constant 1.000000e+00 : f32
    %353 = vector.broadcast %cst_182 : f32 to vector<8x4xf32>
    %354 = arith.subf %353, %349 : vector<8x4xf32>
    %355 = arith.mulf %354, %347 : vector<8x4xf32>
    %356 = arith.addf %352, %355 : vector<8x4xf32>
    %357 = arith.index_cast %263 : i32 to index
    %c0_183 = arith.constant 0 : index
    %358 = vector.load %arg15[%357, %c0_183] : memref<64x4xf32, #tpu.memory_space<vmem>>, vector<8x4xf32>
    tpu.vector_store %arg15[%357, %c0_183], %356 {strides = array<i32>} : memref<64x4xf32, #tpu.memory_space<vmem>>, vector<8x4xf32>,
    %c3_i32 = arith.constant 3 : i32
    %c8_i32_184 = arith.constant 8 : i32
    %359 = arith.muli %c3_i32, %c8_i32_184 : i32
    %360 = tpu.assume_multiple %359, 8 : i32
    %c0_185 = arith.constant 0 : index
    %c0_186 = arith.constant 0 : index
    %361 = vector.load %arg21[%c0_185, %c0_186] : memref<8x32xf32, #tpu.memory_space<vmem>>, vector<8x32xf32>
    %362 = arith.truncf %361 : vector<8x32xf32> to vector<8x32xbf16>
    %cst_187 = arith.constant dense<0.000000e+00> : vector<8x32xf32>
    %363 = tpu.matmul %362, %31, %cst_187 {dimension_numbers = #tpu.dot_dimension_numbers<[1], [0], [0], [1], [0, 0, 1, 1], [], []>} : vector<8x32xbf16>, vector<32x32xbf16>, vector<8x32xf32> -> vector<8x32xf32>
    %364 = vector.broadcast %37 : vector<1x32xf32> to vector<8x32xf32>
    %365 = arith.addf %363, %364 : vector<8x32xf32>
    %cst_188 = arith.constant dense<0.000000e+00> : vector<8x32xf32>
    %366 = tpu.matmul %362, %33, %cst_188 {dimension_numbers = #tpu.dot_dimension_numbers<[1], [0], [0], [1], [0, 0, 1, 1], [], []>} : vector<8x32xbf16>, vector<32x32xbf16>, vector<8x32xf32> -> vector<8x32xf32>
    %367 = vector.broadcast %39 : vector<1x32xf32> to vector<8x32xf32>
    %368 = arith.addf %366, %367 : vector<8x32xf32>
    %cst_189 = arith.constant dense<0.000000e+00> : vector<8x32xf32>
    %369 = tpu.matmul %362, %35, %cst_189 {dimension_numbers = #tpu.dot_dimension_numbers<[1], [0], [0], [1], [0, 0, 1, 1], [], []>} : vector<8x32xbf16>, vector<32x32xbf16>, vector<8x32xf32> -> vector<8x32xf32>
    %370 = vector.broadcast %41 : vector<1x32xf32> to vector<8x32xf32>
    %371 = arith.addf %369, %370 : vector<8x32xf32>
    %372 = arith.index_cast %360 : i32 to index
    %c0_190 = arith.constant 0 : index
    %373 = vector.load %arg18[%372, %c0_190] : memref<64x32xf32, #tpu.memory_space<vmem>>, vector<8x32xf32>
    %374 = arith.addf %373, %365 : vector<8x32xf32>
    %375 = arith.negf %374 : vector<8x32xf32>
    %376 = math.exp %375 : vector<8x32xf32>
    %cst_191 = arith.constant 1.000000e+00 : f32
    %377 = vector.broadcast %cst_191 : f32 to vector<8x32xf32>
    %378 = arith.addf %377, %376 : vector<8x32xf32>
    %379 = arith.divf %377, %378 : vector<8x32xf32>
    %380 = arith.index_cast %360 : i32 to index
    %c0_192 = arith.constant 0 : index
    %381 = vector.load %arg19[%380, %c0_192] : memref<64x32xf32, #tpu.memory_space<vmem>>, vector<8x32xf32>
    %382 = arith.addf %381, %368 : vector<8x32xf32>
    %383 = arith.negf %382 : vector<8x32xf32>
    %384 = math.exp %383 : vector<8x32xf32>
    %cst_193 = arith.constant 1.000000e+00 : f32
    %385 = vector.broadcast %cst_193 : f32 to vector<8x32xf32>
    %386 = arith.addf %385, %384 : vector<8x32xf32>
    %387 = arith.divf %385, %386 : vector<8x32xf32>
    %388 = arith.index_cast %360 : i32 to index
    %c0_194 = arith.constant 0 : index
    %389 = vector.load %arg20[%388, %c0_194] : memref<64x32xf32, #tpu.memory_space<vmem>>, vector<8x32xf32>
    %390 = arith.mulf %379, %371 : vector<8x32xf32>
    %391 = arith.addf %389, %390 : vector<8x32xf32>
    %392 = math.tanh %391 : vector<8x32xf32>
    %cst_195 = arith.constant 1.000000e+00 : f32
    %393 = vector.broadcast %cst_195 : f32 to vector<8x32xf32>
    %394 = arith.subf %393, %387 : vector<8x32xf32>
    %395 = arith.mulf %394, %392 : vector<8x32xf32>
    %396 = arith.mulf %387, %361 : vector<8x32xf32>
    %397 = arith.addf %395, %396 : vector<8x32xf32>
    %c0_196 = arith.constant 0 : index
    %c0_197 = arith.constant 0 : index
    %398 = vector.load %arg21[%c0_196, %c0_197] : memref<8x32xf32, #tpu.memory_space<vmem>>, vector<8x32xf32>
    tpu.vector_store %arg21[%c0_196, %c0_197], %397 {strides = array<i32>} : memref<8x32xf32, #tpu.memory_space<vmem>>, vector<8x32xf32>,
    %399 = arith.truncf %397 : vector<8x32xf32> to vector<8x32xbf16>
    %cst_198 = arith.constant dense<0.000000e+00> : vector<8x32xf32>
    %400 = tpu.matmul %399, %43, %cst_198 {dimension_numbers = #tpu.dot_dimension_numbers<[1], [0], [0], [1], [0, 0, 1, 1], [], []>} : vector<8x32xbf16>, vector<32x32xbf16>, vector<8x32xf32> -> vector<8x32xf32>
    %401 = vector.broadcast %49 : vector<1x32xf32> to vector<8x32xf32>
    %402 = arith.addf %400, %401 : vector<8x32xf32>
    %cst_199 = arith.constant dense<0.000000e+00> : vector<8x32xf32>
    %403 = tpu.matmul %399, %45, %cst_199 {dimension_numbers = #tpu.dot_dimension_numbers<[1], [0], [0], [1], [0, 0, 1, 1], [], []>} : vector<8x32xbf16>, vector<32x32xbf16>, vector<8x32xf32> -> vector<8x32xf32>
    %404 = vector.broadcast %51 : vector<1x32xf32> to vector<8x32xf32>
    %405 = arith.addf %403, %404 : vector<8x32xf32>
    %cst_200 = arith.constant dense<0.000000e+00> : vector<8x32xf32>
    %406 = tpu.matmul %399, %47, %cst_200 {dimension_numbers = #tpu.dot_dimension_numbers<[1], [0], [0], [1], [0, 0, 1, 1], [], []>} : vector<8x32xbf16>, vector<32x32xbf16>, vector<8x32xf32> -> vector<8x32xf32>
    %407 = vector.broadcast %53 : vector<1x32xf32> to vector<8x32xf32>
    %408 = arith.addf %406, %407 : vector<8x32xf32>
    %c0_201 = arith.constant 0 : index
    %c0_202 = arith.constant 0 : index
    %409 = vector.load %arg22[%c0_201, %c0_202] : memref<8x32xf32, #tpu.memory_space<vmem>>, vector<8x32xf32>
    %410 = arith.truncf %409 : vector<8x32xf32> to vector<8x32xbf16>
    %cst_203 = arith.constant dense<0.000000e+00> : vector<8x32xf32>
    %411 = tpu.matmul %410, %55, %cst_203 {dimension_numbers = #tpu.dot_dimension_numbers<[1], [0], [0], [1], [0, 0, 1, 1], [], []>} : vector<8x32xbf16>, vector<32x32xbf16>, vector<8x32xf32> -> vector<8x32xf32>
    %412 = vector.broadcast %61 : vector<1x32xf32> to vector<8x32xf32>
    %413 = arith.addf %411, %412 : vector<8x32xf32>
    %cst_204 = arith.constant dense<0.000000e+00> : vector<8x32xf32>
    %414 = tpu.matmul %410, %57, %cst_204 {dimension_numbers = #tpu.dot_dimension_numbers<[1], [0], [0], [1], [0, 0, 1, 1], [], []>} : vector<8x32xbf16>, vector<32x32xbf16>, vector<8x32xf32> -> vector<8x32xf32>
    %415 = vector.broadcast %63 : vector<1x32xf32> to vector<8x32xf32>
    %416 = arith.addf %414, %415 : vector<8x32xf32>
    %cst_205 = arith.constant dense<0.000000e+00> : vector<8x32xf32>
    %417 = tpu.matmul %410, %59, %cst_205 {dimension_numbers = #tpu.dot_dimension_numbers<[1], [0], [0], [1], [0, 0, 1, 1], [], []>} : vector<8x32xbf16>, vector<32x32xbf16>, vector<8x32xf32> -> vector<8x32xf32>
    %418 = vector.broadcast %65 : vector<1x32xf32> to vector<8x32xf32>
    %419 = arith.addf %417, %418 : vector<8x32xf32>
    %420 = arith.addf %402, %413 : vector<8x32xf32>
    %421 = arith.negf %420 : vector<8x32xf32>
    %422 = math.exp %421 : vector<8x32xf32>
    %cst_206 = arith.constant 1.000000e+00 : f32
    %423 = vector.broadcast %cst_206 : f32 to vector<8x32xf32>
    %424 = arith.addf %423, %422 : vector<8x32xf32>
    %425 = arith.divf %423, %424 : vector<8x32xf32>
    %426 = arith.addf %405, %416 : vector<8x32xf32>
    %427 = arith.negf %426 : vector<8x32xf32>
    %428 = math.exp %427 : vector<8x32xf32>
    %cst_207 = arith.constant 1.000000e+00 : f32
    %429 = vector.broadcast %cst_207 : f32 to vector<8x32xf32>
    %430 = arith.addf %429, %428 : vector<8x32xf32>
    %431 = arith.divf %429, %430 : vector<8x32xf32>
    %432 = arith.mulf %425, %419 : vector<8x32xf32>
    %433 = arith.addf %408, %432 : vector<8x32xf32>
    %434 = math.tanh %433 : vector<8x32xf32>
    %cst_208 = arith.constant 1.000000e+00 : f32
    %435 = vector.broadcast %cst_208 : f32 to vector<8x32xf32>
    %436 = arith.subf %435, %431 : vector<8x32xf32>
    %437 = arith.mulf %436, %434 : vector<8x32xf32>
    %438 = arith.mulf %431, %409 : vector<8x32xf32>
    %439 = arith.addf %437, %438 : vector<8x32xf32>
    %c0_209 = arith.constant 0 : index
    %c0_210 = arith.constant 0 : index
    %440 = vector.load %arg22[%c0_209, %c0_210] : memref<8x32xf32, #tpu.memory_space<vmem>>, vector<8x32xf32>
    tpu.vector_store %arg22[%c0_209, %c0_210], %439 {strides = array<i32>} : memref<8x32xf32, #tpu.memory_space<vmem>>, vector<8x32xf32>,
    %441 = arith.truncf %439 : vector<8x32xf32> to vector<8x32xbf16>
    %cst_211 = arith.constant dense<0.000000e+00> : vector<8x4xf32>
    %442 = tpu.matmul %441, %66, %cst_211 {dimension_numbers = #tpu.dot_dimension_numbers<[1], [0], [0], [1], [0, 0, 1, 1], [], []>} : vector<8x32xbf16>, vector<32x4xbf16>, vector<8x4xf32> -> vector<8x4xf32>
    %443 = vector.broadcast %67 : vector<1x4xf32> to vector<8x4xf32>
    %444 = arith.addf %442, %443 : vector<8x4xf32>
    %445 = arith.index_cast %360 : i32 to index
    %c0_212 = arith.constant 0 : index
    %446 = vector.load %arg1[%445, %c0_212] : memref<64x4xf32, #tpu.memory_space<vmem>>, vector<8x4xf32>
    %447 = arith.index_cast %360 : i32 to index
    %c0_213 = arith.constant 0 : index
    %448 = vector.load %arg0[%447, %c0_213] : memref<64x4xf32, #tpu.memory_space<vmem>>, vector<8x4xf32>
    %449 = arith.mulf %446, %448 : vector<8x4xf32>
    %cst_214 = arith.constant 1.000000e+00 : f32
    %450 = vector.broadcast %cst_214 : f32 to vector<8x4xf32>
    %451 = arith.subf %450, %446 : vector<8x4xf32>
    %452 = arith.mulf %451, %444 : vector<8x4xf32>
    %453 = arith.addf %449, %452 : vector<8x4xf32>
    %454 = arith.index_cast %360 : i32 to index
    %c0_215 = arith.constant 0 : index
    %455 = vector.load %arg15[%454, %c0_215] : memref<64x4xf32, #tpu.memory_space<vmem>>, vector<8x4xf32>
    tpu.vector_store %arg15[%454, %c0_215], %453 {strides = array<i32>} : memref<64x4xf32, #tpu.memory_space<vmem>>, vector<8x4xf32>,
    %c4_i32 = arith.constant 4 : i32
    %c8_i32_216 = arith.constant 8 : i32
    %456 = arith.muli %c4_i32, %c8_i32_216 : i32
    %457 = tpu.assume_multiple %456, 8 : i32
    %c0_217 = arith.constant 0 : index
    %c0_218 = arith.constant 0 : index
    %458 = vector.load %arg21[%c0_217, %c0_218] : memref<8x32xf32, #tpu.memory_space<vmem>>, vector<8x32xf32>
    %459 = arith.truncf %458 : vector<8x32xf32> to vector<8x32xbf16>
    %cst_219 = arith.constant dense<0.000000e+00> : vector<8x32xf32>
    %460 = tpu.matmul %459, %31, %cst_219 {dimension_numbers = #tpu.dot_dimension_numbers<[1], [0], [0], [1], [0, 0, 1, 1], [], []>} : vector<8x32xbf16>, vector<32x32xbf16>, vector<8x32xf32> -> vector<8x32xf32>
    %461 = vector.broadcast %37 : vector<1x32xf32> to vector<8x32xf32>
    %462 = arith.addf %460, %461 : vector<8x32xf32>
    %cst_220 = arith.constant dense<0.000000e+00> : vector<8x32xf32>
    %463 = tpu.matmul %459, %33, %cst_220 {dimension_numbers = #tpu.dot_dimension_numbers<[1], [0], [0], [1], [0, 0, 1, 1], [], []>} : vector<8x32xbf16>, vector<32x32xbf16>, vector<8x32xf32> -> vector<8x32xf32>
    %464 = vector.broadcast %39 : vector<1x32xf32> to vector<8x32xf32>
    %465 = arith.addf %463, %464 : vector<8x32xf32>
    %cst_221 = arith.constant dense<0.000000e+00> : vector<8x32xf32>
    %466 = tpu.matmul %459, %35, %cst_221 {dimension_numbers = #tpu.dot_dimension_numbers<[1], [0], [0], [1], [0, 0, 1, 1], [], []>} : vector<8x32xbf16>, vector<32x32xbf16>, vector<8x32xf32> -> vector<8x32xf32>
    %467 = vector.broadcast %41 : vector<1x32xf32> to vector<8x32xf32>
    %468 = arith.addf %466, %467 : vector<8x32xf32>
    %469 = arith.index_cast %457 : i32 to index
    %c0_222 = arith.constant 0 : index
    %470 = vector.load %arg18[%469, %c0_222] : memref<64x32xf32, #tpu.memory_space<vmem>>, vector<8x32xf32>
    %471 = arith.addf %470, %462 : vector<8x32xf32>
    %472 = arith.negf %471 : vector<8x32xf32>
    %473 = math.exp %472 : vector<8x32xf32>
    %cst_223 = arith.constant 1.000000e+00 : f32
    %474 = vector.broadcast %cst_223 : f32 to vector<8x32xf32>
    %475 = arith.addf %474, %473 : vector<8x32xf32>
    %476 = arith.divf %474, %475 : vector<8x32xf32>
    %477 = arith.index_cast %457 : i32 to index
    %c0_224 = arith.constant 0 : index
    %478 = vector.load %arg19[%477, %c0_224] : memref<64x32xf32, #tpu.memory_space<vmem>>, vector<8x32xf32>
    %479 = arith.addf %478, %465 : vector<8x32xf32>
    %480 = arith.negf %479 : vector<8x32xf32>
    %481 = math.exp %480 : vector<8x32xf32>
    %cst_225 = arith.constant 1.000000e+00 : f32
    %482 = vector.broadcast %cst_225 : f32 to vector<8x32xf32>
    %483 = arith.addf %482, %481 : vector<8x32xf32>
    %484 = arith.divf %482, %483 : vector<8x32xf32>
    %485 = arith.index_cast %457 : i32 to index
    %c0_226 = arith.constant 0 : index
    %486 = vector.load %arg20[%485, %c0_226] : memref<64x32xf32, #tpu.memory_space<vmem>>, vector<8x32xf32>
    %487 = arith.mulf %476, %468 : vector<8x32xf32>
    %488 = arith.addf %486, %487 : vector<8x32xf32>
    %489 = math.tanh %488 : vector<8x32xf32>
    %cst_227 = arith.constant 1.000000e+00 : f32
    %490 = vector.broadcast %cst_227 : f32 to vector<8x32xf32>
    %491 = arith.subf %490, %484 : vector<8x32xf32>
    %492 = arith.mulf %491, %489 : vector<8x32xf32>
    %493 = arith.mulf %484, %458 : vector<8x32xf32>
    %494 = arith.addf %492, %493 : vector<8x32xf32>
    %c0_228 = arith.constant 0 : index
    %c0_229 = arith.constant 0 : index
    %495 = vector.load %arg21[%c0_228, %c0_229] : memref<8x32xf32, #tpu.memory_space<vmem>>, vector<8x32xf32>
    tpu.vector_store %arg21[%c0_228, %c0_229], %494 {strides = array<i32>} : memref<8x32xf32, #tpu.memory_space<vmem>>, vector<8x32xf32>,
    %496 = arith.truncf %494 : vector<8x32xf32> to vector<8x32xbf16>
    %cst_230 = arith.constant dense<0.000000e+00> : vector<8x32xf32>
    %497 = tpu.matmul %496, %43, %cst_230 {dimension_numbers = #tpu.dot_dimension_numbers<[1], [0], [0], [1], [0, 0, 1, 1], [], []>} : vector<8x32xbf16>, vector<32x32xbf16>, vector<8x32xf32> -> vector<8x32xf32>
    %498 = vector.broadcast %49 : vector<1x32xf32> to vector<8x32xf32>
    %499 = arith.addf %497, %498 : vector<8x32xf32>
    %cst_231 = arith.constant dense<0.000000e+00> : vector<8x32xf32>
    %500 = tpu.matmul %496, %45, %cst_231 {dimension_numbers = #tpu.dot_dimension_numbers<[1], [0], [0], [1], [0, 0, 1, 1], [], []>} : vector<8x32xbf16>, vector<32x32xbf16>, vector<8x32xf32> -> vector<8x32xf32>
    %501 = vector.broadcast %51 : vector<1x32xf32> to vector<8x32xf32>
    %502 = arith.addf %500, %501 : vector<8x32xf32>
    %cst_232 = arith.constant dense<0.000000e+00> : vector<8x32xf32>
    %503 = tpu.matmul %496, %47, %cst_232 {dimension_numbers = #tpu.dot_dimension_numbers<[1], [0], [0], [1], [0, 0, 1, 1], [], []>} : vector<8x32xbf16>, vector<32x32xbf16>, vector<8x32xf32> -> vector<8x32xf32>
    %504 = vector.broadcast %53 : vector<1x32xf32> to vector<8x32xf32>
    %505 = arith.addf %503, %504 : vector<8x32xf32>
    %c0_233 = arith.constant 0 : index
    %c0_234 = arith.constant 0 : index
    %506 = vector.load %arg22[%c0_233, %c0_234] : memref<8x32xf32, #tpu.memory_space<vmem>>, vector<8x32xf32>
    %507 = arith.truncf %506 : vector<8x32xf32> to vector<8x32xbf16>
    %cst_235 = arith.constant dense<0.000000e+00> : vector<8x32xf32>
    %508 = tpu.matmul %507, %55, %cst_235 {dimension_numbers = #tpu.dot_dimension_numbers<[1], [0], [0], [1], [0, 0, 1, 1], [], []>} : vector<8x32xbf16>, vector<32x32xbf16>, vector<8x32xf32> -> vector<8x32xf32>
    %509 = vector.broadcast %61 : vector<1x32xf32> to vector<8x32xf32>
    %510 = arith.addf %508, %509 : vector<8x32xf32>
    %cst_236 = arith.constant dense<0.000000e+00> : vector<8x32xf32>
    %511 = tpu.matmul %507, %57, %cst_236 {dimension_numbers = #tpu.dot_dimension_numbers<[1], [0], [0], [1], [0, 0, 1, 1], [], []>} : vector<8x32xbf16>, vector<32x32xbf16>, vector<8x32xf32> -> vector<8x32xf32>
    %512 = vector.broadcast %63 : vector<1x32xf32> to vector<8x32xf32>
    %513 = arith.addf %511, %512 : vector<8x32xf32>
    %cst_237 = arith.constant dense<0.000000e+00> : vector<8x32xf32>
    %514 = tpu.matmul %507, %59, %cst_237 {dimension_numbers = #tpu.dot_dimension_numbers<[1], [0], [0], [1], [0, 0, 1, 1], [], []>} : vector<8x32xbf16>, vector<32x32xbf16>, vector<8x32xf32> -> vector<8x32xf32>
    %515 = vector.broadcast %65 : vector<1x32xf32> to vector<8x32xf32>
    %516 = arith.addf %514, %515 : vector<8x32xf32>
    %517 = arith.addf %499, %510 : vector<8x32xf32>
    %518 = arith.negf %517 : vector<8x32xf32>
    %519 = math.exp %518 : vector<8x32xf32>
    %cst_238 = arith.constant 1.000000e+00 : f32
    %520 = vector.broadcast %cst_238 : f32 to vector<8x32xf32>
    %521 = arith.addf %520, %519 : vector<8x32xf32>
    %522 = arith.divf %520, %521 : vector<8x32xf32>
    %523 = arith.addf %502, %513 : vector<8x32xf32>
    %524 = arith.negf %523 : vector<8x32xf32>
    %525 = math.exp %524 : vector<8x32xf32>
    %cst_239 = arith.constant 1.000000e+00 : f32
    %526 = vector.broadcast %cst_239 : f32 to vector<8x32xf32>
    %527 = arith.addf %526, %525 : vector<8x32xf32>
    %528 = arith.divf %526, %527 : vector<8x32xf32>
    %529 = arith.mulf %522, %516 : vector<8x32xf32>
    %530 = arith.addf %505, %529 : vector<8x32xf32>
    %531 = math.tanh %530 : vector<8x32xf32>
    %cst_240 = arith.constant 1.000000e+00 : f32
    %532 = vector.broadcast %cst_240 : f32 to vector<8x32xf32>
    %533 = arith.subf %532, %528 : vector<8x32xf32>
    %534 = arith.mulf %533, %531 : vector<8x32xf32>
    %535 = arith.mulf %528, %506 : vector<8x32xf32>
    %536 = arith.addf %534, %535 : vector<8x32xf32>
    %c0_241 = arith.constant 0 : index
    %c0_242 = arith.constant 0 : index
    %537 = vector.load %arg22[%c0_241, %c0_242] : memref<8x32xf32, #tpu.memory_space<vmem>>, vector<8x32xf32>
    tpu.vector_store %arg22[%c0_241, %c0_242], %536 {strides = array<i32>} : memref<8x32xf32, #tpu.memory_space<vmem>>, vector<8x32xf32>,
    %538 = arith.truncf %536 : vector<8x32xf32> to vector<8x32xbf16>
    %cst_243 = arith.constant dense<0.000000e+00> : vector<8x4xf32>
    %539 = tpu.matmul %538, %66, %cst_243 {dimension_numbers = #tpu.dot_dimension_numbers<[1], [0], [0], [1], [0, 0, 1, 1], [], []>} : vector<8x32xbf16>, vector<32x4xbf16>, vector<8x4xf32> -> vector<8x4xf32>
    %540 = vector.broadcast %67 : vector<1x4xf32> to vector<8x4xf32>
    %541 = arith.addf %539, %540 : vector<8x4xf32>
    %542 = arith.index_cast %457 : i32 to index
    %c0_244 = arith.constant 0 : index
    %543 = vector.load %arg1[%542, %c0_244] : memref<64x4xf32, #tpu.memory_space<vmem>>, vector<8x4xf32>
    %544 = arith.index_cast %457 : i32 to index
    %c0_245 = arith.constant 0 : index
    %545 = vector.load %arg0[%544, %c0_245] : memref<64x4xf32, #tpu.memory_space<vmem>>, vector<8x4xf32>
    %546 = arith.mulf %543, %545 : vector<8x4xf32>
    %cst_246 = arith.constant 1.000000e+00 : f32
    %547 = vector.broadcast %cst_246 : f32 to vector<8x4xf32>
    %548 = arith.subf %547, %543 : vector<8x4xf32>
    %549 = arith.mulf %548, %541 : vector<8x4xf32>
    %550 = arith.addf %546, %549 : vector<8x4xf32>
    %551 = arith.index_cast %457 : i32 to index
    %c0_247 = arith.constant 0 : index
    %552 = vector.load %arg15[%551, %c0_247] : memref<64x4xf32, #tpu.memory_space<vmem>>, vector<8x4xf32>
    tpu.vector_store %arg15[%551, %c0_247], %550 {strides = array<i32>} : memref<64x4xf32, #tpu.memory_space<vmem>>, vector<8x4xf32>,
    %c5_i32 = arith.constant 5 : i32
    %c8_i32_248 = arith.constant 8 : i32
    %553 = arith.muli %c5_i32, %c8_i32_248 : i32
    %554 = tpu.assume_multiple %553, 8 : i32
    %c0_249 = arith.constant 0 : index
    %c0_250 = arith.constant 0 : index
    %555 = vector.load %arg21[%c0_249, %c0_250] : memref<8x32xf32, #tpu.memory_space<vmem>>, vector<8x32xf32>
    %556 = arith.truncf %555 : vector<8x32xf32> to vector<8x32xbf16>
    %cst_251 = arith.constant dense<0.000000e+00> : vector<8x32xf32>
    %557 = tpu.matmul %556, %31, %cst_251 {dimension_numbers = #tpu.dot_dimension_numbers<[1], [0], [0], [1], [0, 0, 1, 1], [], []>} : vector<8x32xbf16>, vector<32x32xbf16>, vector<8x32xf32> -> vector<8x32xf32>
    %558 = vector.broadcast %37 : vector<1x32xf32> to vector<8x32xf32>
    %559 = arith.addf %557, %558 : vector<8x32xf32>
    %cst_252 = arith.constant dense<0.000000e+00> : vector<8x32xf32>
    %560 = tpu.matmul %556, %33, %cst_252 {dimension_numbers = #tpu.dot_dimension_numbers<[1], [0], [0], [1], [0, 0, 1, 1], [], []>} : vector<8x32xbf16>, vector<32x32xbf16>, vector<8x32xf32> -> vector<8x32xf32>
    %561 = vector.broadcast %39 : vector<1x32xf32> to vector<8x32xf32>
    %562 = arith.addf %560, %561 : vector<8x32xf32>
    %cst_253 = arith.constant dense<0.000000e+00> : vector<8x32xf32>
    %563 = tpu.matmul %556, %35, %cst_253 {dimension_numbers = #tpu.dot_dimension_numbers<[1], [0], [0], [1], [0, 0, 1, 1], [], []>} : vector<8x32xbf16>, vector<32x32xbf16>, vector<8x32xf32> -> vector<8x32xf32>
    %564 = vector.broadcast %41 : vector<1x32xf32> to vector<8x32xf32>
    %565 = arith.addf %563, %564 : vector<8x32xf32>
    %566 = arith.index_cast %554 : i32 to index
    %c0_254 = arith.constant 0 : index
    %567 = vector.load %arg18[%566, %c0_254] : memref<64x32xf32, #tpu.memory_space<vmem>>, vector<8x32xf32>
    %568 = arith.addf %567, %559 : vector<8x32xf32>
    %569 = arith.negf %568 : vector<8x32xf32>
    %570 = math.exp %569 : vector<8x32xf32>
    %cst_255 = arith.constant 1.000000e+00 : f32
    %571 = vector.broadcast %cst_255 : f32 to vector<8x32xf32>
    %572 = arith.addf %571, %570 : vector<8x32xf32>
    %573 = arith.divf %571, %572 : vector<8x32xf32>
    %574 = arith.index_cast %554 : i32 to index
    %c0_256 = arith.constant 0 : index
    %575 = vector.load %arg19[%574, %c0_256] : memref<64x32xf32, #tpu.memory_space<vmem>>, vector<8x32xf32>
    %576 = arith.addf %575, %562 : vector<8x32xf32>
    %577 = arith.negf %576 : vector<8x32xf32>
    %578 = math.exp %577 : vector<8x32xf32>
    %cst_257 = arith.constant 1.000000e+00 : f32
    %579 = vector.broadcast %cst_257 : f32 to vector<8x32xf32>
    %580 = arith.addf %579, %578 : vector<8x32xf32>
    %581 = arith.divf %579, %580 : vector<8x32xf32>
    %582 = arith.index_cast %554 : i32 to index
    %c0_258 = arith.constant 0 : index
    %583 = vector.load %arg20[%582, %c0_258] : memref<64x32xf32, #tpu.memory_space<vmem>>, vector<8x32xf32>
    %584 = arith.mulf %573, %565 : vector<8x32xf32>
    %585 = arith.addf %583, %584 : vector<8x32xf32>
    %586 = math.tanh %585 : vector<8x32xf32>
    %cst_259 = arith.constant 1.000000e+00 : f32
    %587 = vector.broadcast %cst_259 : f32 to vector<8x32xf32>
    %588 = arith.subf %587, %581 : vector<8x32xf32>
    %589 = arith.mulf %588, %586 : vector<8x32xf32>
    %590 = arith.mulf %581, %555 : vector<8x32xf32>
    %591 = arith.addf %589, %590 : vector<8x32xf32>
    %c0_260 = arith.constant 0 : index
    %c0_261 = arith.constant 0 : index
    %592 = vector.load %arg21[%c0_260, %c0_261] : memref<8x32xf32, #tpu.memory_space<vmem>>, vector<8x32xf32>
    tpu.vector_store %arg21[%c0_260, %c0_261], %591 {strides = array<i32>} : memref<8x32xf32, #tpu.memory_space<vmem>>, vector<8x32xf32>,
    %593 = arith.truncf %591 : vector<8x32xf32> to vector<8x32xbf16>
    %cst_262 = arith.constant dense<0.000000e+00> : vector<8x32xf32>
    %594 = tpu.matmul %593, %43, %cst_262 {dimension_numbers = #tpu.dot_dimension_numbers<[1], [0], [0], [1], [0, 0, 1, 1], [], []>} : vector<8x32xbf16>, vector<32x32xbf16>, vector<8x32xf32> -> vector<8x32xf32>
    %595 = vector.broadcast %49 : vector<1x32xf32> to vector<8x32xf32>
    %596 = arith.addf %594, %595 : vector<8x32xf32>
    %cst_263 = arith.constant dense<0.000000e+00> : vector<8x32xf32>
    %597 = tpu.matmul %593, %45, %cst_263 {dimension_numbers = #tpu.dot_dimension_numbers<[1], [0], [0], [1], [0, 0, 1, 1], [], []>} : vector<8x32xbf16>, vector<32x32xbf16>, vector<8x32xf32> -> vector<8x32xf32>
    %598 = vector.broadcast %51 : vector<1x32xf32> to vector<8x32xf32>
    %599 = arith.addf %597, %598 : vector<8x32xf32>
    %cst_264 = arith.constant dense<0.000000e+00> : vector<8x32xf32>
    %600 = tpu.matmul %593, %47, %cst_264 {dimension_numbers = #tpu.dot_dimension_numbers<[1], [0], [0], [1], [0, 0, 1, 1], [], []>} : vector<8x32xbf16>, vector<32x32xbf16>, vector<8x32xf32> -> vector<8x32xf32>
    %601 = vector.broadcast %53 : vector<1x32xf32> to vector<8x32xf32>
    %602 = arith.addf %600, %601 : vector<8x32xf32>
    %c0_265 = arith.constant 0 : index
    %c0_266 = arith.constant 0 : index
    %603 = vector.load %arg22[%c0_265, %c0_266] : memref<8x32xf32, #tpu.memory_space<vmem>>, vector<8x32xf32>
    %604 = arith.truncf %603 : vector<8x32xf32> to vector<8x32xbf16>
    %cst_267 = arith.constant dense<0.000000e+00> : vector<8x32xf32>
    %605 = tpu.matmul %604, %55, %cst_267 {dimension_numbers = #tpu.dot_dimension_numbers<[1], [0], [0], [1], [0, 0, 1, 1], [], []>} : vector<8x32xbf16>, vector<32x32xbf16>, vector<8x32xf32> -> vector<8x32xf32>
    %606 = vector.broadcast %61 : vector<1x32xf32> to vector<8x32xf32>
    %607 = arith.addf %605, %606 : vector<8x32xf32>
    %cst_268 = arith.constant dense<0.000000e+00> : vector<8x32xf32>
    %608 = tpu.matmul %604, %57, %cst_268 {dimension_numbers = #tpu.dot_dimension_numbers<[1], [0], [0], [1], [0, 0, 1, 1], [], []>} : vector<8x32xbf16>, vector<32x32xbf16>, vector<8x32xf32> -> vector<8x32xf32>
    %609 = vector.broadcast %63 : vector<1x32xf32> to vector<8x32xf32>
    %610 = arith.addf %608, %609 : vector<8x32xf32>
    %cst_269 = arith.constant dense<0.000000e+00> : vector<8x32xf32>
    %611 = tpu.matmul %604, %59, %cst_269 {dimension_numbers = #tpu.dot_dimension_numbers<[1], [0], [0], [1], [0, 0, 1, 1], [], []>} : vector<8x32xbf16>, vector<32x32xbf16>, vector<8x32xf32> -> vector<8x32xf32>
    %612 = vector.broadcast %65 : vector<1x32xf32> to vector<8x32xf32>
    %613 = arith.addf %611, %612 : vector<8x32xf32>
    %614 = arith.addf %596, %607 : vector<8x32xf32>
    %615 = arith.negf %614 : vector<8x32xf32>
    %616 = math.exp %615 : vector<8x32xf32>
    %cst_270 = arith.constant 1.000000e+00 : f32
    %617 = vector.broadcast %cst_270 : f32 to vector<8x32xf32>
    %618 = arith.addf %617, %616 : vector<8x32xf32>
    %619 = arith.divf %617, %618 : vector<8x32xf32>
    %620 = arith.addf %599, %610 : vector<8x32xf32>
    %621 = arith.negf %620 : vector<8x32xf32>
    %622 = math.exp %621 : vector<8x32xf32>
    %cst_271 = arith.constant 1.000000e+00 : f32
    %623 = vector.broadcast %cst_271 : f32 to vector<8x32xf32>
    %624 = arith.addf %623, %622 : vector<8x32xf32>
    %625 = arith.divf %623, %624 : vector<8x32xf32>
    %626 = arith.mulf %619, %613 : vector<8x32xf32>
    %627 = arith.addf %602, %626 : vector<8x32xf32>
    %628 = math.tanh %627 : vector<8x32xf32>
    %cst_272 = arith.constant 1.000000e+00 : f32
    %629 = vector.broadcast %cst_272 : f32 to vector<8x32xf32>
    %630 = arith.subf %629, %625 : vector<8x32xf32>
    %631 = arith.mulf %630, %628 : vector<8x32xf32>
    %632 = arith.mulf %625, %603 : vector<8x32xf32>
    %633 = arith.addf %631, %632 : vector<8x32xf32>
    %c0_273 = arith.constant 0 : index
    %c0_274 = arith.constant 0 : index
    %634 = vector.load %arg22[%c0_273, %c0_274] : memref<8x32xf32, #tpu.memory_space<vmem>>, vector<8x32xf32>
    tpu.vector_store %arg22[%c0_273, %c0_274], %633 {strides = array<i32>} : memref<8x32xf32, #tpu.memory_space<vmem>>, vector<8x32xf32>,
    %635 = arith.truncf %633 : vector<8x32xf32> to vector<8x32xbf16>
    %cst_275 = arith.constant dense<0.000000e+00> : vector<8x4xf32>
    %636 = tpu.matmul %635, %66, %cst_275 {dimension_numbers = #tpu.dot_dimension_numbers<[1], [0], [0], [1], [0, 0, 1, 1], [], []>} : vector<8x32xbf16>, vector<32x4xbf16>, vector<8x4xf32> -> vector<8x4xf32>
    %637 = vector.broadcast %67 : vector<1x4xf32> to vector<8x4xf32>
    %638 = arith.addf %636, %637 : vector<8x4xf32>
    %639 = arith.index_cast %554 : i32 to index
    %c0_276 = arith.constant 0 : index
    %640 = vector.load %arg1[%639, %c0_276] : memref<64x4xf32, #tpu.memory_space<vmem>>, vector<8x4xf32>
    %641 = arith.index_cast %554 : i32 to index
    %c0_277 = arith.constant 0 : index
    %642 = vector.load %arg0[%641, %c0_277] : memref<64x4xf32, #tpu.memory_space<vmem>>, vector<8x4xf32>
    %643 = arith.mulf %640, %642 : vector<8x4xf32>
    %cst_278 = arith.constant 1.000000e+00 : f32
    %644 = vector.broadcast %cst_278 : f32 to vector<8x4xf32>
    %645 = arith.subf %644, %640 : vector<8x4xf32>
    %646 = arith.mulf %645, %638 : vector<8x4xf32>
    %647 = arith.addf %643, %646 : vector<8x4xf32>
    %648 = arith.index_cast %554 : i32 to index
    %c0_279 = arith.constant 0 : index
    %649 = vector.load %arg15[%648, %c0_279] : memref<64x4xf32, #tpu.memory_space<vmem>>, vector<8x4xf32>
    tpu.vector_store %arg15[%648, %c0_279], %647 {strides = array<i32>} : memref<64x4xf32, #tpu.memory_space<vmem>>, vector<8x4xf32>,
    %c6_i32 = arith.constant 6 : i32
    %c8_i32_280 = arith.constant 8 : i32
    %650 = arith.muli %c6_i32, %c8_i32_280 : i32
    %651 = tpu.assume_multiple %650, 8 : i32
    %c0_281 = arith.constant 0 : index
    %c0_282 = arith.constant 0 : index
    %652 = vector.load %arg21[%c0_281, %c0_282] : memref<8x32xf32, #tpu.memory_space<vmem>>, vector<8x32xf32>
    %653 = arith.truncf %652 : vector<8x32xf32> to vector<8x32xbf16>
    %cst_283 = arith.constant dense<0.000000e+00> : vector<8x32xf32>
    %654 = tpu.matmul %653, %31, %cst_283 {dimension_numbers = #tpu.dot_dimension_numbers<[1], [0], [0], [1], [0, 0, 1, 1], [], []>} : vector<8x32xbf16>, vector<32x32xbf16>, vector<8x32xf32> -> vector<8x32xf32>
    %655 = vector.broadcast %37 : vector<1x32xf32> to vector<8x32xf32>
    %656 = arith.addf %654, %655 : vector<8x32xf32>
    %cst_284 = arith.constant dense<0.000000e+00> : vector<8x32xf32>
    %657 = tpu.matmul %653, %33, %cst_284 {dimension_numbers = #tpu.dot_dimension_numbers<[1], [0], [0], [1], [0, 0, 1, 1], [], []>} : vector<8x32xbf16>, vector<32x32xbf16>, vector<8x32xf32> -> vector<8x32xf32>
    %658 = vector.broadcast %39 : vector<1x32xf32> to vector<8x32xf32>
    %659 = arith.addf %657, %658 : vector<8x32xf32>
    %cst_285 = arith.constant dense<0.000000e+00> : vector<8x32xf32>
    %660 = tpu.matmul %653, %35, %cst_285 {dimension_numbers = #tpu.dot_dimension_numbers<[1], [0], [0], [1], [0, 0, 1, 1], [], []>} : vector<8x32xbf16>, vector<32x32xbf16>, vector<8x32xf32> -> vector<8x32xf32>
    %661 = vector.broadcast %41 : vector<1x32xf32> to vector<8x32xf32>
    %662 = arith.addf %660, %661 : vector<8x32xf32>
    %663 = arith.index_cast %651 : i32 to index
    %c0_286 = arith.constant 0 : index
    %664 = vector.load %arg18[%663, %c0_286] : memref<64x32xf32, #tpu.memory_space<vmem>>, vector<8x32xf32>
    %665 = arith.addf %664, %656 : vector<8x32xf32>
    %666 = arith.negf %665 : vector<8x32xf32>
    %667 = math.exp %666 : vector<8x32xf32>
    %cst_287 = arith.constant 1.000000e+00 : f32
    %668 = vector.broadcast %cst_287 : f32 to vector<8x32xf32>
    %669 = arith.addf %668, %667 : vector<8x32xf32>
    %670 = arith.divf %668, %669 : vector<8x32xf32>
    %671 = arith.index_cast %651 : i32 to index
    %c0_288 = arith.constant 0 : index
    %672 = vector.load %arg19[%671, %c0_288] : memref<64x32xf32, #tpu.memory_space<vmem>>, vector<8x32xf32>
    %673 = arith.addf %672, %659 : vector<8x32xf32>
    %674 = arith.negf %673 : vector<8x32xf32>
    %675 = math.exp %674 : vector<8x32xf32>
    %cst_289 = arith.constant 1.000000e+00 : f32
    %676 = vector.broadcast %cst_289 : f32 to vector<8x32xf32>
    %677 = arith.addf %676, %675 : vector<8x32xf32>
    %678 = arith.divf %676, %677 : vector<8x32xf32>
    %679 = arith.index_cast %651 : i32 to index
    %c0_290 = arith.constant 0 : index
    %680 = vector.load %arg20[%679, %c0_290] : memref<64x32xf32, #tpu.memory_space<vmem>>, vector<8x32xf32>
    %681 = arith.mulf %670, %662 : vector<8x32xf32>
    %682 = arith.addf %680, %681 : vector<8x32xf32>
    %683 = math.tanh %682 : vector<8x32xf32>
    %cst_291 = arith.constant 1.000000e+00 : f32
    %684 = vector.broadcast %cst_291 : f32 to vector<8x32xf32>
    %685 = arith.subf %684, %678 : vector<8x32xf32>
    %686 = arith.mulf %685, %683 : vector<8x32xf32>
    %687 = arith.mulf %678, %652 : vector<8x32xf32>
    %688 = arith.addf %686, %687 : vector<8x32xf32>
    %c0_292 = arith.constant 0 : index
    %c0_293 = arith.constant 0 : index
    %689 = vector.load %arg21[%c0_292, %c0_293] : memref<8x32xf32, #tpu.memory_space<vmem>>, vector<8x32xf32>
    tpu.vector_store %arg21[%c0_292, %c0_293], %688 {strides = array<i32>} : memref<8x32xf32, #tpu.memory_space<vmem>>, vector<8x32xf32>,
    %690 = arith.truncf %688 : vector<8x32xf32> to vector<8x32xbf16>
    %cst_294 = arith.constant dense<0.000000e+00> : vector<8x32xf32>
    %691 = tpu.matmul %690, %43, %cst_294 {dimension_numbers = #tpu.dot_dimension_numbers<[1], [0], [0], [1], [0, 0, 1, 1], [], []>} : vector<8x32xbf16>, vector<32x32xbf16>, vector<8x32xf32> -> vector<8x32xf32>
    %692 = vector.broadcast %49 : vector<1x32xf32> to vector<8x32xf32>
    %693 = arith.addf %691, %692 : vector<8x32xf32>
    %cst_295 = arith.constant dense<0.000000e+00> : vector<8x32xf32>
    %694 = tpu.matmul %690, %45, %cst_295 {dimension_numbers = #tpu.dot_dimension_numbers<[1], [0], [0], [1], [0, 0, 1, 1], [], []>} : vector<8x32xbf16>, vector<32x32xbf16>, vector<8x32xf32> -> vector<8x32xf32>
    %695 = vector.broadcast %51 : vector<1x32xf32> to vector<8x32xf32>
    %696 = arith.addf %694, %695 : vector<8x32xf32>
    %cst_296 = arith.constant dense<0.000000e+00> : vector<8x32xf32>
    %697 = tpu.matmul %690, %47, %cst_296 {dimension_numbers = #tpu.dot_dimension_numbers<[1], [0], [0], [1], [0, 0, 1, 1], [], []>} : vector<8x32xbf16>, vector<32x32xbf16>, vector<8x32xf32> -> vector<8x32xf32>
    %698 = vector.broadcast %53 : vector<1x32xf32> to vector<8x32xf32>
    %699 = arith.addf %697, %698 : vector<8x32xf32>
    %c0_297 = arith.constant 0 : index
    %c0_298 = arith.constant 0 : index
    %700 = vector.load %arg22[%c0_297, %c0_298] : memref<8x32xf32, #tpu.memory_space<vmem>>, vector<8x32xf32>
    %701 = arith.truncf %700 : vector<8x32xf32> to vector<8x32xbf16>
    %cst_299 = arith.constant dense<0.000000e+00> : vector<8x32xf32>
    %702 = tpu.matmul %701, %55, %cst_299 {dimension_numbers = #tpu.dot_dimension_numbers<[1], [0], [0], [1], [0, 0, 1, 1], [], []>} : vector<8x32xbf16>, vector<32x32xbf16>, vector<8x32xf32> -> vector<8x32xf32>
    %703 = vector.broadcast %61 : vector<1x32xf32> to vector<8x32xf32>
    %704 = arith.addf %702, %703 : vector<8x32xf32>
    %cst_300 = arith.constant dense<0.000000e+00> : vector<8x32xf32>
    %705 = tpu.matmul %701, %57, %cst_300 {dimension_numbers = #tpu.dot_dimension_numbers<[1], [0], [0], [1], [0, 0, 1, 1], [], []>} : vector<8x32xbf16>, vector<32x32xbf16>, vector<8x32xf32> -> vector<8x32xf32>
    %706 = vector.broadcast %63 : vector<1x32xf32> to vector<8x32xf32>
    %707 = arith.addf %705, %706 : vector<8x32xf32>
    %cst_301 = arith.constant dense<0.000000e+00> : vector<8x32xf32>
    %708 = tpu.matmul %701, %59, %cst_301 {dimension_numbers = #tpu.dot_dimension_numbers<[1], [0], [0], [1], [0, 0, 1, 1], [], []>} : vector<8x32xbf16>, vector<32x32xbf16>, vector<8x32xf32> -> vector<8x32xf32>
    %709 = vector.broadcast %65 : vector<1x32xf32> to vector<8x32xf32>
    %710 = arith.addf %708, %709 : vector<8x32xf32>
    %711 = arith.addf %693, %704 : vector<8x32xf32>
    %712 = arith.negf %711 : vector<8x32xf32>
    %713 = math.exp %712 : vector<8x32xf32>
    %cst_302 = arith.constant 1.000000e+00 : f32
    %714 = vector.broadcast %cst_302 : f32 to vector<8x32xf32>
    %715 = arith.addf %714, %713 : vector<8x32xf32>
    %716 = arith.divf %714, %715 : vector<8x32xf32>
    %717 = arith.addf %696, %707 : vector<8x32xf32>
    %718 = arith.negf %717 : vector<8x32xf32>
    %719 = math.exp %718 : vector<8x32xf32>
    %cst_303 = arith.constant 1.000000e+00 : f32
    %720 = vector.broadcast %cst_303 : f32 to vector<8x32xf32>
    %721 = arith.addf %720, %719 : vector<8x32xf32>
    %722 = arith.divf %720, %721 : vector<8x32xf32>
    %723 = arith.mulf %716, %710 : vector<8x32xf32>
    %724 = arith.addf %699, %723 : vector<8x32xf32>
    %725 = math.tanh %724 : vector<8x32xf32>
    %cst_304 = arith.constant 1.000000e+00 : f32
    %726 = vector.broadcast %cst_304 : f32 to vector<8x32xf32>
    %727 = arith.subf %726, %722 : vector<8x32xf32>
    %728 = arith.mulf %727, %725 : vector<8x32xf32>
    %729 = arith.mulf %722, %700 : vector<8x32xf32>
    %730 = arith.addf %728, %729 : vector<8x32xf32>
    %c0_305 = arith.constant 0 : index
    %c0_306 = arith.constant 0 : index
    %731 = vector.load %arg22[%c0_305, %c0_306] : memref<8x32xf32, #tpu.memory_space<vmem>>, vector<8x32xf32>
    tpu.vector_store %arg22[%c0_305, %c0_306], %730 {strides = array<i32>} : memref<8x32xf32, #tpu.memory_space<vmem>>, vector<8x32xf32>,
    %732 = arith.truncf %730 : vector<8x32xf32> to vector<8x32xbf16>
    %cst_307 = arith.constant dense<0.000000e+00> : vector<8x4xf32>
    %733 = tpu.matmul %732, %66, %cst_307 {dimension_numbers = #tpu.dot_dimension_numbers<[1], [0], [0], [1], [0, 0, 1, 1], [], []>} : vector<8x32xbf16>, vector<32x4xbf16>, vector<8x4xf32> -> vector<8x4xf32>
    %734 = vector.broadcast %67 : vector<1x4xf32> to vector<8x4xf32>
    %735 = arith.addf %733, %734 : vector<8x4xf32>
    %736 = arith.index_cast %651 : i32 to index
    %c0_308 = arith.constant 0 : index
    %737 = vector.load %arg1[%736, %c0_308] : memref<64x4xf32, #tpu.memory_space<vmem>>, vector<8x4xf32>
    %738 = arith.index_cast %651 : i32 to index
    %c0_309 = arith.constant 0 : index
    %739 = vector.load %arg0[%738, %c0_309] : memref<64x4xf32, #tpu.memory_space<vmem>>, vector<8x4xf32>
    %740 = arith.mulf %737, %739 : vector<8x4xf32>
    %cst_310 = arith.constant 1.000000e+00 : f32
    %741 = vector.broadcast %cst_310 : f32 to vector<8x4xf32>
    %742 = arith.subf %741, %737 : vector<8x4xf32>
    %743 = arith.mulf %742, %735 : vector<8x4xf32>
    %744 = arith.addf %740, %743 : vector<8x4xf32>
    %745 = arith.index_cast %651 : i32 to index
    %c0_311 = arith.constant 0 : index
    %746 = vector.load %arg15[%745, %c0_311] : memref<64x4xf32, #tpu.memory_space<vmem>>, vector<8x4xf32>
    tpu.vector_store %arg15[%745, %c0_311], %744 {strides = array<i32>} : memref<64x4xf32, #tpu.memory_space<vmem>>, vector<8x4xf32>,
    %c7_i32 = arith.constant 7 : i32
    %c8_i32_312 = arith.constant 8 : i32
    %747 = arith.muli %c7_i32, %c8_i32_312 : i32
    %748 = tpu.assume_multiple %747, 8 : i32
    %c0_313 = arith.constant 0 : index
    %c0_314 = arith.constant 0 : index
    %749 = vector.load %arg21[%c0_313, %c0_314] : memref<8x32xf32, #tpu.memory_space<vmem>>, vector<8x32xf32>
    %750 = arith.truncf %749 : vector<8x32xf32> to vector<8x32xbf16>
    %cst_315 = arith.constant dense<0.000000e+00> : vector<8x32xf32>
    %751 = tpu.matmul %750, %31, %cst_315 {dimension_numbers = #tpu.dot_dimension_numbers<[1], [0], [0], [1], [0, 0, 1, 1], [], []>} : vector<8x32xbf16>, vector<32x32xbf16>, vector<8x32xf32> -> vector<8x32xf32>
    %752 = vector.broadcast %37 : vector<1x32xf32> to vector<8x32xf32>
    %753 = arith.addf %751, %752 : vector<8x32xf32>
    %cst_316 = arith.constant dense<0.000000e+00> : vector<8x32xf32>
    %754 = tpu.matmul %750, %33, %cst_316 {dimension_numbers = #tpu.dot_dimension_numbers<[1], [0], [0], [1], [0, 0, 1, 1], [], []>} : vector<8x32xbf16>, vector<32x32xbf16>, vector<8x32xf32> -> vector<8x32xf32>
    %755 = vector.broadcast %39 : vector<1x32xf32> to vector<8x32xf32>
    %756 = arith.addf %754, %755 : vector<8x32xf32>
    %cst_317 = arith.constant dense<0.000000e+00> : vector<8x32xf32>
    %757 = tpu.matmul %750, %35, %cst_317 {dimension_numbers = #tpu.dot_dimension_numbers<[1], [0], [0], [1], [0, 0, 1, 1], [], []>} : vector<8x32xbf16>, vector<32x32xbf16>, vector<8x32xf32> -> vector<8x32xf32>
    %758 = vector.broadcast %41 : vector<1x32xf32> to vector<8x32xf32>
    %759 = arith.addf %757, %758 : vector<8x32xf32>
    %760 = arith.index_cast %748 : i32 to index
    %c0_318 = arith.constant 0 : index
    %761 = vector.load %arg18[%760, %c0_318] : memref<64x32xf32, #tpu.memory_space<vmem>>, vector<8x32xf32>
    %762 = arith.addf %761, %753 : vector<8x32xf32>
    %763 = arith.negf %762 : vector<8x32xf32>
    %764 = math.exp %763 : vector<8x32xf32>
    %cst_319 = arith.constant 1.000000e+00 : f32
    %765 = vector.broadcast %cst_319 : f32 to vector<8x32xf32>
    %766 = arith.addf %765, %764 : vector<8x32xf32>
    %767 = arith.divf %765, %766 : vector<8x32xf32>
    %768 = arith.index_cast %748 : i32 to index
    %c0_320 = arith.constant 0 : index
    %769 = vector.load %arg19[%768, %c0_320] : memref<64x32xf32, #tpu.memory_space<vmem>>, vector<8x32xf32>
    %770 = arith.addf %769, %756 : vector<8x32xf32>
    %771 = arith.negf %770 : vector<8x32xf32>
    %772 = math.exp %771 : vector<8x32xf32>
    %cst_321 = arith.constant 1.000000e+00 : f32
    %773 = vector.broadcast %cst_321 : f32 to vector<8x32xf32>
    %774 = arith.addf %773, %772 : vector<8x32xf32>
    %775 = arith.divf %773, %774 : vector<8x32xf32>
    %776 = arith.index_cast %748 : i32 to index
    %c0_322 = arith.constant 0 : index
    %777 = vector.load %arg20[%776, %c0_322] : memref<64x32xf32, #tpu.memory_space<vmem>>, vector<8x32xf32>
    %778 = arith.mulf %767, %759 : vector<8x32xf32>
    %779 = arith.addf %777, %778 : vector<8x32xf32>
    %780 = math.tanh %779 : vector<8x32xf32>
    %cst_323 = arith.constant 1.000000e+00 : f32
    %781 = vector.broadcast %cst_323 : f32 to vector<8x32xf32>
    %782 = arith.subf %781, %775 : vector<8x32xf32>
    %783 = arith.mulf %782, %780 : vector<8x32xf32>
    %784 = arith.mulf %775, %749 : vector<8x32xf32>
    %785 = arith.addf %783, %784 : vector<8x32xf32>
    %c0_324 = arith.constant 0 : index
    %c0_325 = arith.constant 0 : index
    %786 = vector.load %arg21[%c0_324, %c0_325] : memref<8x32xf32, #tpu.memory_space<vmem>>, vector<8x32xf32>
    tpu.vector_store %arg21[%c0_324, %c0_325], %785 {strides = array<i32>} : memref<8x32xf32, #tpu.memory_space<vmem>>, vector<8x32xf32>,
    %787 = arith.truncf %785 : vector<8x32xf32> to vector<8x32xbf16>
    %cst_326 = arith.constant dense<0.000000e+00> : vector<8x32xf32>
    %788 = tpu.matmul %787, %43, %cst_326 {dimension_numbers = #tpu.dot_dimension_numbers<[1], [0], [0], [1], [0, 0, 1, 1], [], []>} : vector<8x32xbf16>, vector<32x32xbf16>, vector<8x32xf32> -> vector<8x32xf32>
    %789 = vector.broadcast %49 : vector<1x32xf32> to vector<8x32xf32>
    %790 = arith.addf %788, %789 : vector<8x32xf32>
    %cst_327 = arith.constant dense<0.000000e+00> : vector<8x32xf32>
    %791 = tpu.matmul %787, %45, %cst_327 {dimension_numbers = #tpu.dot_dimension_numbers<[1], [0], [0], [1], [0, 0, 1, 1], [], []>} : vector<8x32xbf16>, vector<32x32xbf16>, vector<8x32xf32> -> vector<8x32xf32>
    %792 = vector.broadcast %51 : vector<1x32xf32> to vector<8x32xf32>
    %793 = arith.addf %791, %792 : vector<8x32xf32>
    %cst_328 = arith.constant dense<0.000000e+00> : vector<8x32xf32>
    %794 = tpu.matmul %787, %47, %cst_328 {dimension_numbers = #tpu.dot_dimension_numbers<[1], [0], [0], [1], [0, 0, 1, 1], [], []>} : vector<8x32xbf16>, vector<32x32xbf16>, vector<8x32xf32> -> vector<8x32xf32>
    %795 = vector.broadcast %53 : vector<1x32xf32> to vector<8x32xf32>
    %796 = arith.addf %794, %795 : vector<8x32xf32>
    %c0_329 = arith.constant 0 : index
    %c0_330 = arith.constant 0 : index
    %797 = vector.load %arg22[%c0_329, %c0_330] : memref<8x32xf32, #tpu.memory_space<vmem>>, vector<8x32xf32>
    %798 = arith.truncf %797 : vector<8x32xf32> to vector<8x32xbf16>
    %cst_331 = arith.constant dense<0.000000e+00> : vector<8x32xf32>
    %799 = tpu.matmul %798, %55, %cst_331 {dimension_numbers = #tpu.dot_dimension_numbers<[1], [0], [0], [1], [0, 0, 1, 1], [], []>} : vector<8x32xbf16>, vector<32x32xbf16>, vector<8x32xf32> -> vector<8x32xf32>
    %800 = vector.broadcast %61 : vector<1x32xf32> to vector<8x32xf32>
    %801 = arith.addf %799, %800 : vector<8x32xf32>
    %cst_332 = arith.constant dense<0.000000e+00> : vector<8x32xf32>
    %802 = tpu.matmul %798, %57, %cst_332 {dimension_numbers = #tpu.dot_dimension_numbers<[1], [0], [0], [1], [0, 0, 1, 1], [], []>} : vector<8x32xbf16>, vector<32x32xbf16>, vector<8x32xf32> -> vector<8x32xf32>
    %803 = vector.broadcast %63 : vector<1x32xf32> to vector<8x32xf32>
    %804 = arith.addf %802, %803 : vector<8x32xf32>
    %cst_333 = arith.constant dense<0.000000e+00> : vector<8x32xf32>
    %805 = tpu.matmul %798, %59, %cst_333 {dimension_numbers = #tpu.dot_dimension_numbers<[1], [0], [0], [1], [0, 0, 1, 1], [], []>} : vector<8x32xbf16>, vector<32x32xbf16>, vector<8x32xf32> -> vector<8x32xf32>
    %806 = vector.broadcast %65 : vector<1x32xf32> to vector<8x32xf32>
    %807 = arith.addf %805, %806 : vector<8x32xf32>
    %808 = arith.addf %790, %801 : vector<8x32xf32>
    %809 = arith.negf %808 : vector<8x32xf32>
    %810 = math.exp %809 : vector<8x32xf32>
    %cst_334 = arith.constant 1.000000e+00 : f32
    %811 = vector.broadcast %cst_334 : f32 to vector<8x32xf32>
    %812 = arith.addf %811, %810 : vector<8x32xf32>
    %813 = arith.divf %811, %812 : vector<8x32xf32>
    %814 = arith.addf %793, %804 : vector<8x32xf32>
    %815 = arith.negf %814 : vector<8x32xf32>
    %816 = math.exp %815 : vector<8x32xf32>
    %cst_335 = arith.constant 1.000000e+00 : f32
    %817 = vector.broadcast %cst_335 : f32 to vector<8x32xf32>
    %818 = arith.addf %817, %816 : vector<8x32xf32>
    %819 = arith.divf %817, %818 : vector<8x32xf32>
    %820 = arith.mulf %813, %807 : vector<8x32xf32>
    %821 = arith.addf %796, %820 : vector<8x32xf32>
    %822 = math.tanh %821 : vector<8x32xf32>
    %cst_336 = arith.constant 1.000000e+00 : f32
    %823 = vector.broadcast %cst_336 : f32 to vector<8x32xf32>
    %824 = arith.subf %823, %819 : vector<8x32xf32>
    %825 = arith.mulf %824, %822 : vector<8x32xf32>
    %826 = arith.mulf %819, %797 : vector<8x32xf32>
    %827 = arith.addf %825, %826 : vector<8x32xf32>
    %c0_337 = arith.constant 0 : index
    %c0_338 = arith.constant 0 : index
    %828 = vector.load %arg22[%c0_337, %c0_338] : memref<8x32xf32, #tpu.memory_space<vmem>>, vector<8x32xf32>
    tpu.vector_store %arg22[%c0_337, %c0_338], %827 {strides = array<i32>} : memref<8x32xf32, #tpu.memory_space<vmem>>, vector<8x32xf32>,
    %829 = arith.truncf %827 : vector<8x32xf32> to vector<8x32xbf16>
    %cst_339 = arith.constant dense<0.000000e+00> : vector<8x4xf32>
    %830 = tpu.matmul %829, %66, %cst_339 {dimension_numbers = #tpu.dot_dimension_numbers<[1], [0], [0], [1], [0, 0, 1, 1], [], []>} : vector<8x32xbf16>, vector<32x4xbf16>, vector<8x4xf32> -> vector<8x4xf32>
    %831 = vector.broadcast %67 : vector<1x4xf32> to vector<8x4xf32>
    %832 = arith.addf %830, %831 : vector<8x4xf32>
    %833 = arith.index_cast %748 : i32 to index
    %c0_340 = arith.constant 0 : index
    %834 = vector.load %arg1[%833, %c0_340] : memref<64x4xf32, #tpu.memory_space<vmem>>, vector<8x4xf32>
    %835 = arith.index_cast %748 : i32 to index
    %c0_341 = arith.constant 0 : index
    %836 = vector.load %arg0[%835, %c0_341] : memref<64x4xf32, #tpu.memory_space<vmem>>, vector<8x4xf32>
    %837 = arith.mulf %834, %836 : vector<8x4xf32>
    %cst_342 = arith.constant 1.000000e+00 : f32
    %838 = vector.broadcast %cst_342 : f32 to vector<8x4xf32>
    %839 = arith.subf %838, %834 : vector<8x4xf32>
    %840 = arith.mulf %839, %832 : vector<8x4xf32>
    %841 = arith.addf %837, %840 : vector<8x4xf32>
    %842 = arith.index_cast %748 : i32 to index
    %c0_343 = arith.constant 0 : index
    %843 = vector.load %arg15[%842, %c0_343] : memref<64x4xf32, #tpu.memory_space<vmem>>, vector<8x4xf32>
    tpu.vector_store %arg15[%842, %c0_343], %841 {strides = array<i32>} : memref<64x4xf32, #tpu.memory_space<vmem>>, vector<8x4xf32>,
    %c8_i32_344 = arith.constant 8 : i32
    %c0_345 = arith.constant 0 : index
    %c0_346 = arith.constant 0 : index
    %844 = vector.load %arg22[%c0_345, %c0_346] : memref<8x32xf32, #tpu.memory_space<vmem>>, vector<8x32xf32>
    %845 = arith.truncf %844 : vector<8x32xf32> to vector<8x32xbf16>
    %c0_347 = arith.constant 0 : index
    %c0_348 = arith.constant 0 : index
    %846 = vector.load %arg12[%c0_347, %c0_348] : memref<32x16xbf16, #tpu.memory_space<vmem>>, vector<32x16xbf16>
    %cst_349 = arith.constant dense<0.000000e+00> : vector<8x16xf32>
    %847 = tpu.matmul %845, %846, %cst_349 {dimension_numbers = #tpu.dot_dimension_numbers<[1], [0], [0], [1], [0, 0, 1, 1], [], []>} : vector<8x32xbf16>, vector<32x16xbf16>, vector<8x16xf32> -> vector<8x16xf32>
    %c0_350 = arith.constant 0 : index
    %c0_351 = arith.constant 0 : index
    %848 = vector.load %arg13[%c0_350, %c0_351] : memref<1x16xf32, #tpu.memory_space<vmem>>, vector<1x16xf32>
    %849 = vector.broadcast %848 : vector<1x16xf32> to vector<8x16xf32>
    %850 = arith.addf %847, %849 : vector<8x16xf32>
    %c0_352 = arith.constant 0 : index
    %c0_353 = arith.constant 0 : index
    %851 = vector.load %arg16[%c0_352, %c0_353] : memref<8x16xf32, #tpu.memory_space<vmem>>, vector<8x16xf32>
    tpu.vector_store %arg16[%c0_352, %c0_353], %850 {strides = array<i32>} : memref<8x16xf32, #tpu.memory_space<vmem>>, vector<8x16xf32>,
    %c0_354 = arith.constant 0 : index
    %c0_355 = arith.constant 0 : index
    %852 = vector.load %arg14[%c0_354, %c0_355] : memref<16x3xf32, #tpu.memory_space<vmem>>, vector<16x3xf32>
    %853 = arith.mulf %850, %850 : vector<8x16xf32>
    %cst_356 = arith.constant dense<0.000000e+00> : vector<8xf32>
    %854 = vector.multi_reduction <add>, %853, %cst_356 [1] : vector<8x16xf32> to vector<8xf32>
    %855 = vector.shape_cast %854 : vector<8xf32> to vector<8x1xf32>
    %856 = arith.mulf %852, %852 : vector<16x3xf32>
    %cst_357 = arith.constant dense<0.000000e+00> : vector<3xf32>
    %857 = vector.multi_reduction <add>, %856, %cst_357 [0] : vector<16x3xf32> to vector<3xf32>
    %858 = vector.shape_cast %857 : vector<3xf32> to vector<1x3xf32>
    %cst_358 = arith.constant dense<0.000000e+00> : vector<8x3xf32>
    %859 = tpu.matmul %850, %852, %cst_358 {dimension_numbers = #tpu.dot_dimension_numbers<[1], [0], [0], [1], [0, 0, 1, 1], [], []>} : vector<8x16xf32>, vector<16x3xf32>, vector<8x3xf32> -> vector<8x3xf32>
    %cst_359 = arith.constant 2.000000e+00 : f32
    %860 = vector.broadcast %cst_359 : f32 to vector<8x3xf32>
    %861 = arith.mulf %860, %859 : vector<8x3xf32>
    %862 = vector.broadcast %855 : vector<8x1xf32> to vector<8x3xf32>
    %863 = arith.subf %862, %861 : vector<8x3xf32>
    %864 = vector.broadcast %858 : vector<1x3xf32> to vector<8x3xf32>
    %865 = arith.addf %863, %864 : vector<8x3xf32>
    %cst_360 = arith.constant dense<0x7F800000> : vector<8xf32>
    %866 = vector.multi_reduction <minimumf>, %865, %cst_360 [1] : vector<8x3xf32> to vector<8xf32>
    %867 = vector.shape_cast %866 : vector<8xf32> to vector<8x1xf32>
    %868 = tpu.iota {dimensions = array<i32: 1>} : vector<8x3xi32>
    %869 = arith.sitofp %868 : vector<8x3xi32> to vector<8x3xf32>
    %870 = vector.broadcast %867 : vector<8x1xf32> to vector<8x3xf32>
    %871 = arith.cmpf ole, %865, %870 : vector<8x3xf32>
    %cst_361 = arith.constant 3.000000e+00 : f32
    %872 = vector.broadcast %cst_361 : f32 to vector<8x3xf32>
    %873 = arith.select %871, %869, %872 : vector<8x3xi1>, vector<8x3xf32>
    %cst_362 = arith.constant dense<0x7F800000> : vector<8xf32>
    %874 = vector.multi_reduction <minimumf>, %873, %cst_362 [1] : vector<8x3xf32> to vector<8xf32>
    %875 = vector.shape_cast %874 : vector<8xf32> to vector<8x1xf32>
    %876 = arith.fptosi %875 : vector<8x1xf32> to vector<8x1xi32>
    %c0_363 = arith.constant 0 : index
    %c0_364 = arith.constant 0 : index
    %877 = vector.load %arg17[%c0_363, %c0_364] : memref<8x1xi32, #tpu.memory_space<vmem>>, vector<8x1xi32>
    tpu.vector_store %arg17[%c0_363, %c0_364], %876 {strides = array<i32>} : memref<8x1xi32, #tpu.memory_space<vmem>>, vector<8x1xi32>,
    return
  }
}

</mosaic_0001>

<bundles_post_ra>
// kernel: crli_forward.1
= control target key start
LH: loop header
LB: loop body
LE: loop exit
PB: predicated region body
PF: predicated region fallthrough
CT: control target
= control target key end

     0   :  { %s7471_s0 = inlined_call_operand.vmem [shape: f32[64,4], index: 0, kind: input, shape index: {}]   ;;  %s7472_s1 = inlined_call_operand.vmem [shape: f32[64,4], index: 1, kind: input, shape index: {}]   ;;  %s7473_s2 = inlined_call_operand.vmem [shape: bf16[3,4,32], index: 2, kind: input, shape index: {}]   ;;  %s7474_s3 = inlined_call_operand.vmem [shape: bf16[3,32,32], index: 3, kind: input, shape index: {}]   ;;  %s7475_s4 = inlined_call_operand.vmem [shape: f32[3,1,32], index: 4, kind: input, shape index: {}]   ;;  %s7476_s5 = inlined_call_operand.vmem [shape: f32[3,1,32], index: 5, kind: input, shape index: {}]   ;;  %s7477_s6 = inlined_call_operand.vmem [shape: bf16[3,32,32], index: 6, kind: input, shape index: {}]   ;;  %s7478_s7 = inlined_call_operand.vmem [shape: bf16[3,32,32], index: 7, kind: input, shape index: {}]   ;;  %s7479_s8 = inlined_call_operand.vmem [shape: f32[3,1,32], index: 8, kind: input, shape index: {}]   ;;  %s7480_s9 = inlined_call_operand.vmem [shape: f32[3,1,32], index: 9, kind: input, shape index: {}]   ;;  %s7481_s10 = inlined_call_operand.vmem [shape: bf16[32,4], index: 10, kind: input, shape index: {}]   ;;  %s7482_s11 = inlined_call_operand.vmem [shape: f32[1,4], index: 11, kind: input, shape index: {}]   ;;  %s7483_s12 = inlined_call_operand.vmem [shape: bf16[32,16], index: 12, kind: input, shape index: {}]   ;;  %s7484_s13 = inlined_call_operand.vmem [shape: f32[1,16], index: 13, kind: input, shape index: {}]   ;;  %s7485_s14 = inlined_call_operand.vmem [shape: f32[16,3], index: 14, kind: input, shape index: {}]   ;;  %s7486_s15 = inlined_call_operand.vmem [shape: f32[64,4], index: 15, kind: output, shape index: {0}]   ;;  %s7487_s16 = inlined_call_operand.hbm [shape: f32[8,16], index: 16, kind: output, shape index: {1}]   ;;  %s7488_s17 = inlined_call_operand.vmem [shape: s32[8,1], index: 17, kind: output, shape index: {2}]  }
   0x1   :  { %7491 = sst [smem:[#allocation10_spill]] %s7471_s0 }
   0x2   :  { %7492 = sst [smem:[#allocation11_spill]] %s7472_s1 }
   0x3   :  { %vm88_vm0 = vcmask 1041408   ;;  %v4605_v0 = vld [vmem:[%s7473_s2 + $0x2] sm:$0x3]  ;;  %s7493_s28 = sld [smem:[#allocation10_spill]]  ;;  %vm75_vm1 = vcmask 31744   ;;  %v6114_v11 = vmov 0.0  }
   0x4   :  { %5863 = vmatprep.subr.msk.bf16.mxu1 %vm88_vm0, %v4605_v0  ;;  %v177_v3 = vsel %vm88_vm0, %v4605_v0, 0  ;;  %v67_v7 = vld [vmem:[%s7473_s2] sm:$0x3]  ;;  %vm157_vm2 = vcmask 261120   ;;  %v4612_v17 = vld [vmem:[%s7473_s2 + $0x4] sm:$0x3] }
   0x5   :  { %5089 = vmatpush3.bf16.msra.mxu1 %v177_v3  ;;  %5862 = vmatprep.subr.msk.bf16.mxu0 %vm88_vm0, %v67_v7  ;;  %v6235_v9 = vld [vmem:[%s7474_s3] sm:$0xff]   ;;  %v90_v10 = vsel %vm88_vm0, %v67_v7, 0  ;;  %338 = vst.msk [vmem:[#allocation5] sm:$0xff] %vm157_vm2, %v6114_v11  ;;  %339 = vst.msk [vmem:[#allocation6] sm:$0xff] %vm157_vm2, %v6114_v11  ;;  %v6266_v18 = vld [vmem:[%s7474_s3 + $0x8] sm:$0xff]   ;;  %v263_v19 = vsel %vm88_vm0, %v4612_v17, 0 }
   0x6   :  { %5108 = vmatprep.subr.bf16.mxu1 %v6114_v11  ;;  %5079 = vmatpush3.bf16.msra.mxu0 %v90_v10  ;;  %vm6115_vm3 = vmmov 0   ;;  %v6285_v22 = vld [vmem:[%s7474_s3 + $0x10] sm:$0xff]   ;;  %v6293_v24 = vld [vmem:[%s7474_s3 + $0x20] sm:$0xff]  }
   0x7   :  { %5864 = vmatprep.subr.msk.bf16.mxu0 %vm88_vm0, %v4612_v17 }
   0x9   :  { %v6214_v1 = vld [vmem:[%s7493_s28] sm:$0xff]  ;;  %v56_v2 = vld [vmem:[%s7493_s28 + $0x8] sm:$0xff]  ;;  %v57_v5 = vld [vmem:[%s7493_s28 + $0x10] sm:$0xff] }
   0xa   :  { %v63_v4 = vpack.c.bf16 %v56_v2, %v6214_v1  ;;  %v58_v6 = vld [vmem:[%s7493_s28 + $0x18] sm:$0xff]  ;;  %v59_v12 = vld [vmem:[%s7493_s28 + $0x20] sm:$0xff]  ;;  %v60_v13 = vld [vmem:[%s7493_s28 + $0x28] sm:$0xff] }
   0xb   :  { %v64_v8 = vpack.c.bf16 %v58_v6, %v57_v5  ;;  %v65_v14 = vpack.c.bf16 %v60_v13, %v59_v12  ;;  %v61_v15 = vld [vmem:[%s7493_s28 + $0x30] sm:$0xff]  ;;  %v62_v16 = vld [vmem:[%s7493_s28 + $0x38] sm:$0xff] }
   0xc   :  { %5090 = vmatprep.mubr.msk.bf16.mxu1 %vm75_vm1, %v63_v4  ;;  %5080 = vmatprep.mubr.msk.bf16.mxu0 %vm75_vm1, %v63_v4  ;;  %v66_v20 = vpack.c.bf16 %v62_v16, %v61_v15  ;;  %v6276_v21 = vld [vmem:[#allocation5] sm:$0xff] }
   0xd   :  { %5091 = vmatmul.mubr.msk.bf16.vlgmr.msra.gmra.mrb[0].mxu1 %vm75_vm1, %v64_v8  ;;  %5081 = vmatmul.mubr.msk.bf16.vlgmr.msra.gmra.mrb[0].mxu0 %vm75_vm1, %v64_v8  ;;  %v403_v23 = vpack.c.bf16 %v6276_v21, %v6276_v21 }
   0xe   :  { %5109 = vmatpush3.bf16.msra.mxu1 %v6235_v9  ;;  %5094 = vmatprep.mubr.msk.bf16.mxu1 %vm75_vm1, %v65_v14 }
   0xf   :  { %5110 = vmatprep.subr.bf16.mxu1 %v6114_v11  ;;  %5084 = vmatprep.mubr.msk.bf16.mxu0 %vm75_vm1, %v65_v14 }
  0x10   :  { %5099 = vmatpush3.bf16.msra.mxu0 %v263_v19 }
  0x11   :  { %5124 = vmatprep.subr.bf16.mxu0 %v6114_v11 }
  0x12   :  { %5111 = vmatpush3.bf16.msra.mxu1 %v6266_v18 }
  0x13   :  { %5116 = vmatprep.subr.bf16.mxu1 %v6114_v11 }
  0x15   :  { %5095 = vmatmul.mubr.msk.bf16.gmra.mrb[4].mxu1 %vm75_vm1, %v66_v20  ;;  %5085 = vmatmul.mubr.msk.bf16.gmra.mrb[4].mxu0 %vm75_vm1, %v66_v20 }
  0x16   :  { %5112 = vmatprep.mubr.msk.bf16.mxu1 %vm6115_vm3, %v6114_v11  ;;  %5100 = vmatprep.mubr.msk.bf16.mxu0 %vm75_vm1, %v63_v4 }
  0x17   :  { %23 = vsyncpa [#allocation8], 0  ;;  %v6300_v25 = vld [vmem:[%s7474_s3 + $0x18] sm:$0xff]   ;;  %v6311_v26 = vld [vmem:[%s7474_s3 + $0x28] sm:$0xff]   ;;  %s7494_s21 = sld [smem:[#allocation11_spill]]  ;;  %vm4468_vm4 = vcmask 130048  }
  0x18   :  { %v6330_v27 = vld [vmem:[%s7477_s6] sm:$0xff]   ;;  %v6335_v28 = vld [vmem:[%s7477_s6 + $0x10] sm:$0xff]   ;;  %v6342_v29 = vld [vmem:[%s7477_s6 + $0x8] sm:$0xff]   ;;  %vm4478_vm5 = vcmask 23552  }
  0x19   :  { %v6347_v30 = vld [vmem:[%s7477_s6 + $0x18] sm:$0xff]   ;;  %v4607_v31 = vld [vmem:[%s7475_s4 + $0x1] ss:$0 sm:$0xff]  ;;  %v4600_v33 = vld [vmem:[%s7475_s4] ss:$0 sm:$0xff] }
  0x1a   :  { %v6377_v0 = vld [vmem:[%s7476_s5] ss:$0 sm:$0xff]  ;;  %v4614_v5 = vld [vmem:[%s7475_s4 + $0x2] ss:$0 sm:$0xff] }
  0x1d   :  { %5113 = vmatmul.mubr.msk.bf16.vlgmr.msra.gmra.mrb[8].mxu1 %vm157_vm2, %v403_v23  ;;  %5101 = vmatmul.mubr.msk.bf16.vlgmr.msra.gmra.mrb[8].mxu0 %vm75_vm1, %v64_v8 }
  0x1e   :  { %5117 = vmatpush3.bf16.msra.mxu1 %v6285_v22  ;;  %5120 = vmatprep.mubr.msk.bf16.mxu1 %vm6115_vm3, %v6114_v11 }
  0x1f   :  { %5118 = vmatprep.subr.bf16.mxu1 %v6114_v11  ;;  %5125 = vmatpush3.bf16.msra.mxu0 %v6293_v24 }
  0x20   :  { %5104 = vmatprep.mubr.msk.bf16.mxu0 %vm75_vm1, %v65_v14  ;;  %5126 = vmatprep.subr.bf16.mxu0 %v6114_v11 }
  0x22   :  { %5119 = vmatpush3.bf16.msra.mxu1 %v6300_v25 }
  0x23   :  { %5132 = vmatprep.subr.bf16.mxu1 %v6114_v11  ;;  %5127 = vmatpush3.bf16.msra.mxu0 %v6311_v26 }
  0x24   :  { %5140 = vmatprep.subr.bf16.mxu0 %v6114_v11 }
  0x25   :  { %5121 = vmatmul.mubr.msk.bf16.vlgmr.msra.gmra.mrb[12].mxu1 %vm157_vm2, %v403_v23  ;;  %5105 = vmatmul.mubr.msk.bf16.gmra.mrb[12].mxu0 %vm75_vm1, %v66_v20 }
  0x26   :  { %5136 = vmatprep.mubr.msk.bf16.mxu1 %vm6115_vm3, %v6114_v11  ;;  %5128 = vmatprep.mubr.msk.bf16.mxu0 %vm6115_vm3, %v6114_v11 }
  0x27   :  { %5133 = vmatpush3.bf16.msra.mxu1 %v6330_v27 }
  0x28   :  { %5134 = vmatprep.subr.bf16.mxu1 %v6114_v11 }
  0x2b   :  { %5135 = vmatpush3.bf16.msra.mxu1 %v6342_v29 }
  0x2c   :  { %5148 = vmatprep.subr.bf16.mxu1 %v6114_v11 }
  0x2d   :  { %5129 = vmatmul.mubr.msk.bf16.vlgmr.msra.gmra.mrb[16].mxu0 %vm157_vm2, %v403_v23 }
  0x2e   :  { %5144 = vmatprep.mubr.msk.bf16.mxu0 %vm6115_vm3, %v6114_v11  ;;  %5141 = vmatpush3.bf16.msra.mxu0 %v6335_v28 }
  0x2f   :  { %5142 = vmatprep.subr.bf16.mxu0 %v6114_v11 }
  0x32   :  { %5143 = vmatpush3.bf16.msra.mxu0 %v6347_v30 }
  0x33   :  { %5164 = vmatprep.subr.bf16.mxu0 %v6114_v11 }
  0xe0   :  { %v5092_v32 = vpop.f32.mrb[0].mxu1  ;;  %v5082_v38 = vpop.f32.mrb[0].mxu0 }
  0xe1   :  { %v222_v34 = vadd.f32 %v5092_v32, %v4607_v31  ;;  %v213_v35 = vpop.f32.mrb[1].mxu1  ;;  %v135_v41 = vadd.f32 %v5082_v38, %v4600_v33  ;;  %v126_v42 = vpop.f32.mrb[1].mxu0 }
  0xe2   :  { %v214_v36 = vadd.f32 %v4607_v31, %v213_v35  ;;  %v5093_v37 = vpop.f32.mrb[2].mxu1  ;;  %v127_v44 = vadd.f32 %v4600_v33, %v126_v42  ;;  %v5083_v45 = vpop.f32.mrb[2].mxu0 }
  0xe3   :  { %246 = vst.msk [vmem:[#allocation3 + $0x10] sm:$0xff] %vm157_vm2, %v222_v34  ;;  %v225_v39 = vadd.f32 %v5093_v37, %v4607_v31  ;;  %v216_v40 = vpop.f32.mrb[3].mxu1  ;;  %160 = vst.msk [vmem:[#allocation2 + $0x10] sm:$0xff] %vm157_vm2, %v135_v41  ;;  %v138_v46 = vadd.f32 %v5083_v45, %v4600_v33  ;;  %v129_v47 = vpop.f32.mrb[3].mxu0 }
  0xe4   :  { %244 = vst.msk [vmem:[#allocation3] sm:$0xff] %vm157_vm2, %v214_v36  ;;  %v217_v43 = vadd.f32 %v4607_v31, %v216_v40  ;;  %158 = vst.msk [vmem:[#allocation2] sm:$0xff] %vm157_vm2, %v127_v44  ;;  %v130_v48 = vadd.f32 %v4600_v33, %v129_v47 }
  0xe5   :  { %247 = vst.msk [vmem:[#allocation3 + $0x18] sm:$0xff] %vm157_vm2, %v225_v39  ;;  %161 = vst.msk [vmem:[#allocation2 + $0x18] sm:$0xff] %vm157_vm2, %v138_v46 }
  0xe6   :  { %245 = vst.msk [vmem:[#allocation3 + $0x8] sm:$0xff] %vm157_vm2, %v217_v43  ;;  %159 = vst.msk [vmem:[#allocation2 + $0x8] sm:$0xff] %vm157_vm2, %v130_v48 }
  0xe8   :  { %v5096_v49 = vpop.f32.mrb[4].mxu1  ;;  %v5086_v54 = vpop.f32.mrb[4].mxu0 }
  0xe9   :  { %v238_v50 = vadd.f32 %v5096_v49, %v4607_v31  ;;  %v229_v51 = vpop.f32.mrb[5].mxu1  ;;  %v151_v57 = vadd.f32 %v5086_v54, %v4600_v33  ;;  %v142_v58 = vpop.f32.mrb[5].mxu0 }
  0xea   :  { %v230_v52 = vadd.f32 %v4607_v31, %v229_v51  ;;  %v5097_v53 = vpop.f32.mrb[6].mxu1  ;;  %v143_v60 = vadd.f32 %v4600_v33, %v142_v58  ;;  %v5087_v61 = vpop.f32.mrb[6].mxu0 }
  0xeb   :  { %250 = vst.msk [vmem:[#allocation3 + $0x30] sm:$0xff] %vm157_vm2, %v238_v50  ;;  %v241_v55 = vadd.f32 %v5097_v53, %v4607_v31  ;;  %v232_v56 = vpop.f32.mrb[7].mxu1  ;;  %164 = vst.msk [vmem:[#allocation2 + $0x30] sm:$0xff] %vm157_vm2, %v151_v57  ;;  %v154_v62 = vadd.f32 %v5087_v61, %v4600_v33  ;;  %v145_v63 = vpop.f32.mrb[7].mxu0  ;;  %v581_v4 = vld [vmem:[#allocation2] sm:$0xff] }
  0xec   :  { %248 = vst.msk [vmem:[#allocation3 + $0x20] sm:$0xff] %vm157_vm2, %v230_v52  ;;  %v233_v59 = vadd.f32 %v4607_v31, %v232_v56  ;;  %162 = vst.msk [vmem:[#allocation2 + $0x20] sm:$0xff] %vm157_vm2, %v143_v60  ;;  %v146_v2 = vadd.f32 %v4600_v33, %v145_v63  ;;  %v6390_v31 = vld [vmem:[%s7476_s5 + $0x1] ss:$0 sm:$0xff] }
  0xed   :  { %251 = vst.msk [vmem:[#allocation3 + $0x38] sm:$0xff] %vm157_vm2, %v241_v55  ;;  %165 = vst.msk [vmem:[#allocation2 + $0x38] sm:$0xff] %vm157_vm2, %v154_v62  ;;  %v589_v36 = vld [vmem:[#allocation3] sm:$0xff] }
  0xee   :  { %249 = vst.msk [vmem:[#allocation3 + $0x28] sm:$0xff] %vm157_vm2, %v233_v59  ;;  %163 = vst.msk [vmem:[#allocation2 + $0x28] sm:$0xff] %vm157_vm2, %v146_v2  ;;  %v6403_v55 = vld [vmem:[%s7476_s5 + $0x2] ss:$0 sm:$0xff] }
  0xf0   :  { %v459_v3 = vpop.f32.mrb[8].mxu1  ;;  %v5102_v10 = vpop.f32.mrb[8].mxu0 }
  0xf1   :  { %v460_v6 = vadd.f32 %v6377_v0, %v459_v3  ;;  %v5114_v7 = vpop.f32.mrb[9].mxu1  ;;  %v308_v14 = vadd.f32 %v5102_v10, %v4614_v5  ;;  %v299_v15 = vpop.f32.mrb[9].mxu0 }
  0xf2   :  { %v462_v8 = vpop.f32.mrb[10].mxu1  ;;  %v300_v16 = vadd.f32 %v4614_v5, %v299_v15  ;;  %v5103_v17 = vpop.f32.mrb[10].mxu0  ;;  %v6410_v7 = vld [vmem:[%s7477_s6 + $0x20] sm:$0xff]  }
  0xf3   :  { %v582_v12 = vadd.f32 %v581_v4, %v460_v6  ;;  %v5115_v13 = vpop.f32.mrb[11].mxu1  ;;  %332 = vst.msk [vmem:[#allocation4 + $0x10] sm:$0xff] %vm157_vm2, %v308_v14  ;;  %v311_v20 = vadd.f32 %v5103_v17, %v4614_v5  ;;  %v302_v23 = vpop.f32.mrb[11].mxu0  ;;  %v6415_v8 = vld [vmem:[%s7478_s7 + $0x10] sm:$0xff]   ;;  %v6445_v14 = vld [vmem:[#allocation6] sm:$0xff]  ;;  %v6461_v17 = vld [vmem:[%s7478_s7 + $0x20] sm:$0xff]  }
  0xf4   :  { %330 = vst.msk [vmem:[#allocation4] sm:$0xff] %vm157_vm2, %v300_v16  ;;  %v303_v32 = vadd.f32 %v4614_v5, %v302_v23  ;;  %v6442_v13 = vld [vmem:[%s7478_s7] sm:$0xff]   ;;  %v785_v15 = vpack.c.bf16 %v6445_v14, %v6445_v14  ;;  %v6456_v16 = vld [vmem:[%s7478_s7 + $0x8] sm:$0xff]  }
  0xf5   :  { %v4661_v19 = vmul.f32 -1.442695, %v582_v12  ;;  %333 = vst.msk [vmem:[#allocation4 + $0x18] sm:$0xff] %vm157_vm2, %v311_v20  ;;  %v6430_v12 = vld [vmem:[%s7478_s7 + $0x18] sm:$0xff]  }
  0xf6   :  { %331 = vst.msk [vmem:[#allocation4 + $0x8] sm:$0xff] %vm157_vm2, %v303_v32  ;;  %v6515_v32 = vld [vmem:[%s7481_s10] sm:$0xff]  }
  0xf7   :  { %5893 = vpow2.f32 %v4661_v19  ;;  %v6472_v19 = vld [vmem:[%s7478_s7 + $0x28] sm:$0xff]  }
  0xf8   :  { %v517_v33 = vpop.f32.mrb[12].mxu1  ;;  %v5106_v38 = vpop.f32.mrb[12].mxu0 }
  0xf9   :  { %v518_v34 = vadd.f32 %v6390_v31, %v517_v33  ;;  %v5122_v35 = vpop.f32.mrb[13].mxu1  ;;  %v324_v41 = vadd.f32 %v5106_v38, %v4614_v5  ;;  %v315_v42 = vpop.f32.mrb[13].mxu0  ;;  %v6522_v33 = vld [vmem:[%s7481_s10 + $0x8] sm:$0xff]   ;;  %v4675_v38 = vld [vmem:[%s7480_s9] ss:$0 sm:$0xff] }
  0xfa   :  { %v520_v37 = vpop.f32.mrb[14].mxu1  ;;  %v316_v43 = vadd.f32 %v4614_v5, %v315_v42  ;;  %v5107_v44 = vpop.f32.mrb[14].mxu0  ;;  %v4679_v42 = vld [vmem:[%s7480_s9 + $0x1] ss:$0 sm:$0xff] }
  0xfb   :  { %v590_v39 = vadd.f32 %v589_v36, %v518_v34  ;;  %v5123_v40 = vpop.f32.mrb[15].mxu1  ;;  %336 = vst.msk [vmem:[#allocation4 + $0x30] sm:$0xff] %vm157_vm2, %v324_v41  ;;  %v327_v46 = vadd.f32 %v5107_v44, %v4614_v5  ;;  %v318_v47 = vpop.f32.mrb[15].mxu0  ;;  %v597_v61 = vld [vmem:[#allocation4] sm:$0xff] }
  0xfc   :  { %334 = vst.msk [vmem:[#allocation4 + $0x20] sm:$0xff] %vm157_vm2, %v316_v43  ;;  %v319_v48 = vadd.f32 %v4614_v5, %v318_v47  ;;  %v4663_v37 = vld [vmem:[%s7479_s8] ss:$0 sm:$0xff]  ;;  %v4667_v41 = vld [vmem:[%s7479_s8 + $0x1] ss:$0 sm:$0xff] }
  0xfd   :  { %v4662_v45 = vmul.f32 -1.442695, %v590_v39  ;;  %337 = vst.msk [vmem:[#allocation4 + $0x38] sm:$0xff] %vm157_vm2, %v327_v46  ;;  %v6538_v44 = vadd.f32 %v4675_v38, %v4663_v37  ;;  %v6540_v47 = vadd.f32 %v4679_v42, %v4667_v41  ;;  %v6548_v38 = vld [vmem:[%s7480_s9 + $0x2] ss:$0 sm:$0xff] }
  0xfe   :  { %335 = vst.msk [vmem:[#allocation4 + $0x28] sm:$0xff] %vm157_vm2, %v319_v48 }
  0xff   :  { %5895 = vpow2.f32 %v4662_v45 }
 0x100   :  { %v575_v51 = vpop.f32.mrb[16].mxu0 }
 0x101   :  { %v5894_v49 = vpop.eup %5893  ;;  %v5130_v52 = vpop.f32.mrb[17].mxu0  ;;  %v576_v58 = vadd.f32 %v6403_v55, %v575_v51 }
 0x102   :  { %v586_v50 = vadd.f32 1.0, %v5894_v49  ;;  %v578_v53 = vpop.f32.mrb[18].mxu0 }
 0x103   :  { %v5131_v54 = vpop.f32.mrb[19].mxu0 }
 0x104   :  { %5897 = vrcp.f32 %v586_v50 }
 0x109   :  { %v5896_v56 = vpop.eup %5895 }
 0x10a   :  { %v594_v57 = vadd.f32 1.0, %v5896_v56 }
 0x10c   :  { %5899 = vrcp.f32 %v594_v57 }
 0x10e   :  { %v5898_v59 = vpop.eup %5897 }
 0x10f   :  { %v598_v60 = vmul.f32 %v5898_v59, %v576_v58 }
 0x111   :  { %v599_v62 = vadd.f32 %v598_v60, %v597_v61 }
 0x113   :  { %5901 = vtanh.f32 %v599_v62 }
 0x116   :  { %v5900_v63 = vpop.eup %5899 }
 0x117   :  { %v601_v2 = vsub.f32 1.0, %v5900_v63  ;;  %v603_v5 = vmul.f32 %v5900_v63, %v6276_v21  ;;  %v6424_v21 = vld [vmem:[%s7477_s6 + $0x28] sm:$0xff]  }
 0x11d   :  { %v5902_v3 = vpop.eup %5901 }
 0x11e   :  { %v602_v4 = vmul.f32 %v5902_v3, %v601_v2  ;;  %v1180_v2 = vld [vmem:[#allocation2 + $0x8] sm:$0xff] }
 0x120   :  { %v604_v6 = vadd.f32 %v603_v5, %v602_v4 }
 0x122   :  { %605 = vst.msk [vmem:[#allocation5] sm:$0xff] %vm157_vm2, %v604_v6  ;;  %v606_v10 = vpack.c.bf16 %v604_v6, %v604_v6 }
 0x124   :  { %5137 = vmatmul.mubr.msk.bf16.vlgmr.msra.gmra.mrb[16].mxu1 %vm157_vm2, %v606_v10  ;;  %5145 = vmatmul.mubr.msk.bf16.vlgmr.msra.gmra.mrb[20].mxu0 %vm157_vm2, %v606_v10 }
 0x125   :  { %5149 = vmatpush3.bf16.msra.mxu1 %v6410_v7  ;;  %5165 = vmatpush3.bf16.msra.mxu0 %v6415_v8 }
 0x126   :  { %5150 = vmatprep.subr.bf16.mxu1 %v6114_v11  ;;  %5152 = vmatprep.mubr.msk.bf16.mxu1 %vm6115_vm3, %v6114_v11 }
 0x127   :  { %5166 = vmatprep.subr.bf16.mxu0 %v6114_v11  ;;  %5168 = vmatprep.mubr.msk.bf16.mxu0 %vm6115_vm3, %v6114_v11 }
 0x129   :  { %5151 = vmatpush3.bf16.msra.mxu1 %v6424_v21  ;;  %5167 = vmatpush3.bf16.msra.mxu0 %v6430_v12  ;;  %v6488_v20 = vld [vmem:[#allocation5] sm:$0xff] }
 0x12a   :  { %5156 = vmatprep.subr.bf16.mxu1 %v6114_v11  ;;  %5172 = vmatprep.subr.bf16.mxu0 %v6114_v11  ;;  %v6493_v23 = vpack.c.bf16 %v6488_v20, %v6488_v20 }
 0x12c   :  { %5153 = vmatmul.mubr.msk.bf16.vlgmr.msra.gmra.mrb[20].mxu1 %vm157_vm2, %v606_v10 }
 0x12d   :  { %5157 = vmatpush3.bf16.msra.mxu1 %v6442_v13  ;;  %5160 = vmatprep.mubr.msk.bf16.mxu1 %vm6115_vm3, %v6114_v11 }
 0x12e   :  { %5158 = vmatprep.subr.bf16.mxu1 %v6114_v11 }
 0x130   :  { %5169 = vmatmul.mubr.msk.bf16.vlgmr.msra.gmra.mrb[20].mxu0 %vm157_vm2, %v785_v15 }
 0x131   :  { %5159 = vmatpush3.bf16.msra.mxu1 %v6456_v16  ;;  %5173 = vmatpush3.bf16.msra.mxu0 %v6461_v17 }
 0x132   :  { %5174 = vmatprep.subr.bf16.mxu0 %v6114_v11  ;;  %5176 = vmatprep.mubr.msk.bf16.mxu0 %vm6115_vm3, %v6114_v11 }
 0x133   :  { %5180 = vmatprep.subr.bf16.mxu1 %v6114_v11 }
 0x134   :  { %5161 = vmatmul.mubr.msk.bf16.vlgmr.msra.gmra.mrb[16].mxu1 %vm157_vm2, %v785_v15 }
 0x135   :  { %5175 = vmatpush3.bf16.msra.mxu0 %v6472_v19  ;;  %5184 = vmatprep.mubr.msk.bf16.mxu1 %vm6115_vm3, %v6114_v11 }
 0x136   :  { %5188 = vmatprep.subr.bf16.mxu0 %v6114_v11  ;;  %5181 = vmatpush3.bf16.msra.mxu1 %v6515_v32 }
 0x137   :  { %5182 = vmatprep.subr.bf16.mxu1 %v6114_v11 }
 0x138   :  { %5177 = vmatmul.mubr.msk.bf16.vlgmr.msra.gmra.mrb[24].mxu0 %vm157_vm2, %v785_v15 }
 0x139   :  { %5189 = vmatpush3.bf16.msra.mxu0 %v6235_v9  ;;  %5192 = vmatprep.mubr.msk.bf16.mxu0 %vm6115_vm3, %v6114_v11 }
 0x13a   :  { %5190 = vmatprep.subr.bf16.mxu0 %v6114_v11  ;;  %5183 = vmatpush3.bf16.msra.mxu1 %v6522_v33 }
 0x13b   :  { %5196 = vmatprep.subr.bf16.mxu1 %v6114_v11 }
 0x13d   :  { %5191 = vmatpush3.bf16.msra.mxu0 %v6266_v18 }
 0x13e   :  { %5204 = vmatprep.subr.bf16.mxu0 %v6114_v11 }
 0x140   :  { %5193 = vmatmul.mubr.msk.bf16.vlgmr.msra.gmra.mrb[28].mxu0 %vm157_vm2, %v6493_v23 }
 0x141   :  { %5205 = vmatpush3.bf16.msra.mxu0 %v6293_v24  ;;  %5208 = vmatprep.mubr.msk.bf16.mxu0 %vm6115_vm3, %v6114_v11 }
 0x142   :  { %5206 = vmatprep.subr.bf16.mxu0 %v6114_v11 }
 0x145   :  { %5207 = vmatpush3.bf16.msra.mxu0 %v6311_v26 }
 0x146   :  { %5220 = vmatprep.subr.bf16.mxu0 %v6114_v11 }
 0x148   :  { %5209 = vmatmul.mubr.msk.bf16.vlgmr.msra.gmra.mrb[32].mxu0 %vm157_vm2, %v6493_v23 }
 0x149   :  { %5221 = vmatpush3.bf16.msra.mxu0 %v6335_v28  ;;  %5224 = vmatprep.mubr.msk.bf16.mxu0 %vm6115_vm3, %v6114_v11 }
 0x14a   :  { %5222 = vmatprep.subr.bf16.mxu0 %v6114_v11 }
 0x14d   :  { %5223 = vmatpush3.bf16.msra.mxu0 %v6347_v30 }
 0x14e   :  { %5244 = vmatprep.subr.bf16.mxu0 %v6114_v11 }
 0x1ff   :  { %v778_v34 = vpop.f32.mrb[20].mxu1 }
 0x200   :  { %v5154_v35 = vpop.f32.mrb[21].mxu1 }
 0x201   :  { %v781_v36 = vpop.f32.mrb[22].mxu1 }
 0x202   :  { %v5155_v39 = vpop.f32.mrb[23].mxu1 }
 0x203   :  { %v899_v40 = vpop.f32.mrb[20].mxu0 }
 0x204   :  { %v5170_v43 = vpop.f32.mrb[21].mxu0  ;;  %v5769_v54 = vadd.f32 %v6540_v47, %v899_v40 }
 0x205   :  { %v902_v45 = vpop.f32.mrb[22].mxu0  ;;  %v6554_v43 = vld [vmem:[%s7479_s8 + $0x2] ss:$0 sm:$0xff] }
 0x206   :  { %v5171_v46 = vpop.f32.mrb[23].mxu0  ;;  %v4688_v60 = vmul.f32 -1.442695, %v5769_v54 }
 0x207   :  { %v841_v48 = vpop.f32.mrb[16].mxu1 }
 0x208   :  { %v5767_v49 = vadd.f32 %v6538_v44, %v841_v48  ;;  %v5162_v50 = vpop.f32.mrb[17].mxu1  ;;  %v779_v48 = vadd.f32 %v6554_v43, %v778_v34 }
 0x209   :  { %v844_v51 = vpop.f32.mrb[18].mxu1 }
 0x20a   :  { %v4687_v52 = vmul.f32 -1.442695, %v5767_v49  ;;  %v5163_v53 = vpop.f32.mrb[19].mxu1 }
 0x20b   :  { %v957_v56 = vpop.f32.mrb[24].mxu0 }
 0x20c   :  { %5903 = vpow2.f32 %v4687_v52  ;;  %v5178_v57 = vpop.f32.mrb[25].mxu0  ;;  %v958_v42 = vadd.f32 %v6548_v38, %v957_v56 }
 0x20d   :  { %v960_v58 = vpop.f32.mrb[26].mxu0  ;;  %5905 = vpow2.f32 %v4688_v60 }
 0x20e   :  { %v5179_v59 = vpop.f32.mrb[27].mxu0 }
 0x213   :  { %v1093_v61 = vpop.f32.mrb[28].mxu0 }
 0x214   :  { %v1094_v62 = vadd.f32 %v6377_v0, %v1093_v61  ;;  %v5194_v63 = vpop.f32.mrb[29].mxu0 }
 0x215   :  { %v1096_v3 = vpop.f32.mrb[30].mxu0 }
 0x216   :  { %v5904_v4 = vpop.eup %5903  ;;  %v1181_v5 = vadd.f32 %v1180_v2, %v1094_v62  ;;  %v5195_v6 = vpop.f32.mrb[31].mxu0  ;;  %v6581_v62 = vld [vmem:[%s7482_s11] ss:$0 sm:$0xff] }
 0x217   :  { %v967_v10 = vadd.f32 1.0, %v5904_v4  ;;  %v5906_v37 = vpop.eup %5905 }
 0x218   :  { %v4696_v15 = vmul.f32 -1.442695, %v1181_v5  ;;  %v974_v41 = vadd.f32 1.0, %v5906_v37 }
 0x219   :  { %5907 = vrcp.f32 %v967_v10 }
 0x21a   :  { %5909 = vpow2.f32 %v4696_v15 }
 0x21b   :  { %v1173_v35 = vpop.f32.mrb[32].mxu0  ;;  %5911 = vrcp.f32 %v974_v41 }
 0x21c   :  { %v5210_v36 = vpop.f32.mrb[33].mxu0  ;;  %v1174_v53 = vadd.f32 %v6403_v55, %v1173_v35 }
 0x21d   :  { %v1176_v39 = vpop.f32.mrb[34].mxu0 }
 0x21e   :  { %v5211_v40 = vpop.f32.mrb[35].mxu0  ;;  %v1189_v39 = vld [vmem:[#allocation3 + $0x8] sm:$0xff] }
 0x223   :  { %v5908_v45 = vpop.eup %5907 }
 0x224   :  { %v5910_v46 = vpop.eup %5909  ;;  %v977_v49 = vmul.f32 %v5908_v45, %v958_v42 }
 0x225   :  { %v1185_v50 = vadd.f32 1.0, %v5910_v46  ;;  %v5912_v52 = vpop.eup %5911  ;;  %v1198_v46 = vld [vmem:[#allocation4 + $0x8] sm:$0xff] }
 0x226   :  { %v978_v51 = vadd.f32 %v977_v49, %v779_v48  ;;  %v980_v56 = vsub.f32 1.0, %v5912_v52  ;;  %v982_v59 = vmul.f32 %v5912_v52, %v6445_v14  ;;  %v1047_v14 = vld [vmem:[%s7494_s21] sm:$0xff] }
 0x227   :  { %5913 = vrcp.f32 %v1185_v50  ;;  %v1049_v3 = vmul.f32 %v1047_v14, %v6214_v1 }
 0x228   :  { %5915 = vtanh.f32 %v978_v51 }
 0x231   :  { %v5914_v54 = vpop.eup %5913 }
 0x232   :  { %v5916_v57 = vpop.eup %5915  ;;  %v1199_v58 = vmul.f32 %v5914_v54, %v1174_v53 }
 0x233   :  { %v981_v60 = vmul.f32 %v5916_v57, %v980_v56 }
 0x234   :  { %v1200_v48 = vadd.f32 %v1199_v58, %v1198_v46 }
 0x235   :  { %v983_v61 = vadd.f32 %v982_v59, %v981_v60 }
 0x237   :  { %984 = vst.msk [vmem:[#allocation6] sm:$0xff] %vm157_vm2, %v983_v61  ;;  %v985_v34 = vpack.c.bf16 %v983_v61, %v983_v61 }
 0x239   :  { %5185 = vmatmul.mubr.msk.bf16.vlgmr.msra.gmra.mrb[24].mxu1 %vm157_vm2, %v985_v34 }
 0x23a   :  { %5197 = vmatpush3.bf16.msra.mxu1 %v6285_v22  ;;  %5200 = vmatprep.mubr.msk.bf16.mxu1 %vm6115_vm3, %v6114_v11 }
 0x23b   :  { %5198 = vmatprep.subr.bf16.mxu1 %v6114_v11 }
 0x23e   :  { %5199 = vmatpush3.bf16.msra.mxu1 %v6300_v25 }
 0x23f   :  { %5212 = vmatprep.subr.bf16.mxu1 %v6114_v11 }
 0x241   :  { %5201 = vmatmul.mubr.msk.bf16.vlgmr.msra.gmra.mrb[28].mxu1 %vm157_vm2, %v6493_v23  ;;  %v1050_v23 = vsub.f32 1.0, %v1047_v14 }
 0x242   :  { %5213 = vmatpush3.bf16.msra.mxu1 %v6330_v27  ;;  %5216 = vmatprep.mubr.msk.bf16.mxu1 %vm6115_vm3, %v6114_v11 }
 0x243   :  { %5214 = vmatprep.subr.bf16.mxu1 %v6114_v11 }
 0x246   :  { %5215 = vmatpush3.bf16.msra.mxu1 %v6342_v29 }
 0x247   :  { %5228 = vmatprep.subr.bf16.mxu1 %v6114_v11 }
 0x30c   :  { %v1041_v63 = vpop.f32.mrb[24].mxu1 }
 0x30d   :  { %v1042_v2 = vadd.f32 %v6581_v62, %v1041_v63  ;;  %v5186_v4 = vpop.f32.mrb[25].mxu1 }
 0x30e   :  { %v1044_v5 = vpop.f32.mrb[26].mxu1 }
 0x30f   :  { %v1051_v6 = vmul.f32 %v1050_v23, %v1042_v2  ;;  %v5187_v10 = vpop.f32.mrb[27].mxu1 }
 0x311   :  { %v1052_v15 = vadd.f32 %v1051_v6, %v1049_v3 }
 0x313   :  { %1053 = vst.msk [vmem:[%s7486_s15] sm:$0xff] %vm75_vm1, %v1052_v15 }
 0x314   :  { %v1133_v35 = vpop.f32.mrb[28].mxu1 }
 0x315   :  { %v1134_v36 = vadd.f32 %v6390_v31, %v1133_v35  ;;  %v5202_v37 = vpop.f32.mrb[29].mxu1 }
 0x316   :  { %v1136_v40 = vpop.f32.mrb[30].mxu1 }
 0x317   :  { %v1190_v41 = vadd.f32 %v1189_v39, %v1134_v36  ;;  %v5203_v42 = vpop.f32.mrb[31].mxu1 }
 0x319   :  { %v4697_v45 = vmul.f32 -1.442695, %v1190_v41  ;;  %v1658_v41 = vld [vmem:[#allocation2 + $0x10] sm:$0xff] }
 0x31b   :  { %5917 = vpow2.f32 %v4697_v45 }
 0x325   :  { %v5918_v1 = vpop.eup %5917 }
 0x326   :  { %v1194_v49 = vadd.f32 1.0, %v5918_v1 }
 0x328   :  { %5919 = vrcp.f32 %v1194_v49 }
 0x329   :  { %5921 = vtanh.f32 %v1200_v48 }
 0x332   :  { %v5920_v50 = vpop.eup %5919 }
 0x333   :  { %v1202_v51 = vsub.f32 1.0, %v5920_v50  ;;  %v5922_v52 = vpop.eup %5921  ;;  %v1204_v54 = vmul.f32 %v5920_v50, %v6488_v20  ;;  %v6606_v20 = vld [vmem:[#allocation6] sm:$0xff] }
 0x334   :  { %v1332_v58 = vpack.c.bf16 %v6606_v20, %v6606_v20 }
 0x335   :  { %v1203_v53 = vmul.f32 %v5922_v52, %v1202_v51 }
 0x337   :  { %v1205_v56 = vadd.f32 %v1204_v54, %v1203_v53 }
 0x339   :  { %1206 = vst.msk [vmem:[#allocation5] sm:$0xff] %vm157_vm2, %v1205_v56  ;;  %v1207_v57 = vpack.c.bf16 %v1205_v56, %v1205_v56 }
 0x33b   :  { %5217 = vmatmul.mubr.msk.bf16.vlgmr.msra.gmra.mrb[32].mxu1 %vm157_vm2, %v1207_v57  ;;  %5225 = vmatmul.mubr.msk.bf16.vlgmr.msra.gmra.mrb[36].mxu0 %vm157_vm2, %v1207_v57 }
 0x33c   :  { %5229 = vmatpush3.bf16.msra.mxu1 %v6410_v7  ;;  %5245 = vmatpush3.bf16.msra.mxu0 %v6415_v8 }
 0x33d   :  { %5230 = vmatprep.subr.bf16.mxu1 %v6114_v11  ;;  %5232 = vmatprep.mubr.msk.bf16.mxu1 %vm6115_vm3, %v6114_v11 }
 0x33e   :  { %5246 = vmatprep.subr.bf16.mxu0 %v6114_v11  ;;  %5248 = vmatprep.mubr.msk.bf16.mxu0 %vm6115_vm3, %v6114_v11 }
 0x340   :  { %5231 = vmatpush3.bf16.msra.mxu1 %v6424_v21  ;;  %5247 = vmatpush3.bf16.msra.mxu0 %v6430_v12  ;;  %v6635_v59 = vld [vmem:[#allocation5] sm:$0xff] }
 0x341   :  { %5236 = vmatprep.subr.bf16.mxu1 %v6114_v11  ;;  %5252 = vmatprep.subr.bf16.mxu0 %v6114_v11  ;;  %v6641_v60 = vpack.c.bf16 %v6635_v59, %v6635_v59 }
 0x343   :  { %5233 = vmatmul.mubr.msk.bf16.vlgmr.msra.gmra.mrb[36].mxu1 %vm157_vm2, %v1207_v57 }
 0x344   :  { %5237 = vmatpush3.bf16.msra.mxu1 %v6442_v13  ;;  %5240 = vmatprep.mubr.msk.bf16.mxu1 %vm6115_vm3, %v6114_v11 }
 0x345   :  { %5238 = vmatprep.subr.bf16.mxu1 %v6114_v11 }
 0x347   :  { %5249 = vmatmul.mubr.msk.bf16.vlgmr.msra.gmra.mrb[36].mxu0 %vm157_vm2, %v1332_v58 }
 0x348   :  { %5239 = vmatpush3.bf16.msra.mxu1 %v6456_v16  ;;  %5253 = vmatpush3.bf16.msra.mxu0 %v6461_v17 }
 0x349   :  { %5254 = vmatprep.subr.bf16.mxu0 %v6114_v11  ;;  %5256 = vmatprep.mubr.msk.bf16.mxu0 %vm6115_vm3, %v6114_v11 }
 0x34a   :  { %5260 = vmatprep.subr.bf16.mxu1 %v6114_v11 }
 0x34b   :  { %5241 = vmatmul.mubr.msk.bf16.vlgmr.msra.gmra.mrb[32].mxu1 %vm157_vm2, %v1332_v58 }
 0x34c   :  { %5255 = vmatpush3.bf16.msra.mxu0 %v6472_v19  ;;  %5261 = vmatpush3.bf16.msra.mxu1 %v6515_v32 }
 0x34d   :  { %5268 = vmatprep.subr.bf16.mxu0 %v6114_v11  ;;  %5262 = vmatprep.subr.bf16.mxu1 %v6114_v11 }
 0x34e   :  { %5264 = vmatprep.mubr.msk.bf16.mxu1 %vm6115_vm3, %v6114_v11 }
 0x34f   :  { %5257 = vmatmul.mubr.msk.bf16.vlgmr.msra.gmra.mrb[40].mxu0 %vm157_vm2, %v1332_v58 }
 0x350   :  { %5269 = vmatpush3.bf16.msra.mxu0 %v6235_v9  ;;  %5272 = vmatprep.mubr.msk.bf16.mxu0 %vm6115_vm3, %v6114_v11 }
 0x351   :  { %5270 = vmatprep.subr.bf16.mxu0 %v6114_v11  ;;  %5263 = vmatpush3.bf16.msra.mxu1 %v6522_v33 }
 0x352   :  { %5276 = vmatprep.subr.bf16.mxu1 %v6114_v11 }
 0x354   :  { %5271 = vmatpush3.bf16.msra.mxu0 %v6266_v18 }
 0x355   :  { %5284 = vmatprep.subr.bf16.mxu0 %v6114_v11 }
 0x357   :  { %5273 = vmatmul.mubr.msk.bf16.vlgmr.msra.gmra.mrb[44].mxu0 %vm157_vm2, %v6641_v60 }
 0x358   :  { %5285 = vmatpush3.bf16.msra.mxu0 %v6293_v24  ;;  %5288 = vmatprep.mubr.msk.bf16.mxu0 %vm6115_vm3, %v6114_v11 }
 0x359   :  { %5286 = vmatprep.subr.bf16.mxu0 %v6114_v11 }
 0x35c   :  { %5287 = vmatpush3.bf16.msra.mxu0 %v6311_v26 }
 0x35d   :  { %5300 = vmatprep.subr.bf16.mxu0 %v6114_v11 }
 0x35f   :  { %5289 = vmatmul.mubr.msk.bf16.vlgmr.msra.gmra.mrb[48].mxu0 %vm157_vm2, %v6641_v60 }
 0x360   :  { %5301 = vmatpush3.bf16.msra.mxu0 %v6335_v28  ;;  %5304 = vmatprep.mubr.msk.bf16.mxu0 %vm6115_vm3, %v6114_v11 }
 0x361   :  { %5302 = vmatprep.subr.bf16.mxu0 %v6114_v11 }
 0x364   :  { %5303 = vmatpush3.bf16.msra.mxu0 %v6347_v30 }
 0x365   :  { %5324 = vmatprep.subr.bf16.mxu0 %v6114_v11 }
 0x416   :  { %v1325_v9 = vpop.f32.mrb[36].mxu1 }
 0x417   :  { %v5234_v18 = vpop.f32.mrb[37].mxu1 }
 0x418   :  { %v1328_v24 = vpop.f32.mrb[38].mxu1 }
 0x419   :  { %v5235_v26 = vpop.f32.mrb[39].mxu1  ;;  %v1326_v24 = vadd.f32 %v6554_v43, %v1325_v9 }
 0x41a   :  { %v1410_v61 = vpop.f32.mrb[36].mxu0 }
 0x41b   :  { %v5250_v34 = vpop.f32.mrb[37].mxu0  ;;  %v5773_v6 = vadd.f32 %v6540_v47, %v1410_v61 }
 0x41c   :  { %v1413_v14 = vpop.f32.mrb[38].mxu0 }
 0x41d   :  { %v5251_v23 = vpop.f32.mrb[39].mxu0  ;;  %v4705_v36 = vmul.f32 -1.442695, %v5773_v6 }
 0x41e   :  { %v1370_v63 = vpop.f32.mrb[32].mxu1 }
 0x41f   :  { %v5771_v28 = vadd.f32 %v6538_v44, %v1370_v63  ;;  %v5242_v2 = vpop.f32.mrb[33].mxu1 }
 0x420   :  { %v1373_v3 = vpop.f32.mrb[34].mxu1 }
 0x421   :  { %v4704_v4 = vmul.f32 -1.442695, %v5771_v28  ;;  %v5243_v5 = vpop.f32.mrb[35].mxu1 }
 0x422   :  { %v1450_v30 = vpop.f32.mrb[40].mxu0 }
 0x423   :  { %5923 = vpow2.f32 %v4704_v4  ;;  %v5258_v10 = vpop.f32.mrb[41].mxu0  ;;  %v1451_v57 = vadd.f32 %v6548_v38, %v1450_v30 }
 0x424   :  { %v1453_v15 = vpop.f32.mrb[42].mxu0  ;;  %5925 = vpow2.f32 %v4705_v36 }
 0x425   :  { %v5259_v35 = vpop.f32.mrb[43].mxu0 }
 0x42a   :  { %v1571_v37 = vpop.f32.mrb[44].mxu0 }
 0x42b   :  { %v1572_v39 = vadd.f32 %v6377_v0, %v1571_v37  ;;  %v5274_v40 = vpop.f32.mrb[45].mxu0 }
 0x42c   :  { %v1574_v42 = vpop.f32.mrb[46].mxu0 }
 0x42d   :  { %v5924_v45 = vpop.eup %5923  ;;  %v1659_v1 = vadd.f32 %v1658_v41, %v1572_v39  ;;  %v5275_v46 = vpop.f32.mrb[47].mxu0  ;;  %v1667_v41 = vld [vmem:[#allocation3 + $0x10] sm:$0xff] }
 0x42e   :  { %v1460_v48 = vadd.f32 1.0, %v5924_v45  ;;  %v5926_v52 = vpop.eup %5925 }
 0x42f   :  { %v4713_v49 = vmul.f32 -1.442695, %v1659_v1  ;;  %v1467_v56 = vadd.f32 1.0, %v5926_v52 }
 0x430   :  { %5927 = vrcp.f32 %v1460_v48 }
 0x431   :  { %5929 = vpow2.f32 %v4713_v49  ;;  %v1676_v49 = vld [vmem:[#allocation4 + $0x10] sm:$0xff] }
 0x432   :  { %v1651_v50 = vpop.f32.mrb[48].mxu0  ;;  %5931 = vrcp.f32 %v1467_v56 }
 0x433   :  { %v5290_v51 = vpop.f32.mrb[49].mxu0  ;;  %v1652_v23 = vadd.f32 %v6403_v55, %v1651_v50 }
 0x434   :  { %v1654_v53 = vpop.f32.mrb[50].mxu0 }
 0x435   :  { %v5291_v54 = vpop.f32.mrb[51].mxu0 }
 0x43a   :  { %v5928_v58 = vpop.eup %5927 }
 0x43b   :  { %v5930_v18 = vpop.eup %5929  ;;  %v1470_v26 = vmul.f32 %v5928_v58, %v1451_v57 }
 0x43c   :  { %v1663_v61 = vadd.f32 1.0, %v5930_v18  ;;  %v5932_v14 = vpop.eup %5931 }
 0x43d   :  { %v1471_v34 = vadd.f32 %v1470_v26, %v1326_v24  ;;  %v1473_v28 = vsub.f32 1.0, %v5932_v14  ;;  %v1475_v4 = vmul.f32 %v5932_v14, %v6606_v20  ;;  %v6738_v24 = vld [vmem:[%s7474_s3] sm:$0xff]  }
 0x43e   :  { %5933 = vrcp.f32 %v1663_v61  ;;  %v6751_v61 = vld [vmem:[%s7474_s3 + $0x8] sm:$0xff]   ;;  %v6764_v14 = vld [vmem:[%s7474_s3 + $0x20] sm:$0xff]  }
 0x43f   :  { %5935 = vtanh.f32 %v1471_v34 }
 0x448   :  { %v5934_v63 = vpop.eup %5933 }
 0x449   :  { %v5936_v2 = vpop.eup %5935  ;;  %v1677_v3 = vmul.f32 %v5934_v63, %v1652_v23  ;;  %v6773_v23 = vld [vmem:[%s7474_s3 + $0x28] sm:$0xff]   ;;  %v6782_v63 = vld [vmem:[%s7477_s6 + $0x10] sm:$0xff]  }
 0x44a   :  { %v1474_v5 = vmul.f32 %v5936_v2, %v1473_v28  ;;  %v6791_v28 = vld [vmem:[%s7477_s6 + $0x18] sm:$0xff]  }
 0x44b   :  { %v1678_v50 = vadd.f32 %v1677_v3, %v1676_v49 }
 0x44c   :  { %v1476_v6 = vadd.f32 %v1475_v4, %v1474_v5 }
 0x44e   :  { %1477 = vst.msk [vmem:[#allocation6] sm:$0xff] %vm157_vm2, %v1476_v6  ;;  %v1478_v9 = vpack.c.bf16 %v1476_v6, %v1476_v6 }
 0x450   :  { %5265 = vmatmul.mubr.msk.bf16.vlgmr.msra.gmra.mrb[40].mxu1 %vm157_vm2, %v1478_v9 }
 0x451   :  { %5277 = vmatpush3.bf16.msra.mxu1 %v6285_v22  ;;  %5280 = vmatprep.mubr.msk.bf16.mxu1 %vm6115_vm3, %v6114_v11  ;;  %v4707_v22 = vld [vmem:[%s7494_s21 + $0x8] sm:$0xff] }
 0x452   :  { %5278 = vmatprep.subr.bf16.mxu1 %v6114_v11  ;;  %v1527_v20 = vsub.f32 1.0, %v4707_v22 }
 0x455   :  { %5279 = vmatpush3.bf16.msra.mxu1 %v6300_v25  ;;  %v4708_v25 = vld [vmem:[%s7493_s28 + $0x8] sm:$0xff] }
 0x456   :  { %5292 = vmatprep.subr.bf16.mxu1 %v6114_v11  ;;  %v1526_v30 = vmul.f32 %v4708_v25, %v4707_v22 }
 0x458   :  { %5281 = vmatmul.mubr.msk.bf16.vlgmr.msra.gmra.mrb[44].mxu1 %vm157_vm2, %v6641_v60 }
 0x459   :  { %5293 = vmatpush3.bf16.msra.mxu1 %v6330_v27  ;;  %5296 = vmatprep.mubr.msk.bf16.mxu1 %vm6115_vm3, %v6114_v11 }
 0x45a   :  { %5294 = vmatprep.subr.bf16.mxu1 %v6114_v11 }
 0x45d   :  { %5295 = vmatpush3.bf16.msra.mxu1 %v6342_v29 }
 0x45e   :  { %5308 = vmatprep.subr.bf16.mxu1 %v6114_v11 }
 0x523   :  { %v1516_v60 = vpop.f32.mrb[40].mxu1 }
 0x524   :  { %v1517_v27 = vadd.f32 %v6581_v62, %v1516_v60  ;;  %v5266_v10 = vpop.f32.mrb[41].mxu1 }
 0x525   :  { %v1519_v15 = vpop.f32.mrb[42].mxu1 }
 0x526   :  { %v1528_v35 = vmul.f32 %v1527_v20, %v1517_v27  ;;  %v5267_v36 = vpop.f32.mrb[43].mxu1 }
 0x528   :  { %v1529_v29 = vadd.f32 %v1528_v35, %v1526_v30 }
 0x52a   :  { %4709 = vst.msk [vmem:[%s7486_s15 + $0x8] sm:$0xff] %vm75_vm1, %v1529_v29 }
 0x52b   :  { %v1611_v37 = vpop.f32.mrb[44].mxu1 }
 0x52c   :  { %v1612_v39 = vadd.f32 %v6390_v31, %v1611_v37  ;;  %v5282_v40 = vpop.f32.mrb[45].mxu1 }
 0x52d   :  { %v1614_v42 = vpop.f32.mrb[46].mxu1 }
 0x52e   :  { %v1668_v45 = vadd.f32 %v1667_v41, %v1612_v39  ;;  %v5283_v1 = vpop.f32.mrb[47].mxu1 }
 0x52f   :  { %v2136_v1 = vld [vmem:[#allocation2 + $0x18] sm:$0xff] }
 0x530   :  { %v4714_v46 = vmul.f32 -1.442695, %v1668_v45 }
 0x532   :  { %5937 = vpow2.f32 %v4714_v46 }
 0x53c   :  { %v5938_v48 = vpop.eup %5937 }
 0x53d   :  { %v1672_v51 = vadd.f32 1.0, %v5938_v48 }
 0x53f   :  { %5939 = vrcp.f32 %v1672_v51 }
 0x540   :  { %5941 = vtanh.f32 %v1678_v50 }
 0x549   :  { %v5940_v52 = vpop.eup %5939 }
 0x54a   :  { %v1680_v53 = vsub.f32 1.0, %v5940_v52  ;;  %v5942_v54 = vpop.eup %5941  ;;  %v1682_v57 = vmul.f32 %v5940_v52, %v6635_v59  ;;  %v6711_v59 = vld [vmem:[#allocation6] sm:$0xff] }
 0x54b   :  { %v1810_v18 = vpack.c.bf16 %v6711_v59, %v6711_v59 }
 0x54c   :  { %v1681_v56 = vmul.f32 %v5942_v54, %v1680_v53 }
 0x54e   :  { %v1683_v31 = vadd.f32 %v1682_v57, %v1681_v56 }
 0x550   :  { %1684 = vst.msk [vmem:[#allocation5] sm:$0xff] %vm157_vm2, %v1683_v31  ;;  %v1685_v58 = vpack.c.bf16 %v1683_v31, %v1683_v31 }
 0x552   :  { %5297 = vmatmul.mubr.msk.bf16.vlgmr.msra.gmra.mrb[48].mxu1 %vm157_vm2, %v1685_v58  ;;  %5305 = vmatmul.mubr.msk.bf16.vlgmr.msra.gmra.mrb[52].mxu0 %vm157_vm2, %v1685_v58 }
 0x553   :  { %5309 = vmatpush3.bf16.msra.mxu1 %v6410_v7  ;;  %5325 = vmatpush3.bf16.msra.mxu0 %v6415_v8 }
 0x554   :  { %5310 = vmatprep.subr.bf16.mxu1 %v6114_v11  ;;  %5312 = vmatprep.mubr.msk.bf16.mxu1 %vm6115_vm3, %v6114_v11 }
 0x555   :  { %5326 = vmatprep.subr.bf16.mxu0 %v6114_v11  ;;  %5328 = vmatprep.mubr.msk.bf16.mxu0 %vm6115_vm3, %v6114_v11 }
 0x557   :  { %5311 = vmatpush3.bf16.msra.mxu1 %v6424_v21  ;;  %5327 = vmatpush3.bf16.msra.mxu0 %v6430_v12  ;;  %v6745_v26 = vld [vmem:[#allocation5] sm:$0xff] }
 0x558   :  { %5316 = vmatprep.subr.bf16.mxu1 %v6114_v11  ;;  %5332 = vmatprep.subr.bf16.mxu0 %v6114_v11  ;;  %v6756_v34 = vpack.c.bf16 %v6745_v26, %v6745_v26 }
 0x55a   :  { %5313 = vmatmul.mubr.msk.bf16.vlgmr.msra.gmra.mrb[52].mxu1 %vm157_vm2, %v1685_v58 }
 0x55b   :  { %5317 = vmatpush3.bf16.msra.mxu1 %v6442_v13  ;;  %5320 = vmatprep.mubr.msk.bf16.mxu1 %vm6115_vm3, %v6114_v11 }
 0x55c   :  { %5318 = vmatprep.subr.bf16.mxu1 %v6114_v11 }
 0x55e   :  { %5329 = vmatmul.mubr.msk.bf16.vlgmr.msra.gmra.mrb[52].mxu0 %vm157_vm2, %v1810_v18 }
 0x55f   :  { %5319 = vmatpush3.bf16.msra.mxu1 %v6456_v16  ;;  %5333 = vmatpush3.bf16.msra.mxu0 %v6461_v17 }
 0x560   :  { %5334 = vmatprep.subr.bf16.mxu0 %v6114_v11  ;;  %5336 = vmatprep.mubr.msk.bf16.mxu0 %vm6115_vm3, %v6114_v11 }
 0x561   :  { %5340 = vmatprep.subr.bf16.mxu1 %v6114_v11 }
 0x562   :  { %5321 = vmatmul.mubr.msk.bf16.vlgmr.msra.gmra.mrb[48].mxu1 %vm157_vm2, %v1810_v18 }
 0x563   :  { %5335 = vmatpush3.bf16.msra.mxu0 %v6472_v19  ;;  %5341 = vmatpush3.bf16.msra.mxu1 %v6515_v32 }
 0x564   :  { %5348 = vmatprep.subr.bf16.mxu0 %v6114_v11  ;;  %5342 = vmatprep.subr.bf16.mxu1 %v6114_v11 }
 0x565   :  { %5344 = vmatprep.mubr.msk.bf16.mxu1 %vm6115_vm3, %v6114_v11 }
 0x566   :  { %5337 = vmatmul.mubr.msk.bf16.vlgmr.msra.gmra.mrb[56].mxu0 %vm157_vm2, %v1810_v18 }
 0x567   :  { %5349 = vmatpush3.bf16.msra.mxu0 %v6738_v24  ;;  %5352 = vmatprep.mubr.msk.bf16.mxu0 %vm6115_vm3, %v6114_v11 }
 0x568   :  { %5350 = vmatprep.subr.bf16.mxu0 %v6114_v11  ;;  %5343 = vmatpush3.bf16.msra.mxu1 %v6522_v33 }
 0x569   :  { %5356 = vmatprep.subr.bf16.mxu1 %v6114_v11 }
 0x56b   :  { %5351 = vmatpush3.bf16.msra.mxu0 %v6751_v61 }
 0x56c   :  { %5364 = vmatprep.subr.bf16.mxu0 %v6114_v11 }
 0x56e   :  { %5353 = vmatmul.mubr.msk.bf16.vlgmr.msra.gmra.mrb[60].mxu0 %vm157_vm2, %v6756_v34 }
 0x56f   :  { %5365 = vmatpush3.bf16.msra.mxu0 %v6764_v14  ;;  %5368 = vmatprep.mubr.msk.bf16.mxu0 %vm6115_vm3, %v6114_v11 }
 0x570   :  { %5366 = vmatprep.subr.bf16.mxu0 %v6114_v11 }
 0x573   :  { %5367 = vmatpush3.bf16.msra.mxu0 %v6773_v23 }
 0x574   :  { %5380 = vmatprep.subr.bf16.mxu0 %v6114_v11 }
 0x576   :  { %5369 = vmatmul.mubr.msk.bf16.vlgmr.msra.gmra.mrb[64].mxu0 %vm157_vm2, %v6756_v34 }
 0x577   :  { %5381 = vmatpush3.bf16.msra.mxu0 %v6782_v63  ;;  %5384 = vmatprep.mubr.msk.bf16.mxu0 %vm6115_vm3, %v6114_v11 }
 0x578   :  { %5382 = vmatprep.subr.bf16.mxu0 %v6114_v11 }
 0x57b   :  { %5383 = vmatpush3.bf16.msra.mxu0 %v6791_v28 }
 0x57c   :  { %5404 = vmatprep.subr.bf16.mxu0 %v6114_v11 }
 0x62d   :  { %v1803_v2 = vpop.f32.mrb[52].mxu1 }
 0x62e   :  { %v5314_v3 = vpop.f32.mrb[53].mxu1 }
 0x62f   :  { %v1806_v4 = vpop.f32.mrb[54].mxu1 }
 0x630   :  { %v5315_v5 = vpop.f32.mrb[55].mxu1  ;;  %v1804_v4 = vadd.f32 %v6554_v43, %v1803_v2 }
 0x631   :  { %v1888_v6 = vpop.f32.mrb[52].mxu0 }
 0x632   :  { %v5330_v9 = vpop.f32.mrb[53].mxu0  ;;  %v5777_v35 = vadd.f32 %v6540_v47, %v1888_v6 }
 0x633   :  { %v1891_v22 = vpop.f32.mrb[54].mxu0 }
 0x634   :  { %v5331_v25 = vpop.f32.mrb[55].mxu0  ;;  %v4722_v40 = vmul.f32 -1.442695, %v5777_v35 }
 0x635   :  { %v1848_v20 = vpop.f32.mrb[48].mxu1 }
 0x636   :  { %v5775_v60 = vadd.f32 %v6538_v44, %v1848_v20  ;;  %v5322_v27 = vpop.f32.mrb[49].mxu1 }
 0x637   :  { %v1851_v30 = vpop.f32.mrb[50].mxu1 }
 0x638   :  { %v4721_v10 = vmul.f32 -1.442695, %v5775_v60  ;;  %v5323_v15 = vpop.f32.mrb[51].mxu1 }
 0x639   :  { %v1928_v36 = vpop.f32.mrb[56].mxu0 }
 0x63a   :  { %5943 = vpow2.f32 %v4721_v10  ;;  %v5338_v29 = vpop.f32.mrb[57].mxu0  ;;  %v1929_v18 = vadd.f32 %v6548_v38, %v1928_v36  ;;  %v6807_v36 = vld [vmem:[%s7474_s3 + $0x10] sm:$0xff]  }
 0x63b   :  { %v1931_v37 = vpop.f32.mrb[58].mxu0  ;;  %5945 = vpow2.f32 %v4722_v40  ;;  %v6834_v29 = vld [vmem:[%s7477_s6 + $0x8] sm:$0xff]  }
 0x63c   :  { %v5339_v39 = vpop.f32.mrb[59].mxu0  ;;  %v4725_v37 = vld [vmem:[%s7493_s28 + $0x10] sm:$0xff] }
 0x641   :  { %v2049_v41 = vpop.f32.mrb[60].mxu0 }
 0x642   :  { %v2050_v42 = vadd.f32 %v6377_v0, %v2049_v41  ;;  %v5354_v45 = vpop.f32.mrb[61].mxu0 }
 0x643   :  { %v2052_v46 = vpop.f32.mrb[62].mxu0 }
 0x644   :  { %v5944_v48 = vpop.eup %5943  ;;  %v2137_v49 = vadd.f32 %v2136_v1, %v2050_v42  ;;  %v5355_v50 = vpop.f32.mrb[63].mxu0 }
 0x645   :  { %v1938_v51 = vadd.f32 1.0, %v5944_v48  ;;  %v5946_v56 = vpop.eup %5945 }
 0x646   :  { %v4730_v52 = vmul.f32 -1.442695, %v2137_v49  ;;  %v1945_v58 = vadd.f32 1.0, %v5946_v56 }
 0x647   :  { %5947 = vrcp.f32 %v1938_v51  ;;  %v6852_v51 = vld [vmem:[%s7476_s5 + $0x1] ss:$0 sm:$0xff] }
 0x648   :  { %5949 = vpow2.f32 %v4730_v52 }
 0x649   :  { %v2129_v53 = vpop.f32.mrb[64].mxu0  ;;  %5951 = vrcp.f32 %v1945_v58 }
 0x64a   :  { %v5370_v54 = vpop.f32.mrb[65].mxu0  ;;  %v2130_v25 = vadd.f32 %v6403_v55, %v2129_v53  ;;  %v6816_v55 = vld [vmem:[%s7474_s3 + $0x18] sm:$0xff]  }
 0x64b   :  { %v2132_v57 = vpop.f32.mrb[66].mxu0  ;;  %v2145_v54 = vld [vmem:[#allocation3 + $0x18] sm:$0xff] }
 0x64c   :  { %v5371_v31 = vpop.f32.mrb[67].mxu0 }
 0x651   :  { %v5948_v3 = vpop.eup %5947 }
 0x652   :  { %v5950_v0 = vpop.eup %5949  ;;  %v1948_v5 = vmul.f32 %v5948_v3, %v1929_v18  ;;  %v2154_v3 = vld [vmem:[#allocation4 + $0x18] sm:$0xff] }
 0x653   :  { %v2141_v6 = vadd.f32 1.0, %v5950_v0  ;;  %v5952_v22 = vpop.eup %5951 }
 0x654   :  { %v1949_v9 = vadd.f32 %v1948_v5, %v1804_v4  ;;  %v1951_v60 = vsub.f32 1.0, %v5952_v22  ;;  %v1953_v10 = vmul.f32 %v5952_v22, %v6711_v59  ;;  %v6825_v59 = vld [vmem:[%s7477_s6] sm:$0xff]  }
 0x655   :  { %5953 = vrcp.f32 %v2141_v6 }
 0x656   :  { %5955 = vtanh.f32 %v1949_v9 }
 0x65f   :  { %v5954_v20 = vpop.eup %5953 }
 0x660   :  { %v5956_v27 = vpop.eup %5955  ;;  %v2155_v30 = vmul.f32 %v5954_v20, %v2130_v25 }
 0x661   :  { %v1952_v15 = vmul.f32 %v5956_v27, %v1951_v60 }
 0x662   :  { %v2156_v0 = vadd.f32 %v2155_v30, %v2154_v3 }
 0x663   :  { %v1954_v35 = vadd.f32 %v1953_v10, %v1952_v15 }
 0x665   :  { %1955 = vst.msk [vmem:[#allocation6] sm:$0xff] %vm157_vm2, %v1954_v35  ;;  %v1956_v2 = vpack.c.bf16 %v1954_v35, %v1954_v35 }
 0x667   :  { %5345 = vmatmul.mubr.msk.bf16.vlgmr.msra.gmra.mrb[56].mxu1 %vm157_vm2, %v1956_v2 }
 0x668   :  { %5357 = vmatpush3.bf16.msra.mxu1 %v6807_v36  ;;  %5360 = vmatprep.mubr.msk.bf16.mxu1 %vm6115_vm3, %v6114_v11 }
 0x669   :  { %5358 = vmatprep.subr.bf16.mxu1 %v6114_v11 }
 0x66c   :  { %5359 = vmatpush3.bf16.msra.mxu1 %v6816_v55 }
 0x66d   :  { %5372 = vmatprep.subr.bf16.mxu1 %v6114_v11 }
 0x66f   :  { %5361 = vmatmul.mubr.msk.bf16.vlgmr.msra.gmra.mrb[60].mxu1 %vm157_vm2, %v6756_v34  ;;  %v4724_v34 = vld [vmem:[%s7494_s21 + $0x10] sm:$0xff] }
 0x670   :  { %5373 = vmatpush3.bf16.msra.mxu1 %v6825_v59  ;;  %5376 = vmatprep.mubr.msk.bf16.mxu1 %vm6115_vm3, %v6114_v11  ;;  %v2005_v39 = vsub.f32 1.0, %v4724_v34  ;;  %v2004_v42 = vmul.f32 %v4725_v37, %v4724_v34 }
 0x671   :  { %5374 = vmatprep.subr.bf16.mxu1 %v6114_v11 }
 0x674   :  { %5375 = vmatpush3.bf16.msra.mxu1 %v6834_v29 }
 0x675   :  { %5388 = vmatprep.subr.bf16.mxu1 %v6114_v11 }
 0x73a   :  { %v1994_v40 = vpop.f32.mrb[56].mxu1 }
 0x73b   :  { %v1995_v41 = vadd.f32 %v6581_v62, %v1994_v40  ;;  %v5346_v45 = vpop.f32.mrb[57].mxu1 }
 0x73c   :  { %v1997_v1 = vpop.f32.mrb[58].mxu1 }
 0x73d   :  { %v2006_v46 = vmul.f32 %v2005_v39, %v1995_v41  ;;  %v5347_v48 = vpop.f32.mrb[59].mxu1 }
 0x73f   :  { %v2007_v49 = vadd.f32 %v2006_v46, %v2004_v42  ;;  %v6930_v46 = vld [vmem:[%s7476_s5] ss:$0 sm:$0xff] }
 0x741   :  { %4726 = vst.msk [vmem:[%s7486_s15 + $0x10] sm:$0xff] %vm75_vm1, %v2007_v49 }
 0x742   :  { %v2089_v50 = vpop.f32.mrb[60].mxu1 }
 0x743   :  { %v2090_v52 = vadd.f32 %v6852_v51, %v2089_v50  ;;  %v5362_v53 = vpop.f32.mrb[61].mxu1  ;;  %v2614_v50 = vld [vmem:[#allocation2 + $0x20] sm:$0xff] }
 0x744   :  { %v2092_v56 = vpop.f32.mrb[62].mxu1 }
 0x745   :  { %v2146_v57 = vadd.f32 %v2145_v54, %v2090_v52  ;;  %v5363_v31 = vpop.f32.mrb[63].mxu1 }
 0x747   :  { %v4731_v58 = vmul.f32 -1.442695, %v2146_v57 }
 0x749   :  { %5957 = vpow2.f32 %v4731_v58 }
 0x753   :  { %v5958_v18 = vpop.eup %5957 }
 0x754   :  { %v2150_v4 = vadd.f32 1.0, %v5958_v18 }
 0x756   :  { %5959 = vrcp.f32 %v2150_v4 }
 0x757   :  { %5961 = vtanh.f32 %v2156_v0 }
 0x760   :  { %v5960_v5 = vpop.eup %5959 }
 0x761   :  { %v2158_v6 = vsub.f32 1.0, %v5960_v5  ;;  %v5962_v9 = vpop.eup %5961  ;;  %v2160_v25 = vmul.f32 %v5960_v5, %v6745_v26 }
 0x763   :  { %v2159_v22 = vmul.f32 %v5962_v9, %v2158_v6 }
 0x765   :  { %v2161_v20 = vadd.f32 %v2160_v25, %v2159_v22 }
 0x767   :  { %2162 = vst.msk [vmem:[#allocation5] sm:$0xff] %vm157_vm2, %v2161_v20  ;;  %v2163_v60 = vpack.c.bf16 %v2161_v20, %v2161_v20 }
 0x769   :  { %5377 = vmatmul.mubr.msk.bf16.vlgmr.msra.gmra.mrb[64].mxu1 %vm157_vm2, %v2163_v60  ;;  %5385 = vmatmul.mubr.msk.bf16.vlgmr.msra.gmra.mrb[68].mxu0 %vm157_vm2, %v2163_v60 }
 0x76a   :  { %5389 = vmatpush3.bf16.msra.mxu1 %v6410_v7  ;;  %5405 = vmatpush3.bf16.msra.mxu0 %v6415_v8  ;;  %v6871_v7 = vld [vmem:[#allocation6] sm:$0xff] }
 0x76b   :  { %5390 = vmatprep.subr.bf16.mxu1 %v6114_v11  ;;  %5392 = vmatprep.mubr.msk.bf16.mxu1 %vm6115_vm3, %v6114_v11  ;;  %v2288_v8 = vpack.c.bf16 %v6871_v7, %v6871_v7 }
 0x76c   :  { %5406 = vmatprep.subr.bf16.mxu0 %v6114_v11  ;;  %5408 = vmatprep.mubr.msk.bf16.mxu0 %vm6115_vm3, %v6114_v11 }
 0x76e   :  { %5391 = vmatpush3.bf16.msra.mxu1 %v6424_v21  ;;  %5407 = vmatpush3.bf16.msra.mxu0 %v6430_v12  ;;  %v6900_v21 = vld [vmem:[#allocation5] sm:$0xff] }
 0x76f   :  { %5396 = vmatprep.subr.bf16.mxu1 %v6114_v11  ;;  %5412 = vmatprep.subr.bf16.mxu0 %v6114_v11  ;;  %v6906_v12 = vpack.c.bf16 %v6900_v21, %v6900_v21 }
 0x771   :  { %5393 = vmatmul.mubr.msk.bf16.vlgmr.msra.gmra.mrb[68].mxu1 %vm157_vm2, %v2163_v60 }
 0x772   :  { %5397 = vmatpush3.bf16.msra.mxu1 %v6442_v13  ;;  %5400 = vmatprep.mubr.msk.bf16.mxu1 %vm6115_vm3, %v6114_v11 }
 0x773   :  { %5398 = vmatprep.subr.bf16.mxu1 %v6114_v11 }
 0x775   :  { %5409 = vmatmul.mubr.msk.bf16.vlgmr.msra.gmra.mrb[68].mxu0 %vm157_vm2, %v2288_v8 }
 0x776   :  { %5399 = vmatpush3.bf16.msra.mxu1 %v6456_v16  ;;  %5413 = vmatpush3.bf16.msra.mxu0 %v6461_v17 }
 0x777   :  { %5414 = vmatprep.subr.bf16.mxu0 %v6114_v11  ;;  %5416 = vmatprep.mubr.msk.bf16.mxu0 %vm6115_vm3, %v6114_v11 }
 0x778   :  { %5420 = vmatprep.subr.bf16.mxu1 %v6114_v11 }
 0x779   :  { %5401 = vmatmul.mubr.msk.bf16.vlgmr.msra.gmra.mrb[64].mxu1 %vm157_vm2, %v2288_v8 }
 0x77a   :  { %5415 = vmatpush3.bf16.msra.mxu0 %v6472_v19  ;;  %5421 = vmatpush3.bf16.msra.mxu1 %v6515_v32 }
 0x77b   :  { %5428 = vmatprep.subr.bf16.mxu0 %v6114_v11  ;;  %5422 = vmatprep.subr.bf16.mxu1 %v6114_v11 }
 0x77c   :  { %5424 = vmatprep.mubr.msk.bf16.mxu1 %vm6115_vm3, %v6114_v11 }
 0x77d   :  { %5417 = vmatmul.mubr.msk.bf16.vlgmr.msra.gmra.mrb[72].mxu0 %vm157_vm2, %v2288_v8 }
 0x77e   :  { %5429 = vmatpush3.bf16.msra.mxu0 %v6738_v24  ;;  %5432 = vmatprep.mubr.msk.bf16.mxu0 %vm6115_vm3, %v6114_v11 }
 0x77f   :  { %5430 = vmatprep.subr.bf16.mxu0 %v6114_v11  ;;  %5423 = vmatpush3.bf16.msra.mxu1 %v6522_v33 }
 0x780   :  { %5436 = vmatprep.subr.bf16.mxu1 %v6114_v11 }
 0x782   :  { %5431 = vmatpush3.bf16.msra.mxu0 %v6751_v61 }
 0x783   :  { %5444 = vmatprep.subr.bf16.mxu0 %v6114_v11 }
 0x785   :  { %5433 = vmatmul.mubr.msk.bf16.vlgmr.msra.gmra.mrb[76].mxu0 %vm157_vm2, %v6906_v12 }
 0x786   :  { %5445 = vmatpush3.bf16.msra.mxu0 %v6764_v14  ;;  %5448 = vmatprep.mubr.msk.bf16.mxu0 %vm6115_vm3, %v6114_v11 }
 0x787   :  { %5446 = vmatprep.subr.bf16.mxu0 %v6114_v11 }
 0x78a   :  { %5447 = vmatpush3.bf16.msra.mxu0 %v6773_v23 }
 0x78b   :  { %5460 = vmatprep.subr.bf16.mxu0 %v6114_v11 }
 0x78d   :  { %5449 = vmatmul.mubr.msk.bf16.vlgmr.msra.gmra.mrb[80].mxu0 %vm157_vm2, %v6906_v12 }
 0x78e   :  { %5461 = vmatpush3.bf16.msra.mxu0 %v6782_v63  ;;  %5464 = vmatprep.mubr.msk.bf16.mxu0 %vm6115_vm3, %v6114_v11 }
 0x78f   :  { %5462 = vmatprep.subr.bf16.mxu0 %v6114_v11 }
 0x792   :  { %5463 = vmatpush3.bf16.msra.mxu0 %v6791_v28 }
 0x793   :  { %5484 = vmatprep.subr.bf16.mxu0 %v6114_v11 }
 0x844   :  { %v2281_v13 = vpop.f32.mrb[68].mxu1 }
 0x845   :  { %v5394_v16 = vpop.f32.mrb[69].mxu1  ;;  %v2282_v25 = vadd.f32 %v6554_v43, %v2281_v13 }
 0x846   :  { %v2284_v17 = vpop.f32.mrb[70].mxu1 }
 0x847   :  { %v5395_v19 = vpop.f32.mrb[71].mxu1  ;;  %v6938_v17 = vld [vmem:[%s7476_s5 + $0x2] ss:$0 sm:$0xff] }
 0x848   :  { %v2366_v32 = vpop.f32.mrb[68].mxu0 }
 0x849   :  { %v5410_v33 = vpop.f32.mrb[69].mxu0  ;;  %v5781_v37 = vadd.f32 %v6540_v47, %v2366_v32 }
 0x84a   :  { %v2369_v26 = vpop.f32.mrb[70].mxu0 }
 0x84b   :  { %v5411_v27 = vpop.f32.mrb[71].mxu0  ;;  %v4739_v45 = vmul.f32 -1.442695, %v5781_v37 }
 0x84c   :  { %v2326_v30 = vpop.f32.mrb[64].mxu1 }
 0x84d   :  { %v5779_v10 = vadd.f32 %v6538_v44, %v2326_v30  ;;  %v5402_v15 = vpop.f32.mrb[65].mxu1 }
 0x84e   :  { %v2329_v35 = vpop.f32.mrb[66].mxu1 }
 0x84f   :  { %v4738_v2 = vmul.f32 -1.442695, %v5779_v10  ;;  %v5403_v34 = vpop.f32.mrb[67].mxu1  ;;  %v4742_v10 = vld [vmem:[%s7493_s28 + $0x18] sm:$0xff] }
 0x850   :  { %v2406_v39 = vpop.f32.mrb[72].mxu0 }
 0x851   :  { %5963 = vpow2.f32 %v4738_v2  ;;  %v5418_v40 = vpop.f32.mrb[73].mxu0  ;;  %v2407_v6 = vadd.f32 %v6548_v38, %v2406_v39 }
 0x852   :  { %v2409_v41 = vpop.f32.mrb[74].mxu0  ;;  %5965 = vpow2.f32 %v4739_v45 }
 0x853   :  { %v5419_v42 = vpop.f32.mrb[75].mxu0 }
 0x858   :  { %v2527_v1 = vpop.f32.mrb[76].mxu0 }
 0x859   :  { %v2528_v48 = vadd.f32 %v6930_v46, %v2527_v1  ;;  %v5434_v49 = vpop.f32.mrb[77].mxu0 }
 0x85a   :  { %v2530_v52 = vpop.f32.mrb[78].mxu0 }
 0x85b   :  { %v5964_v53 = vpop.eup %5963  ;;  %v2615_v54 = vadd.f32 %v2614_v50, %v2528_v48  ;;  %v5435_v56 = vpop.f32.mrb[79].mxu0  ;;  %v2623_v48 = vld [vmem:[#allocation3 + $0x20] sm:$0xff] }
 0x85c   :  { %v2416_v57 = vadd.f32 1.0, %v5964_v53  ;;  %v5966_v3 = vpop.eup %5965 }
 0x85d   :  { %v4747_v31 = vmul.f32 -1.442695, %v2615_v54  ;;  %v2423_v5 = vadd.f32 1.0, %v5966_v3  ;;  %v2632_v54 = vld [vmem:[#allocation4 + $0x20] sm:$0xff] }
 0x85e   :  { %5967 = vrcp.f32 %v2416_v57 }
 0x85f   :  { %5969 = vpow2.f32 %v4747_v31 }
 0x860   :  { %v2607_v58 = vpop.f32.mrb[80].mxu0  ;;  %5971 = vrcp.f32 %v2423_v5 }
 0x861   :  { %v5450_v18 = vpop.f32.mrb[81].mxu0  ;;  %v2608_v19 = vadd.f32 %v6938_v17, %v2607_v58 }
 0x862   :  { %v2610_v0 = vpop.f32.mrb[82].mxu0 }
 0x863   :  { %v5451_v4 = vpop.f32.mrb[83].mxu0 }
 0x868   :  { %v5968_v9 = vpop.eup %5967 }
 0x869   :  { %v5970_v22 = vpop.eup %5969  ;;  %v2426_v20 = vmul.f32 %v5968_v9, %v2407_v6  ;;  %v6977_v6 = vld [vmem:[%s7477_s6 + $0x20] sm:$0xff]   ;;  %v6983_v9 = vld [vmem:[%s7478_s7 + $0x10] sm:$0xff]  }
 0x86a   :  { %v2619_v60 = vadd.f32 1.0, %v5970_v22  ;;  %v5972_v16 = vpop.eup %5971  ;;  %v7001_v22 = vld [vmem:[%s7478_s7 + $0x18] sm:$0xff]  }
 0x86b   :  { %v2427_v8 = vadd.f32 %v2426_v20, %v2282_v25  ;;  %v2429_v38 = vsub.f32 1.0, %v5972_v16  ;;  %v2431_v43 = vmul.f32 %v5972_v16, %v6871_v7  ;;  %v4741_v7 = vld [vmem:[%s7494_s21 + $0x18] sm:$0xff]  ;;  %v7012_v20 = vld [vmem:[%s7478_s7] sm:$0xff]  }
 0x86c   :  { %5973 = vrcp.f32 %v2619_v60  ;;  %v2482_v2 = vmul.f32 %v4742_v10, %v4741_v7  ;;  %v7030_v16 = vld [vmem:[%s7478_s7 + $0x20] sm:$0xff]  }
 0x86d   :  { %5975 = vtanh.f32 %v2427_v8  ;;  %v7024_v8 = vld [vmem:[%s7478_s7 + $0x8] sm:$0xff]  }
 0x876   :  { %v5974_v32 = vpop.eup %5973 }
 0x877   :  { %v5976_v33 = vpop.eup %5975  ;;  %v2633_v26 = vmul.f32 %v5974_v32, %v2608_v19  ;;  %v7041_v19 = vld [vmem:[%s7478_s7 + $0x28] sm:$0xff]   ;;  %v7047_v32 = vld [vmem:[%s7481_s10] sm:$0xff]  }
 0x878   :  { %v2430_v13 = vmul.f32 %v5976_v33, %v2429_v38  ;;  %v7062_v38 = vld [vmem:[%s7481_s10 + $0x8] sm:$0xff]  }
 0x879   :  { %v2634_v56 = vadd.f32 %v2633_v26, %v2632_v54 }
 0x87a   :  { %v2432_v27 = vadd.f32 %v2431_v43, %v2430_v13 }
 0x87c   :  { %2433 = vst.msk [vmem:[#allocation6] sm:$0xff] %vm157_vm2, %v2432_v27  ;;  %v2434_v30 = vpack.c.bf16 %v2432_v27, %v2432_v27 }
 0x87e   :  { %5425 = vmatmul.mubr.msk.bf16.vlgmr.msra.gmra.mrb[72].mxu1 %vm157_vm2, %v2434_v30 }
 0x87f   :  { %5437 = vmatpush3.bf16.msra.mxu1 %v6807_v36  ;;  %5440 = vmatprep.mubr.msk.bf16.mxu1 %vm6115_vm3, %v6114_v11 }
 0x880   :  { %5438 = vmatprep.subr.bf16.mxu1 %v6114_v11 }
 0x883   :  { %5439 = vmatpush3.bf16.msra.mxu1 %v6816_v55  ;;  %v7006_v25 = vld [vmem:[#allocation6] sm:$0xff] }
 0x884   :  { %5452 = vmatprep.subr.bf16.mxu1 %v6114_v11  ;;  %v2766_v60 = vpack.c.bf16 %v7006_v25, %v7006_v25 }
 0x886   :  { %5441 = vmatmul.mubr.msk.bf16.vlgmr.msra.gmra.mrb[76].mxu1 %vm157_vm2, %v6906_v12  ;;  %v2483_v12 = vsub.f32 1.0, %v4741_v7 }
 0x887   :  { %5453 = vmatpush3.bf16.msra.mxu1 %v6825_v59  ;;  %5456 = vmatprep.mubr.msk.bf16.mxu1 %vm6115_vm3, %v6114_v11 }
 0x888   :  { %5454 = vmatprep.subr.bf16.mxu1 %v6114_v11 }
 0x88b   :  { %5455 = vmatpush3.bf16.msra.mxu1 %v6834_v29 }
 0x88c   :  { %5468 = vmatprep.subr.bf16.mxu1 %v6114_v11 }
 0x951   :  { %v2472_v15 = vpop.f32.mrb[72].mxu1 }
 0x952   :  { %v2473_v35 = vadd.f32 %v6581_v62, %v2472_v15  ;;  %v5426_v34 = vpop.f32.mrb[73].mxu1 }
 0x953   :  { %v2475_v37 = vpop.f32.mrb[74].mxu1 }
 0x954   :  { %v2484_v39 = vmul.f32 %v2483_v12, %v2473_v35  ;;  %v5427_v40 = vpop.f32.mrb[75].mxu1 }
 0x956   :  { %v2485_v41 = vadd.f32 %v2484_v39, %v2482_v2 }
 0x958   :  { %4743 = vst.msk [vmem:[%s7486_s15 + $0x18] sm:$0xff] %vm75_vm1, %v2485_v41 }
 0x959   :  { %v2567_v42 = vpop.f32.mrb[76].mxu1 }
 0x95a   :  { %v2568_v45 = vadd.f32 %v6852_v51, %v2567_v42  ;;  %v5442_v1 = vpop.f32.mrb[77].mxu1 }
 0x95b   :  { %v2570_v49 = vpop.f32.mrb[78].mxu1 }
 0x95c   :  { %v2624_v50 = vadd.f32 %v2623_v48, %v2568_v45  ;;  %v5443_v52 = vpop.f32.mrb[79].mxu1 }
 0x95e   :  { %v4748_v62 = vmul.f32 -1.442695, %v2624_v50 }
 0x960   :  { %5977 = vpow2.f32 %v4748_v62 }
 0x96a   :  { %v5978_v53 = vpop.eup %5977 }
 0x96b   :  { %v2628_v57 = vadd.f32 1.0, %v5978_v53  ;;  %v3092_v53 = vld [vmem:[#allocation2 + $0x28] sm:$0xff] }
 0x96d   :  { %5979 = vrcp.f32 %v2628_v57 }
 0x96e   :  { %5981 = vtanh.f32 %v2634_v56 }
 0x977   :  { %v5980_v31 = vpop.eup %5979 }
 0x978   :  { %v2636_v58 = vsub.f32 1.0, %v5980_v31  ;;  %v5982_v18 = vpop.eup %5981  ;;  %v2638_v0 = vmul.f32 %v5980_v31, %v6900_v21  ;;  %v6995_v21 = vld [vmem:[%s7477_s6 + $0x28] sm:$0xff]  }
 0x97a   :  { %v2637_v3 = vmul.f32 %v5982_v18, %v2636_v58 }
 0x97c   :  { %v2639_v4 = vadd.f32 %v2638_v0, %v2637_v3 }
 0x97e   :  { %2640 = vst.msk [vmem:[#allocation5] sm:$0xff] %vm157_vm2, %v2639_v4  ;;  %v2641_v5 = vpack.c.bf16 %v2639_v4, %v2639_v4 }
 0x980   :  { %5457 = vmatmul.mubr.msk.bf16.vlgmr.msra.gmra.mrb[80].mxu1 %vm157_vm2, %v2641_v5  ;;  %5465 = vmatmul.mubr.msk.bf16.vlgmr.msra.gmra.mrb[84].mxu0 %vm157_vm2, %v2641_v5 }
 0x981   :  { %5469 = vmatpush3.bf16.msra.mxu1 %v6977_v6  ;;  %5485 = vmatpush3.bf16.msra.mxu0 %v6983_v9 }
 0x982   :  { %5470 = vmatprep.subr.bf16.mxu1 %v6114_v11  ;;  %5472 = vmatprep.mubr.msk.bf16.mxu1 %vm6115_vm3, %v6114_v11 }
 0x983   :  { %5486 = vmatprep.subr.bf16.mxu0 %v6114_v11  ;;  %5488 = vmatprep.mubr.msk.bf16.mxu0 %vm6115_vm3, %v6114_v11 }
 0x985   :  { %5471 = vmatpush3.bf16.msra.mxu1 %v6995_v21  ;;  %5487 = vmatpush3.bf16.msra.mxu0 %v7001_v22  ;;  %v7065_v33 = vld [vmem:[#allocation5] sm:$0xff] }
 0x986   :  { %5476 = vmatprep.subr.bf16.mxu1 %v6114_v11  ;;  %5492 = vmatprep.subr.bf16.mxu0 %v6114_v11  ;;  %v7071_v26 = vpack.c.bf16 %v7065_v33, %v7065_v33 }
 0x988   :  { %5473 = vmatmul.mubr.msk.bf16.vlgmr.msra.gmra.mrb[84].mxu1 %vm157_vm2, %v2641_v5 }
 0x989   :  { %5477 = vmatpush3.bf16.msra.mxu1 %v7012_v20  ;;  %5480 = vmatprep.mubr.msk.bf16.mxu1 %vm6115_vm3, %v6114_v11 }
 0x98a   :  { %5478 = vmatprep.subr.bf16.mxu1 %v6114_v11 }
 0x98c   :  { %5489 = vmatmul.mubr.msk.bf16.vlgmr.msra.gmra.mrb[84].mxu0 %vm157_vm2, %v2766_v60 }
 0x98d   :  { %5479 = vmatpush3.bf16.msra.mxu1 %v7024_v8  ;;  %5493 = vmatpush3.bf16.msra.mxu0 %v7030_v16 }
 0x98e   :  { %5494 = vmatprep.subr.bf16.mxu0 %v6114_v11  ;;  %5496 = vmatprep.mubr.msk.bf16.mxu0 %vm6115_vm3, %v6114_v11 }
 0x98f   :  { %5500 = vmatprep.subr.bf16.mxu1 %v6114_v11 }
 0x990   :  { %5481 = vmatmul.mubr.msk.bf16.vlgmr.msra.gmra.mrb[80].mxu1 %vm157_vm2, %v2766_v60 }
 0x991   :  { %5495 = vmatpush3.bf16.msra.mxu0 %v7041_v19  ;;  %5501 = vmatpush3.bf16.msra.mxu1 %v7047_v32 }
 0x992   :  { %5508 = vmatprep.subr.bf16.mxu0 %v6114_v11  ;;  %5502 = vmatprep.subr.bf16.mxu1 %v6114_v11 }
 0x993   :  { %5504 = vmatprep.mubr.msk.bf16.mxu1 %vm6115_vm3, %v6114_v11 }
 0x994   :  { %5497 = vmatmul.mubr.msk.bf16.vlgmr.msra.gmra.mrb[88].mxu0 %vm157_vm2, %v2766_v60 }
 0x995   :  { %5509 = vmatpush3.bf16.msra.mxu0 %v6738_v24  ;;  %5512 = vmatprep.mubr.msk.bf16.mxu0 %vm6115_vm3, %v6114_v11 }
 0x996   :  { %5510 = vmatprep.subr.bf16.mxu0 %v6114_v11  ;;  %5503 = vmatpush3.bf16.msra.mxu1 %v7062_v38 }
 0x997   :  { %5516 = vmatprep.subr.bf16.mxu1 %v6114_v11 }
 0x999   :  { %5511 = vmatpush3.bf16.msra.mxu0 %v6751_v61 }
 0x99a   :  { %5524 = vmatprep.subr.bf16.mxu0 %v6114_v11 }
 0x99c   :  { %5513 = vmatmul.mubr.msk.bf16.vlgmr.msra.gmra.mrb[92].mxu0 %vm157_vm2, %v7071_v26 }
 0x99d   :  { %5525 = vmatpush3.bf16.msra.mxu0 %v6764_v14  ;;  %5528 = vmatprep.mubr.msk.bf16.mxu0 %vm6115_vm3, %v6114_v11 }
 0x99e   :  { %5526 = vmatprep.subr.bf16.mxu0 %v6114_v11 }
 0x9a1   :  { %5527 = vmatpush3.bf16.msra.mxu0 %v6773_v23 }
 0x9a2   :  { %5540 = vmatprep.subr.bf16.mxu0 %v6114_v11 }
 0x9a4   :  { %5529 = vmatmul.mubr.msk.bf16.vlgmr.msra.gmra.mrb[96].mxu0 %vm157_vm2, %v7071_v26 }
 0x9a5   :  { %5541 = vmatpush3.bf16.msra.mxu0 %v6782_v63  ;;  %5544 = vmatprep.mubr.msk.bf16.mxu0 %vm6115_vm3, %v6114_v11 }
 0x9a6   :  { %5542 = vmatprep.subr.bf16.mxu0 %v6114_v11 }
 0x9a9   :  { %5543 = vmatpush3.bf16.msra.mxu0 %v6791_v28 }
 0x9aa   :  { %5564 = vmatprep.subr.bf16.mxu0 %v6114_v11 }
 0xa5b   :  { %v2759_v43 = vpop.f32.mrb[84].mxu1 }
 0xa5c   :  { %v5474_v13 = vpop.f32.mrb[85].mxu1 }
 0xa5d   :  { %v2762_v27 = vpop.f32.mrb[86].mxu1 }
 0xa5e   :  { %v5475_v30 = vpop.f32.mrb[87].mxu1  ;;  %v7096_v27 = vld [vmem:[%s7480_s9 + $0x2] ss:$0 sm:$0xff] }
 0xa5f   :  { %v2844_v7 = vpop.f32.mrb[84].mxu0 }
 0xa60   :  { %v5490_v10 = vpop.f32.mrb[85].mxu0  ;;  %v5785_v41 = vadd.f32 %v6540_v47, %v2844_v7 }
 0xa61   :  { %v2847_v12 = vpop.f32.mrb[86].mxu0 }
 0xa62   :  { %v5491_v15 = vpop.f32.mrb[87].mxu0  ;;  %v4756_v49 = vmul.f32 -1.442695, %v5785_v41  ;;  %v7102_v12 = vld [vmem:[%s7479_s8 + $0x2] ss:$0 sm:$0xff] }
 0xa63   :  { %v2804_v35 = vpop.f32.mrb[80].mxu1  ;;  %v2760_v15 = vadd.f32 %v7102_v12, %v2759_v43 }
 0xa64   :  { %v5783_v2 = vadd.f32 %v6538_v44, %v2804_v35  ;;  %v5482_v34 = vpop.f32.mrb[81].mxu1 }
 0xa65   :  { %v2807_v37 = vpop.f32.mrb[82].mxu1 }
 0xa66   :  { %v4755_v39 = vmul.f32 -1.442695, %v5783_v2  ;;  %v5483_v40 = vpop.f32.mrb[83].mxu1 }
 0xa67   :  { %v2884_v42 = vpop.f32.mrb[88].mxu0 }
 0xa68   :  { %5983 = vpow2.f32 %v4755_v39  ;;  %v5498_v45 = vpop.f32.mrb[89].mxu0  ;;  %v2885_v30 = vadd.f32 %v7096_v27, %v2884_v42 }
 0xa69   :  { %v2887_v1 = vpop.f32.mrb[90].mxu0  ;;  %5985 = vpow2.f32 %v4756_v49 }
 0xa6a   :  { %v5499_v48 = vpop.f32.mrb[91].mxu0 }
 0xa6f   :  { %v3005_v50 = vpop.f32.mrb[92].mxu0 }
 0xa70   :  { %v3006_v52 = vadd.f32 %v6930_v46, %v3005_v50  ;;  %v5514_v62 = vpop.f32.mrb[93].mxu0  ;;  %v4759_v50 = vld [vmem:[%s7493_s28 + $0x20] sm:$0xff] }
 0xa71   :  { %v3008_v54 = vpop.f32.mrb[94].mxu0  ;;  %v7132_v62 = vld [vmem:[%s7482_s11] ss:$0 sm:$0xff] }
 0xa72   :  { %v5984_v56 = vpop.eup %5983  ;;  %v3093_v57 = vadd.f32 %v3092_v53, %v3006_v52  ;;  %v5515_v31 = vpop.f32.mrb[95].mxu0 }
 0xa73   :  { %v2894_v58 = vadd.f32 1.0, %v5984_v56  ;;  %v5986_v4 = vpop.eup %5985 }
 0xa74   :  { %v4764_v18 = vmul.f32 -1.442695, %v3093_v57  ;;  %v2901_v13 = vadd.f32 1.0, %v5986_v4 }
 0xa75   :  { %5987 = vrcp.f32 %v2894_v58 }
 0xa76   :  { %5989 = vpow2.f32 %v4764_v18 }
 0xa77   :  { %v3085_v3 = vpop.f32.mrb[96].mxu0  ;;  %5991 = vrcp.f32 %v2901_v13 }
 0xa78   :  { %v5530_v0 = vpop.f32.mrb[97].mxu0  ;;  %v3086_v39 = vadd.f32 %v6938_v17, %v3085_v3 }
 0xa79   :  { %v3088_v5 = vpop.f32.mrb[98].mxu0 }
 0xa7a   :  { %v5531_v60 = vpop.f32.mrb[99].mxu0  ;;  %v3101_v5 = vld [vmem:[#allocation3 + $0x28] sm:$0xff] }
 0xa7f   :  { %v5988_v7 = vpop.eup %5987 }
 0xa80   :  { %v5990_v10 = vpop.eup %5989  ;;  %v2904_v35 = vmul.f32 %v5988_v7, %v2885_v30 }
 0xa81   :  { %v3097_v2 = vadd.f32 1.0, %v5990_v10  ;;  %v5992_v37 = vpop.eup %5991 }
 0xa82   :  { %v2905_v34 = vadd.f32 %v2904_v35, %v2760_v15  ;;  %v2907_v41 = vsub.f32 1.0, %v5992_v37  ;;  %v2909_v1 = vmul.f32 %v5992_v37, %v7006_v25  ;;  %v4758_v25 = vld [vmem:[%s7494_s21 + $0x20] sm:$0xff]  ;;  %v3110_v15 = vld [vmem:[#allocation4 + $0x28] sm:$0xff] }
 0xa83   :  { %5993 = vrcp.f32 %v3097_v2  ;;  %v2960_v54 = vmul.f32 %v4759_v50, %v4758_v25 }
 0xa84   :  { %5995 = vtanh.f32 %v2905_v34 }
 0xa8d   :  { %v5994_v40 = vpop.eup %5993 }
 0xa8e   :  { %v5996_v42 = vpop.eup %5995  ;;  %v3111_v45 = vmul.f32 %v5994_v40, %v3086_v39 }
 0xa8f   :  { %v2908_v48 = vmul.f32 %v5996_v42, %v2907_v41 }
 0xa90   :  { %v3112_v35 = vadd.f32 %v3111_v45, %v3110_v15 }
 0xa91   :  { %v2910_v49 = vadd.f32 %v2909_v1, %v2908_v48 }
 0xa93   :  { %2911 = vst.msk [vmem:[#allocation6] sm:$0xff] %vm157_vm2, %v2910_v49  ;;  %v2912_v43 = vpack.c.bf16 %v2910_v49, %v2910_v49 }
 0xa95   :  { %5505 = vmatmul.mubr.msk.bf16.vlgmr.msra.gmra.mrb[88].mxu1 %vm157_vm2, %v2912_v43 }
 0xa96   :  { %5517 = vmatpush3.bf16.msra.mxu1 %v6807_v36  ;;  %5520 = vmatprep.mubr.msk.bf16.mxu1 %vm6115_vm3, %v6114_v11 }
 0xa97   :  { %5518 = vmatprep.subr.bf16.mxu1 %v6114_v11 }
 0xa9a   :  { %5519 = vmatpush3.bf16.msra.mxu1 %v6816_v55 }
 0xa9b   :  { %5532 = vmatprep.subr.bf16.mxu1 %v6114_v11 }
 0xa9d   :  { %5521 = vmatmul.mubr.msk.bf16.vlgmr.msra.gmra.mrb[92].mxu1 %vm157_vm2, %v7071_v26  ;;  %v2961_v26 = vsub.f32 1.0, %v4758_v25 }
 0xa9e   :  { %5533 = vmatpush3.bf16.msra.mxu1 %v6825_v59  ;;  %5536 = vmatprep.mubr.msk.bf16.mxu1 %vm6115_vm3, %v6114_v11 }
 0xa9f   :  { %5534 = vmatprep.subr.bf16.mxu1 %v6114_v11 }
 0xaa2   :  { %5535 = vmatpush3.bf16.msra.mxu1 %v6834_v29 }
 0xaa3   :  { %5548 = vmatprep.subr.bf16.mxu1 %v6114_v11 }
 0xb68   :  { %v2950_v52 = vpop.f32.mrb[88].mxu1 }
 0xb69   :  { %v2951_v53 = vadd.f32 %v7132_v62, %v2950_v52  ;;  %v5506_v56 = vpop.f32.mrb[89].mxu1 }
 0xb6a   :  { %v2953_v57 = vpop.f32.mrb[90].mxu1 }
 0xb6b   :  { %v2962_v31 = vmul.f32 %v2961_v26, %v2951_v53  ;;  %v5507_v58 = vpop.f32.mrb[91].mxu1 }
 0xb6d   :  { %v2963_v18 = vadd.f32 %v2962_v31, %v2960_v54 }
 0xb6f   :  { %4760 = vst.msk [vmem:[%s7486_s15 + $0x20] sm:$0xff] %vm75_vm1, %v2963_v18 }
 0xb70   :  { %v3045_v3 = vpop.f32.mrb[92].mxu1 }
 0xb71   :  { %v3046_v0 = vadd.f32 %v6852_v51, %v3045_v3  ;;  %v5522_v4 = vpop.f32.mrb[93].mxu1 }
 0xb72   :  { %v3048_v60 = vpop.f32.mrb[94].mxu1 }
 0xb73   :  { %v3102_v13 = vadd.f32 %v3101_v5, %v3046_v0  ;;  %v5523_v30 = vpop.f32.mrb[95].mxu1 }
 0xb75   :  { %v4765_v7 = vmul.f32 -1.442695, %v3102_v13  ;;  %v3570_v13 = vld [vmem:[#allocation2 + $0x30] sm:$0xff] }
 0xb77   :  { %5997 = vpow2.f32 %v4765_v7 }
 0xb81   :  { %v5998_v10 = vpop.eup %5997 }
 0xb82   :  { %v3106_v2 = vadd.f32 1.0, %v5998_v10 }
 0xb84   :  { %5999 = vrcp.f32 %v3106_v2 }
 0xb85   :  { %6001 = vtanh.f32 %v3112_v35 }
 0xb8e   :  { %v6000_v34 = vpop.eup %5999 }
 0xb8f   :  { %v3114_v37 = vsub.f32 1.0, %v6000_v34  ;;  %v6002_v39 = vpop.eup %6001  ;;  %v3116_v41 = vmul.f32 %v6000_v34, %v7065_v33  ;;  %v7156_v33 = vld [vmem:[#allocation6] sm:$0xff] }
 0xb90   :  { %v3244_v45 = vpack.c.bf16 %v7156_v33, %v7156_v33 }
 0xb91   :  { %v3115_v40 = vmul.f32 %v6002_v39, %v3114_v37 }
 0xb93   :  { %v3117_v42 = vadd.f32 %v3116_v41, %v3115_v40 }
 0xb95   :  { %3118 = vst.msk [vmem:[#allocation5] sm:$0xff] %vm157_vm2, %v3117_v42  ;;  %v3119_v1 = vpack.c.bf16 %v3117_v42, %v3117_v42 }
 0xb97   :  { %5537 = vmatmul.mubr.msk.bf16.vlgmr.msra.gmra.mrb[96].mxu1 %vm157_vm2, %v3119_v1  ;;  %5545 = vmatmul.mubr.msk.bf16.vlgmr.msra.gmra.mrb[100].mxu0 %vm157_vm2, %v3119_v1 }
 0xb98   :  { %5549 = vmatpush3.bf16.msra.mxu1 %v6977_v6  ;;  %5565 = vmatpush3.bf16.msra.mxu0 %v6983_v9 }
 0xb99   :  { %5550 = vmatprep.subr.bf16.mxu1 %v6114_v11  ;;  %5552 = vmatprep.mubr.msk.bf16.mxu1 %vm6115_vm3, %v6114_v11 }
 0xb9a   :  { %5566 = vmatprep.subr.bf16.mxu0 %v6114_v11  ;;  %5568 = vmatprep.mubr.msk.bf16.mxu0 %vm6115_vm3, %v6114_v11 }
 0xb9c   :  { %5551 = vmatpush3.bf16.msra.mxu1 %v6995_v21  ;;  %5567 = vmatpush3.bf16.msra.mxu0 %v7001_v22  ;;  %v7185_v48 = vld [vmem:[#allocation5] sm:$0xff] }
 0xb9d   :  { %5556 = vmatprep.subr.bf16.mxu1 %v6114_v11  ;;  %5572 = vmatprep.subr.bf16.mxu0 %v6114_v11  ;;  %v7191_v49 = vpack.c.bf16 %v7185_v48, %v7185_v48 }
 0xb9f   :  { %5553 = vmatmul.mubr.msk.bf16.vlgmr.msra.gmra.mrb[100].mxu1 %vm157_vm2, %v3119_v1 }
 0xba0   :  { %5557 = vmatpush3.bf16.msra.mxu1 %v7012_v20  ;;  %5560 = vmatprep.mubr.msk.bf16.mxu1 %vm6115_vm3, %v6114_v11 }
 0xba1   :  { %5558 = vmatprep.subr.bf16.mxu1 %v6114_v11 }
 0xba3   :  { %5569 = vmatmul.mubr.msk.bf16.vlgmr.msra.gmra.mrb[100].mxu0 %vm157_vm2, %v3244_v45 }
 0xba4   :  { %5559 = vmatpush3.bf16.msra.mxu1 %v7024_v8  ;;  %5573 = vmatpush3.bf16.msra.mxu0 %v7030_v16 }
 0xba5   :  { %5574 = vmatprep.subr.bf16.mxu0 %v6114_v11  ;;  %5576 = vmatprep.mubr.msk.bf16.mxu0 %vm6115_vm3, %v6114_v11 }
 0xba6   :  { %5580 = vmatprep.subr.bf16.mxu1 %v6114_v11 }
 0xba7   :  { %5561 = vmatmul.mubr.msk.bf16.vlgmr.msra.gmra.mrb[96].mxu1 %vm157_vm2, %v3244_v45 }
 0xba8   :  { %5575 = vmatpush3.bf16.msra.mxu0 %v7041_v19  ;;  %5581 = vmatpush3.bf16.msra.mxu1 %v7047_v32 }
 0xba9   :  { %5588 = vmatprep.subr.bf16.mxu0 %v6114_v11  ;;  %5582 = vmatprep.subr.bf16.mxu1 %v6114_v11 }
 0xbaa   :  { %5584 = vmatprep.mubr.msk.bf16.mxu1 %vm6115_vm3, %v6114_v11 }
 0xbab   :  { %5577 = vmatmul.mubr.msk.bf16.vlgmr.msra.gmra.mrb[104].mxu0 %vm157_vm2, %v3244_v45 }
 0xbac   :  { %5589 = vmatpush3.bf16.msra.mxu0 %v6738_v24  ;;  %5592 = vmatprep.mubr.msk.bf16.mxu0 %vm6115_vm3, %v6114_v11 }
 0xbad   :  { %5590 = vmatprep.subr.bf16.mxu0 %v6114_v11  ;;  %5583 = vmatpush3.bf16.msra.mxu1 %v7062_v38 }
 0xbae   :  { %5596 = vmatprep.subr.bf16.mxu1 %v6114_v11 }
 0xbb0   :  { %5591 = vmatpush3.bf16.msra.mxu0 %v6751_v61 }
 0xbb1   :  { %5604 = vmatprep.subr.bf16.mxu0 %v6114_v11 }
 0xbb3   :  { %5593 = vmatmul.mubr.msk.bf16.vlgmr.msra.gmra.mrb[108].mxu0 %vm157_vm2, %v7191_v49 }
 0xbb4   :  { %5605 = vmatpush3.bf16.msra.mxu0 %v6764_v14  ;;  %5608 = vmatprep.mubr.msk.bf16.mxu0 %vm6115_vm3, %v6114_v11 }
 0xbb5   :  { %5606 = vmatprep.subr.bf16.mxu0 %v6114_v11 }
 0xbb8   :  { %5607 = vmatpush3.bf16.msra.mxu0 %v6773_v23 }
 0xbb9   :  { %5620 = vmatprep.subr.bf16.mxu0 %v6114_v11 }
 0xbbb   :  { %5609 = vmatmul.mubr.msk.bf16.vlgmr.msra.gmra.mrb[112].mxu0 %vm157_vm2, %v7191_v49 }
 0xbbc   :  { %5621 = vmatpush3.bf16.msra.mxu0 %v6782_v63  ;;  %5624 = vmatprep.mubr.msk.bf16.mxu0 %vm6115_vm3, %v6114_v11 }
 0xbbd   :  { %5622 = vmatprep.subr.bf16.mxu0 %v6114_v11 }
 0xbc0   :  { %5623 = vmatpush3.bf16.msra.mxu0 %v6791_v28 }
 0xbc1   :  { %5644 = vmatprep.subr.bf16.mxu0 %v6114_v11 }
 0xc72   :  { %v3237_v24 = vpop.f32.mrb[100].mxu1 }
 0xc73   :  { %v5554_v61 = vpop.f32.mrb[101].mxu1 }
 0xc74   :  { %v3240_v14 = vpop.f32.mrb[102].mxu1 }
 0xc75   :  { %v5555_v23 = vpop.f32.mrb[103].mxu1  ;;  %v3238_v14 = vadd.f32 %v7102_v12, %v3237_v24 }
 0xc76   :  { %v3322_v43 = vpop.f32.mrb[100].mxu0 }
 0xc77   :  { %v5570_v25 = vpop.f32.mrb[101].mxu0  ;;  %v5789_v31 = vadd.f32 %v6540_v47, %v3322_v43 }
 0xc78   :  { %v3325_v50 = vpop.f32.mrb[102].mxu0 }
 0xc79   :  { %v5571_v26 = vpop.f32.mrb[103].mxu0  ;;  %v4773_v0 = vmul.f32 -1.442695, %v5789_v31 }
 0xc7a   :  { %v3282_v52 = vpop.f32.mrb[96].mxu1 }
 0xc7b   :  { %v5787_v63 = vadd.f32 %v6538_v44, %v3282_v52  ;;  %v5562_v53 = vpop.f32.mrb[97].mxu1 }
 0xc7c   :  { %v3285_v54 = vpop.f32.mrb[98].mxu1 }
 0xc7d   :  { %v4772_v56 = vmul.f32 -1.442695, %v5787_v63  ;;  %v5563_v57 = vpop.f32.mrb[99].mxu1 }
 0xc7e   :  { %v3362_v28 = vpop.f32.mrb[104].mxu0 }
 0xc7f   :  { %6003 = vpow2.f32 %v4772_v56  ;;  %v5578_v58 = vpop.f32.mrb[105].mxu0  ;;  %v3363_v1 = vadd.f32 %v7096_v27, %v3362_v28 }
 0xc80   :  { %v3365_v18 = vpop.f32.mrb[106].mxu0  ;;  %6005 = vpow2.f32 %v4773_v0 }
 0xc81   :  { %v5579_v3 = vpop.f32.mrb[107].mxu0 }
 0xc86   :  { %v3483_v4 = vpop.f32.mrb[108].mxu0 }
 0xc87   :  { %v3484_v5 = vadd.f32 %v6930_v46, %v3483_v4  ;;  %v5594_v60 = vpop.f32.mrb[109].mxu0 }
 0xc88   :  { %v3486_v30 = vpop.f32.mrb[110].mxu0 }
 0xc89   :  { %v6004_v7 = vpop.eup %6003  ;;  %v3571_v10 = vadd.f32 %v3570_v13, %v3484_v5  ;;  %v5595_v15 = vpop.f32.mrb[111].mxu0  ;;  %v3579_v13 = vld [vmem:[#allocation3 + $0x30] sm:$0xff] }
 0xc8a   :  { %v3372_v35 = vadd.f32 1.0, %v6004_v7  ;;  %v6006_v39 = vpop.eup %6005 }
 0xc8b   :  { %v4781_v2 = vmul.f32 -1.442695, %v3571_v10  ;;  %v3379_v42 = vadd.f32 1.0, %v6006_v39 }
 0xc8c   :  { %6007 = vrcp.f32 %v3372_v35 }
 0xc8d   :  { %6009 = vpow2.f32 %v4781_v2  ;;  %v3588_v2 = vld [vmem:[#allocation4 + $0x30] sm:$0xff] }
 0xc8e   :  { %v3563_v34 = vpop.f32.mrb[112].mxu0  ;;  %6011 = vrcp.f32 %v3379_v42 }
 0xc8f   :  { %v5610_v37 = vpop.f32.mrb[113].mxu0  ;;  %v3564_v26 = vadd.f32 %v6938_v17, %v3563_v34 }
 0xc90   :  { %v3566_v40 = vpop.f32.mrb[114].mxu0 }
 0xc91   :  { %v5611_v41 = vpop.f32.mrb[115].mxu0 }
 0xc96   :  { %v6008_v45 = vpop.eup %6007 }
 0xc97   :  { %v6010_v61 = vpop.eup %6009  ;;  %v3382_v23 = vmul.f32 %v6008_v45, %v3363_v1 }
 0xc98   :  { %v3575_v43 = vadd.f32 1.0, %v6010_v61  ;;  %v6012_v50 = vpop.eup %6011 }
 0xc99   :  { %v3383_v25 = vadd.f32 %v3382_v23, %v3238_v14  ;;  %v3385_v63 = vsub.f32 1.0, %v6012_v50  ;;  %v3387_v56 = vmul.f32 %v6012_v50, %v7156_v33  ;;  %v6079_v14 = vld [vmem:[%s7474_s3] sm:$0xff]  }
 0xc9a   :  { %6013 = vrcp.f32 %v3575_v43  ;;  %v6080_v43 = vld [vmem:[%s7474_s3 + $0x8] sm:$0xff]   ;;  %v6081_v50 = vld [vmem:[%s7474_s3 + $0x20] sm:$0xff]  }
 0xc9b   :  { %6015 = vtanh.f32 %v3383_v25 }
 0xca4   :  { %v6014_v52 = vpop.eup %6013 }
 0xca5   :  { %v6016_v53 = vpop.eup %6015  ;;  %v3589_v54 = vmul.f32 %v6014_v52, %v3564_v26  ;;  %v6082_v26 = vld [vmem:[%s7474_s3 + $0x28] sm:$0xff]   ;;  %v6083_v52 = vld [vmem:[%s7477_s6 + $0x10] sm:$0xff]  }
 0xca6   :  { %v3386_v57 = vmul.f32 %v6016_v53, %v3385_v63  ;;  %v6084_v63 = vld [vmem:[%s7477_s6 + $0x18] sm:$0xff]  }
 0xca7   :  { %v3590_v34 = vadd.f32 %v3589_v54, %v3588_v2 }
 0xca8   :  { %v3388_v31 = vadd.f32 %v3387_v56, %v3386_v57 }
 0xcaa   :  { %3389 = vst.msk [vmem:[#allocation6] sm:$0xff] %vm157_vm2, %v3388_v31  ;;  %v3390_v24 = vpack.c.bf16 %v3388_v31, %v3388_v31 }
 0xcac   :  { %5585 = vmatmul.mubr.msk.bf16.vlgmr.msra.gmra.mrb[104].mxu1 %vm157_vm2, %v3390_v24 }
 0xcad   :  { %5597 = vmatpush3.bf16.msra.mxu1 %v6807_v36  ;;  %5600 = vmatprep.mubr.msk.bf16.mxu1 %vm6115_vm3, %v6114_v11  ;;  %v4775_v36 = vld [vmem:[%s7494_s21 + $0x28] sm:$0xff] }
 0xcae   :  { %5598 = vmatprep.subr.bf16.mxu1 %v6114_v11  ;;  %v3439_v33 = vsub.f32 1.0, %v4775_v36 }
 0xcb1   :  { %5599 = vmatpush3.bf16.msra.mxu1 %v6816_v55  ;;  %v4776_v55 = vld [vmem:[%s7493_s28 + $0x28] sm:$0xff] }
 0xcb2   :  { %5612 = vmatprep.subr.bf16.mxu1 %v6114_v11  ;;  %v3438_v28 = vmul.f32 %v4776_v55, %v4775_v36 }
 0xcb4   :  { %5601 = vmatmul.mubr.msk.bf16.vlgmr.msra.gmra.mrb[108].mxu1 %vm157_vm2, %v7191_v49 }
 0xcb5   :  { %5613 = vmatpush3.bf16.msra.mxu1 %v6825_v59  ;;  %5616 = vmatprep.mubr.msk.bf16.mxu1 %vm6115_vm3, %v6114_v11 }
 0xcb6   :  { %5614 = vmatprep.subr.bf16.mxu1 %v6114_v11 }
 0xcb9   :  { %5615 = vmatpush3.bf16.msra.mxu1 %v6834_v29 }
 0xcba   :  { %5628 = vmatprep.subr.bf16.mxu1 %v6114_v11 }
 0xd7f   :  { %v3428_v49 = vpop.f32.mrb[104].mxu1 }
 0xd80   :  { %v3429_v59 = vadd.f32 %v7132_v62, %v3428_v49  ;;  %v5586_v58 = vpop.f32.mrb[105].mxu1 }
 0xd81   :  { %v3431_v18 = vpop.f32.mrb[106].mxu1 }
 0xd82   :  { %v3440_v3 = vmul.f32 %v3439_v33, %v3429_v59  ;;  %v5587_v0 = vpop.f32.mrb[107].mxu1 }
 0xd84   :  { %v3441_v29 = vadd.f32 %v3440_v3, %v3438_v28 }
 0xd86   :  { %4777 = vst.msk [vmem:[%s7486_s15 + $0x28] sm:$0xff] %vm75_vm1, %v3441_v29 }
 0xd87   :  { %v3523_v4 = vpop.f32.mrb[108].mxu1 }
 0xd88   :  { %v3524_v5 = vadd.f32 %v6852_v51, %v3523_v4  ;;  %v5602_v60 = vpop.f32.mrb[109].mxu1 }
 0xd89   :  { %v3526_v30 = vpop.f32.mrb[110].mxu1 }
 0xd8a   :  { %v3580_v7 = vadd.f32 %v3579_v13, %v3524_v5  ;;  %v5603_v10 = vpop.f32.mrb[111].mxu1 }
 0xd8b   :  { %v4048_v10 = vld [vmem:[#allocation2 + $0x38] sm:$0xff] }
 0xd8c   :  { %v4782_v15 = vmul.f32 -1.442695, %v3580_v7 }
 0xd8e   :  { %6017 = vpow2.f32 %v4782_v15 }
 0xd98   :  { %v6018_v35 = vpop.eup %6017 }
 0xd99   :  { %v3584_v37 = vadd.f32 1.0, %v6018_v35 }
 0xd9b   :  { %6019 = vrcp.f32 %v3584_v37 }
 0xd9c   :  { %6021 = vtanh.f32 %v3590_v34 }
 0xda5   :  { %v6020_v39 = vpop.eup %6019 }
 0xda6   :  { %v3592_v40 = vsub.f32 1.0, %v6020_v39  ;;  %v6022_v41 = vpop.eup %6021  ;;  %v3594_v1 = vmul.f32 %v6020_v39, %v7185_v48  ;;  %v7261_v48 = vld [vmem:[#allocation6] sm:$0xff] }
 0xda7   :  { %v3722_v61 = vpack.c.bf16 %v7261_v48, %v7261_v48 }
 0xda8   :  { %v3593_v42 = vmul.f32 %v6022_v41, %v3592_v40 }
 0xdaa   :  { %v3595_v51 = vadd.f32 %v3594_v1, %v3593_v42 }
 0xdac   :  { %3596 = vst.msk [vmem:[#allocation5] sm:$0xff] %vm157_vm2, %v3595_v51  ;;  %v3597_v45 = vpack.c.bf16 %v3595_v51, %v3595_v51 }
 0xdae   :  { %5617 = vmatmul.mubr.msk.bf16.vlgmr.msra.gmra.mrb[112].mxu1 %vm157_vm2, %v3597_v45  ;;  %5625 = vmatmul.mubr.msk.bf16.vlgmr.msra.gmra.mrb[116].mxu0 %vm157_vm2, %v3597_v45 }
 0xdaf   :  { %5629 = vmatpush3.bf16.msra.mxu1 %v6977_v6  ;;  %5645 = vmatpush3.bf16.msra.mxu0 %v6983_v9 }
 0xdb0   :  { %5630 = vmatprep.subr.bf16.mxu1 %v6114_v11  ;;  %5632 = vmatprep.mubr.msk.bf16.mxu1 %vm6115_vm3, %v6114_v11 }
 0xdb1   :  { %5646 = vmatprep.subr.bf16.mxu0 %v6114_v11  ;;  %5648 = vmatprep.mubr.msk.bf16.mxu0 %vm6115_vm3, %v6114_v11 }
 0xdb3   :  { %5631 = vmatpush3.bf16.msra.mxu1 %v6995_v21  ;;  %5647 = vmatpush3.bf16.msra.mxu0 %v7001_v22  ;;  %v7292_v23 = vld [vmem:[#allocation5] sm:$0xff] }
 0xdb4   :  { %5636 = vmatprep.subr.bf16.mxu1 %v6114_v11  ;;  %5652 = vmatprep.subr.bf16.mxu0 %v6114_v11  ;;  %v7300_v25 = vpack.c.bf16 %v7292_v23, %v7292_v23 }
 0xdb6   :  { %5633 = vmatmul.mubr.msk.bf16.vlgmr.msra.gmra.mrb[116].mxu1 %vm157_vm2, %v3597_v45 }
 0xdb7   :  { %5637 = vmatpush3.bf16.msra.mxu1 %v7012_v20  ;;  %5640 = vmatprep.mubr.msk.bf16.mxu1 %vm6115_vm3, %v6114_v11 }
 0xdb8   :  { %5638 = vmatprep.subr.bf16.mxu1 %v6114_v11 }
 0xdba   :  { %5649 = vmatmul.mubr.msk.bf16.vlgmr.msra.gmra.mrb[116].mxu0 %vm157_vm2, %v3722_v61 }
 0xdbb   :  { %5639 = vmatpush3.bf16.msra.mxu1 %v7024_v8  ;;  %5653 = vmatpush3.bf16.msra.mxu0 %v7030_v16 }
 0xdbc   :  { %5654 = vmatprep.subr.bf16.mxu0 %v6114_v11  ;;  %5656 = vmatprep.mubr.msk.bf16.mxu0 %vm6115_vm3, %v6114_v11 }
 0xdbd   :  { %5660 = vmatprep.subr.bf16.mxu1 %v6114_v11 }
 0xdbe   :  { %5641 = vmatmul.mubr.msk.bf16.vlgmr.msra.gmra.mrb[112].mxu1 %vm157_vm2, %v3722_v61 }
 0xdbf   :  { %5655 = vmatpush3.bf16.msra.mxu0 %v7041_v19  ;;  %5661 = vmatpush3.bf16.msra.mxu1 %v7047_v32 }
 0xdc0   :  { %5668 = vmatprep.subr.bf16.mxu0 %v6114_v11  ;;  %5662 = vmatprep.subr.bf16.mxu1 %v6114_v11 }
 0xdc1   :  { %5664 = vmatprep.mubr.msk.bf16.mxu1 %vm6115_vm3, %v6114_v11 }
 0xdc2   :  { %5657 = vmatmul.mubr.msk.bf16.vlgmr.msra.gmra.mrb[120].mxu0 %vm157_vm2, %v3722_v61 }
 0xdc3   :  { %5669 = vmatpush3.bf16.msra.mxu0 %v6079_v14  ;;  %5672 = vmatprep.mubr.msk.bf16.mxu0 %vm6115_vm3, %v6114_v11 }
 0xdc4   :  { %5670 = vmatprep.subr.bf16.mxu0 %v6114_v11  ;;  %5663 = vmatpush3.bf16.msra.mxu1 %v7062_v38 }
 0xdc5   :  { %5676 = vmatprep.subr.bf16.mxu1 %v6114_v11 }
 0xdc7   :  { %5671 = vmatpush3.bf16.msra.mxu0 %v6080_v43 }
 0xdc8   :  { %5684 = vmatprep.subr.bf16.mxu0 %v6114_v11 }
 0xdca   :  { %5673 = vmatmul.mubr.msk.bf16.vlgmr.msra.gmra.mrb[124].mxu0 %vm157_vm2, %v7300_v25 }
 0xdcb   :  { %5685 = vmatpush3.bf16.msra.mxu0 %v6081_v50  ;;  %5688 = vmatprep.mubr.msk.bf16.mxu0 %vm6115_vm3, %v6114_v11 }
 0xdcc   :  { %5686 = vmatprep.subr.bf16.mxu0 %v6114_v11 }
 0xdcf   :  { %5687 = vmatpush3.bf16.msra.mxu0 %v6082_v26 }
 0xdd0   :  { %5700 = vmatprep.subr.bf16.mxu0 %v6114_v11 }
 0xdd2   :  { %5689 = vmatmul.mubr.msk.bf16.vlgmr.msra.gmra.mrb[128].mxu0 %vm157_vm2, %v7300_v25 }
 0xdd3   :  { %5701 = vmatpush3.bf16.msra.mxu0 %v6083_v52  ;;  %5704 = vmatprep.mubr.msk.bf16.mxu0 %vm6115_vm3, %v6114_v11 }
 0xdd4   :  { %5702 = vmatprep.subr.bf16.mxu0 %v6114_v11 }
 0xdd7   :  { %5703 = vmatpush3.bf16.msra.mxu0 %v6084_v63 }
 0xdd8   :  { %5724 = vmatprep.subr.bf16.mxu0 %v6114_v11 }
 0xe89   :  { %v3715_v53 = vpop.f32.mrb[116].mxu1 }
 0xe8a   :  { %v5634_v54 = vpop.f32.mrb[117].mxu1  ;;  %v3716_v43 = vadd.f32 %v7102_v12, %v3715_v53 }
 0xe8b   :  { %v3718_v56 = vpop.f32.mrb[118].mxu1 }
 0xe8c   :  { %v5635_v57 = vpop.f32.mrb[119].mxu1 }
 0xe8d   :  { %v3800_v31 = vpop.f32.mrb[116].mxu0 }
 0xe8e   :  { %v5650_v24 = vpop.f32.mrb[117].mxu0  ;;  %v5793_v3 = vadd.f32 %v6540_v47, %v3800_v31 }
 0xe8f   :  { %v3803_v36 = vpop.f32.mrb[118].mxu0 }
 0xe90   :  { %v5651_v55 = vpop.f32.mrb[119].mxu0  ;;  %v4790_v60 = vmul.f32 -1.442695, %v5793_v3 }
 0xe91   :  { %v3760_v33 = vpop.f32.mrb[112].mxu1 }
 0xe92   :  { %v5791_v49 = vadd.f32 %v6538_v44, %v3760_v33  ;;  %v5642_v59 = vpop.f32.mrb[113].mxu1 }
 0xe93   :  { %v3763_v28 = vpop.f32.mrb[114].mxu1  ;;  %v6088_v59 = vld [vmem:[%s7477_s6 + $0x8] sm:$0xff]  }
 0xe94   :  { %v4789_v58 = vmul.f32 -1.442695, %v5791_v49  ;;  %v5643_v18 = vpop.f32.mrb[115].mxu1  ;;  %v6085_v49 = vld [vmem:[%s7474_s3 + $0x10] sm:$0xff]  }
 0xe95   :  { %v3840_v0 = vpop.f32.mrb[120].mxu0  ;;  %v4793_v28 = vld [vmem:[%s7493_s28 + $0x30] sm:$0xff] }
 0xe96   :  { %6023 = vpow2.f32 %v4789_v58  ;;  %v5658_v29 = vpop.f32.mrb[121].mxu0  ;;  %v3841_v61 = vadd.f32 %v7096_v27, %v3840_v0 }
 0xe97   :  { %v3843_v4 = vpop.f32.mrb[122].mxu0  ;;  %6025 = vpow2.f32 %v4790_v60 }
 0xe98   :  { %v5659_v5 = vpop.f32.mrb[123].mxu0 }
 0xe9d   :  { %v3961_v13 = vpop.f32.mrb[124].mxu0 }
 0xe9e   :  { %v3962_v30 = vadd.f32 %v6930_v46, %v3961_v13  ;;  %v5674_v7 = vpop.f32.mrb[125].mxu0 }
 0xe9f   :  { %v3964_v15 = vpop.f32.mrb[126].mxu0  ;;  %v6089_v7 = vld [vmem:[%s7476_s5 + $0x1] ss:$0 sm:$0xff] }
 0xea0   :  { %v6024_v35 = vpop.eup %6023  ;;  %v4049_v2 = vadd.f32 %v4048_v10, %v3962_v30  ;;  %v5675_v34 = vpop.f32.mrb[127].mxu0 }
 0xea1   :  { %v3850_v37 = vadd.f32 1.0, %v6024_v35  ;;  %v6026_v42 = vpop.eup %6025  ;;  %v4057_v35 = vld [vmem:[#allocation3 + $0x38] sm:$0xff] }
 0xea2   :  { %v4798_v39 = vmul.f32 -1.442695, %v4049_v2  ;;  %v3857_v45 = vadd.f32 1.0, %v6026_v42 }
 0xea3   :  { %6027 = vrcp.f32 %v3850_v37 }
 0xea4   :  { %6029 = vpow2.f32 %v4798_v39 }
 0xea5   :  { %v4041_v40 = vpop.f32.mrb[128].mxu0  ;;  %6031 = vrcp.f32 %v3857_v45 }
 0xea6   :  { %v5690_v41 = vpop.f32.mrb[129].mxu0  ;;  %v4042_v54 = vadd.f32 %v6938_v17, %v4041_v40  ;;  %v6086_v17 = vld [vmem:[%s7474_s3 + $0x18] sm:$0xff]  }
 0xea7   :  { %v4044_v1 = vpop.f32.mrb[130].mxu0  ;;  %v4066_v41 = vld [vmem:[#allocation4 + $0x38] sm:$0xff] }
 0xea8   :  { %v5691_v51 = vpop.f32.mrb[131].mxu0 }
 0xead   :  { %v6028_v14 = vpop.eup %6027 }
 0xeae   :  { %v6030_v46 = vpop.eup %6029  ;;  %v3860_v50 = vmul.f32 %v6028_v14, %v3841_v61 }
 0xeaf   :  { %v4053_v26 = vadd.f32 1.0, %v6030_v46  ;;  %v6032_v63 = vpop.eup %6031 }
 0xeb0   :  { %v3861_v52 = vadd.f32 %v3860_v50, %v3716_v43  ;;  %v3863_v57 = vsub.f32 1.0, %v6032_v63  ;;  %v3865_v36 = vmul.f32 %v6032_v63, %v7261_v48  ;;  %v6087_v48 = vld [vmem:[%s7477_s6] sm:$0xff]  }
 0xeb1   :  { %6033 = vrcp.f32 %v4053_v26 }
 0xeb2   :  { %6035 = vtanh.f32 %v3861_v52 }
 0xebb   :  { %v6034_v56 = vpop.eup %6033 }
 0xebc   :  { %v6036_v31 = vpop.eup %6035  ;;  %v4067_v24 = vmul.f32 %v6034_v56, %v4042_v54 }
 0xebd   :  { %v3864_v55 = vmul.f32 %v6036_v31, %v3863_v57 }
 0xebe   :  { %v4068_v42 = vadd.f32 %v4067_v24, %v4066_v41 }
 0xebf   :  { %v3866_v33 = vadd.f32 %v3865_v36, %v3864_v55 }
 0xec1   :  { %3867 = vst.msk [vmem:[#allocation6] sm:$0xff] %vm157_vm2, %v3866_v33  ;;  %v3868_v53 = vpack.c.bf16 %v3866_v33, %v3866_v33 }
 0xec3   :  { %5665 = vmatmul.mubr.msk.bf16.vlgmr.msra.gmra.mrb[120].mxu1 %vm157_vm2, %v3868_v53 }
 0xec4   :  { %5677 = vmatpush3.bf16.msra.mxu1 %v6085_v49  ;;  %5680 = vmatprep.mubr.msk.bf16.mxu1 %vm6115_vm3, %v6114_v11 }
 0xec5   :  { %5678 = vmatprep.subr.bf16.mxu1 %v6114_v11 }
 0xec8   :  { %5679 = vmatpush3.bf16.msra.mxu1 %v6086_v17 }
 0xec9   :  { %5692 = vmatprep.subr.bf16.mxu1 %v6114_v11 }
 0xecb   :  { %5681 = vmatmul.mubr.msk.bf16.vlgmr.msra.gmra.mrb[124].mxu1 %vm157_vm2, %v7300_v25  ;;  %v4792_v25 = vld [vmem:[%s7494_s21 + $0x30] sm:$0xff] }
 0xecc   :  { %5693 = vmatpush3.bf16.msra.mxu1 %v6087_v48  ;;  %5696 = vmatprep.mubr.msk.bf16.mxu1 %vm6115_vm3, %v6114_v11  ;;  %v3917_v58 = vsub.f32 1.0, %v4792_v25  ;;  %v3916_v0 = vmul.f32 %v4793_v28, %v4792_v25 }
 0xecd   :  { %5694 = vmatprep.subr.bf16.mxu1 %v6114_v11 }
 0xed0   :  { %5695 = vmatpush3.bf16.msra.mxu1 %v6088_v59 }
 0xed1   :  { %5708 = vmatprep.subr.bf16.mxu1 %v6114_v11 }
 0xf96   :  { %v3906_v18 = vpop.f32.mrb[120].mxu1 }
 0xf97   :  { %v3907_v3 = vadd.f32 %v7132_v62, %v3906_v18  ;;  %v5666_v29 = vpop.f32.mrb[121].mxu1 }
 0xf98   :  { %v3909_v4 = vpop.f32.mrb[122].mxu1 }
 0xf99   :  { %v3918_v5 = vmul.f32 %v3917_v58, %v3907_v3  ;;  %v5667_v60 = vpop.f32.mrb[123].mxu1 }
 0xf9b   :  { %v3919_v13 = vadd.f32 %v3918_v5, %v3916_v0 }
 0xf9d   :  { %4794 = vst.msk [vmem:[%s7486_s15 + $0x30] sm:$0xff] %vm75_vm1, %v3919_v13 }
 0xf9e   :  { %v4001_v30 = vpop.f32.mrb[124].mxu1 }
 0xf9f   :  { %v4002_v10 = vadd.f32 %v6089_v7, %v4001_v30  ;;  %v5682_v15 = vpop.f32.mrb[125].mxu1  ;;  %v4470_v30 = vld [vmem:[%s7485_s14] sm:$0xff]  ;;  %v4471_v7 = vld [vmem:[%s7485_s14 + $0x8] sm:$0xff] }
 0xfa0   :  { %v4004_v2 = vpop.f32.mrb[126].mxu1  ;;  %v6116_v15 = vmov 0.0|0.0  }
 0xfa1   :  { %v4058_v34 = vadd.f32 %v4057_v35, %v4002_v10  ;;  %v5683_v37 = vpop.f32.mrb[127].mxu1  ;;  %v5764_v10 = vpack.c.bf16 %v4471_v7, %v4470_v30  ;;  %v4810_v35 = vld [vmem:[%s7493_s28 + $0x38] sm:$0xff] }
 0xfa3   :  { %v4799_v39 = vmul.f32 -1.442695, %v4058_v34 }
 0xfa5   :  { %6037 = vpow2.f32 %v4799_v39 }
 0xfaf   :  { %v6038_v40 = vpop.eup %6037 }
 0xfb0   :  { %v4062_v1 = vadd.f32 1.0, %v6038_v40 }
 0xfb2   :  { %6039 = vrcp.f32 %v4062_v1 }
 0xfb3   :  { %6041 = vtanh.f32 %v4068_v42 }
 0xfbc   :  { %v6040_v51 = vpop.eup %6039 }
 0xfbd   :  { %v4070_v45 = vsub.f32 1.0, %v6040_v51  ;;  %v6042_v61 = vpop.eup %6041  ;;  %v4072_v46 = vmul.f32 %v6040_v51, %v7292_v23 }
 0xfbf   :  { %v4071_v14 = vmul.f32 %v6042_v61, %v4070_v45  ;;  %v4812_v45 = vld [vmem:[%s7484_s13] ss:$0 sm:$0xff]  ;;  %s6117_s13 = smov [#allocation7]  }
 0xfc1   :  { %v4073_v43 = vadd.f32 %v4072_v46, %v4071_v14 }
 0xfc3   :  { %4074 = vst.msk [vmem:[#allocation5] sm:$0xff] %vm157_vm2, %v4073_v43  ;;  %v4075_v50 = vpack.c.bf16 %v4073_v43, %v4073_v43 }
 0xfc5   :  { %5697 = vmatmul.mubr.msk.bf16.vlgmr.msra.gmra.mrb[128].mxu1 %vm157_vm2, %v4075_v50  ;;  %5705 = vmatmul.mubr.msk.bf16.vlgmr.msra.gmra.mrb[132].mxu0 %vm157_vm2, %v4075_v50 }
 0xfc6   :  { %5709 = vmatpush3.bf16.msra.mxu1 %v6977_v6  ;;  %5725 = vmatpush3.bf16.msra.mxu0 %v6983_v9  ;;  %v7388_v6 = vld [vmem:[#allocation6] sm:$0xff] }
 0xfc7   :  { %5710 = vmatprep.subr.bf16.mxu1 %v6114_v11  ;;  %5712 = vmatprep.mubr.msk.bf16.mxu1 %vm6115_vm3, %v6114_v11  ;;  %v4200_v9 = vpack.c.bf16 %v7388_v6, %v7388_v6 }
 0xfc8   :  { %5726 = vmatprep.subr.bf16.mxu0 %v6114_v11  ;;  %5728 = vmatprep.mubr.msk.bf16.mxu0 %vm6115_vm3, %v6114_v11 }
 0xfca   :  { %5711 = vmatpush3.bf16.msra.mxu1 %v6995_v21  ;;  %5727 = vmatpush3.bf16.msra.mxu0 %v7001_v22  ;;  %v5891_v21 = vld [vmem:[%s7483_s12] sm:$0xff]   ;;  %v5892_v22 = vld [vmem:[%s7483_s12 + $0x8] sm:$0xff]  }
 0xfcb   :  { %5716 = vmatprep.subr.bf16.mxu1 %v6114_v11  ;;  %5732 = vmatprep.subr.bf16.mxu0 %v6114_v11 }
 0xfcd   :  { %5713 = vmatmul.mubr.msk.bf16.vlgmr.msra.gmra.mrb[132].mxu1 %vm157_vm2, %v4075_v50 }
 0xfce   :  { %5717 = vmatpush3.bf16.msra.mxu1 %v7012_v20  ;;  %5720 = vmatprep.mubr.msk.bf16.mxu1 %vm6115_vm3, %v6114_v11 }
 0xfcf   :  { %5718 = vmatprep.subr.bf16.mxu1 %v6114_v11 }
 0xfd1   :  { %5729 = vmatmul.mubr.msk.bf16.vlgmr.msra.gmra.mrb[132].mxu0 %vm157_vm2, %v4200_v9 }
 0xfd2   :  { %5719 = vmatpush3.bf16.msra.mxu1 %v7024_v8  ;;  %5733 = vmatpush3.bf16.msra.mxu0 %v7030_v16 }
 0xfd3   :  { %5734 = vmatprep.subr.bf16.mxu0 %v6114_v11  ;;  %5736 = vmatprep.mubr.msk.bf16.mxu0 %vm6115_vm3, %v6114_v11 }
 0xfd4   :  { %5740 = vmatprep.subr.bf16.mxu1 %v6114_v11 }
 0xfd5   :  { %5721 = vmatmul.mubr.msk.bf16.vlgmr.msra.gmra.mrb[128].mxu1 %vm157_vm2, %v4200_v9 }
 0xfd6   :  { %5735 = vmatpush3.bf16.msra.mxu0 %v7041_v19  ;;  %5741 = vmatpush3.bf16.msra.mxu1 %v7047_v32 }
 0xfd7   :  { %5742 = vmatprep.subr.bf16.mxu1 %v6114_v11  ;;  %5744 = vmatprep.mubr.msk.bf16.mxu1 %vm6115_vm3, %v6114_v11 }
 0xfd8   :  { %5748 = vmatprep.subr.bf16.mxu0 %v6114_v11 }
 0xfd9   :  { %5737 = vmatmul.mubr.msk.bf16.vlgmr.msra.gmra.mrb[136].mxu0 %vm157_vm2, %v4200_v9  ;;  %v4476_v9 = vmul.f32 %v4470_v30, %v4470_v30 }
 0xfda   :  { %5743 = vmatpush3.bf16.msra.mxu1 %v7062_v38  ;;  %5752 = vmatprep.mubr.msk.bf16.mxu0 %vm6115_vm3, %v6114_v11 }
 0xfdb   :  { %5749 = vmatpush3.bf16.msra.mxu0 %v5891_v21  ;;  %5763 = vmatprep.subr.bf16.mxu1 %v6116_v15  ;;  %v4477_v21 = vmul.f32 %v4471_v7, %v4471_v7 }
 0xfdc   :  { %5750 = vmatprep.subr.bf16.mxu0 %v6114_v11 }
 0xfdf   :  { %5751 = vmatpush3.bf16.msra.mxu0 %v5892_v22  ;;  %v4479_v22 = vsel %vm4478_vm5, %v4476_v9, 0.0 }
0x10a0   :  { %v4193_v20 = vpop.f32.mrb[132].mxu1 }
0x10a1   :  { %v5714_v8 = vpop.f32.mrb[133].mxu1  ;;  %v4194_v58 = vadd.f32 %v7102_v12, %v4193_v20  ;;  %v4480_v20 = vsel %vm4478_vm5, %v4477_v21, 0.0 }
0x10a2   :  { %v4196_v16 = vpop.f32.mrb[134].mxu1  ;;  %v4481_v8 = vadd.f32 %v4480_v20, %v4479_v22 }
0x10a3   :  { %v5715_v19 = vpop.f32.mrb[135].mxu1 }
0x10a4   :  { %v4278_v32 = vpop.f32.mrb[132].mxu0  ;;  %v4482_v16 = vrot.slane %v4481_v8, 4 }
0x10a5   :  { %v5730_v38 = vpop.f32.mrb[133].mxu0  ;;  %v5797_v24 = vadd.f32 %v6540_v47, %v4278_v32 }
0x10a6   :  { %v4281_v23 = vpop.f32.mrb[134].mxu0  ;;  %v4483_v19 = vadd.f32 %v4482_v16, %v4481_v8 }
0x10a7   :  { %v5731_v26 = vpop.f32.mrb[135].mxu0  ;;  %v4807_v49 = vmul.f32 -1.442695, %v5797_v24 }
0x10a8   :  { %v4238_v52 = vpop.f32.mrb[128].mxu1  ;;  %v4484_v32 = vrot.slane %v4483_v19, 2 }
0x10a9   :  { %v5795_v63 = vadd.f32 %v6538_v44, %v4238_v52  ;;  %v5722_v54 = vpop.f32.mrb[129].mxu1 }
0x10aa   :  { %v4241_v56 = vpop.f32.mrb[130].mxu1  ;;  %v4485_v38 = vadd.f32 %v4484_v32, %v4483_v19 }
0x10ab   :  { %v4806_v57 = vmul.f32 -1.442695, %v5795_v63  ;;  %v5723_v31 = vpop.f32.mrb[131].mxu1 }
0x10ac   :  { %v4318_v36 = vpop.f32.mrb[136].mxu0  ;;  %v4486_v23 = vrot.slane %v4485_v38, 1 }
0x10ad   :  { %6043 = vpow2.f32 %v4806_v57  ;;  %v5738_v55 = vpop.f32.mrb[137].mxu0  ;;  %v4319_v44 = vadd.f32 %v7096_v27, %v4318_v36  ;;  %v4567_v36 = vlaneseq }
0x10ae   :  { %v4321_v33 = vpop.f32.mrb[138].mxu0  ;;  %6045 = vpow2.f32 %v4807_v49  ;;  %v4487_v54 = vadd.f32 %v4486_v23, %v4485_v38 }
0x10af   :  { %v5739_v53 = vpop.f32.mrb[139].mxu0  ;;  %v4568_v55 = vand.u32 127, %v4567_v36 }
0x10b1   :  { %v4569_v33 = vcvt.s32.f32 %v4568_v55 }
0x10b7   :  { %v6044_v17 = vpop.eup %6043 }
0x10b8   :  { %v4328_v48 = vadd.f32 1.0, %v6044_v17  ;;  %v6046_v59 = vpop.eup %6045 }
0x10b9   :  { %v4335_v25 = vadd.f32 1.0, %v6046_v59 }
0x10ba   :  { %6047 = vrcp.f32 %v4328_v48 }
0x10bb   :  { %6049 = vrcp.f32 %v4335_v25 }
0x10c4   :  { %v6048_v28 = vpop.eup %6047 }
0x10c5   :  { %v4338_v18 = vmul.f32 %v6048_v28, %v4319_v44  ;;  %v6050_v3 = vpop.eup %6049 }
0x10c6   :  { %v4341_v0 = vsub.f32 1.0, %v6050_v3  ;;  %v4343_v4 = vmul.f32 %v6050_v3, %v7388_v6 }
0x10c7   :  { %v4339_v47 = vadd.f32 %v4338_v18, %v4194_v58 }
0x10c9   :  { %6051 = vtanh.f32 %v4339_v47 }
0x10d3   :  { %v6052_v29 = vpop.eup %6051 }
0x10d4   :  { %v4342_v5 = vmul.f32 %v6052_v29, %v4341_v0 }
0x10d6   :  { %v4344_v60 = vadd.f32 %v4343_v4, %v4342_v5 }
0x10d8   :  { %4345 = vst.msk [vmem:[#allocation6] sm:$0xff] %vm157_vm2, %v4344_v60  ;;  %v4346_v13 = vpack.c.bf16 %v4344_v60, %v4344_v60 }
0x10da   :  { %5745 = vmatmul.mubr.msk.bf16.vlgmr.msra.gmra.mrb[136].mxu1 %vm157_vm2, %v4346_v13 }
0x10db   :  { %5760 = vmatprep.mubr.msk.f32.mxu1 %vm6115_vm3, %v6114_v11  ;;  %5765 = vmatpush3.bf16.msra.mxu1 %v5764_v10  ;;  %v4809_v11 = vld [vmem:[%s7494_s21 + $0x38] sm:$0xff] }
0x10dc   :  { %v4395_v2 = vsub.f32 1.0, %v4809_v11  ;;  %v4394_v39 = vmul.f32 %v4810_v35, %v4809_v11 }
0x10df   :  { %v4400_v27 = vld [vmem:[#allocation6] sm:$0xff] }
0x10e0   :  { %v4401_v12 = vpack.c.bf16 %v4400_v27, %v4400_v27 }
0x10e2   :  { %5753 = vmatmul.mubr.msk.bf16.vlgmr.msra.gmra.mrb[140].mxu0 %vm157_vm2, %v4401_v12 }
0x11ad   :  { %v4384_v34 = vpop.f32.mrb[136].mxu1 }
0x11ae   :  { %v4385_v37 = vadd.f32 %v7132_v62, %v4384_v34  ;;  %v5746_v40 = vpop.f32.mrb[137].mxu1 }
0x11af   :  { %v4387_v41 = vpop.f32.mrb[138].mxu1 }
0x11b0   :  { %v4396_v42 = vmul.f32 %v4395_v2, %v4385_v37  ;;  %v5747_v1 = vpop.f32.mrb[139].mxu1 }
0x11b2   :  { %v4397_v51 = vadd.f32 %v4396_v42, %v4394_v39 }
0x11b4   :  { %4811 = vst.msk [vmem:[%s7486_s15 + $0x38] sm:$0xff] %vm75_vm1, %v4397_v51  ;;  %s4586_s15 = sshll.u32 %s6117_s13, 4  ;;  %s4587_s15 = int_to_ptr.vmem [resolvable:$true] %s4586_s15 }
0x11b5   :  { %v4462_v61 = vpop.f32.mrb[140].mxu0  ;;  %s6090_s28 = scalar_lea.vmem %s4587_s15, 128  ;;  %p6095_p1 = scmp.lt.s32.totalorder %s4587_s15, %s4587_s15 }
0x11b6   :  { %v4463_v14 = vadd.f32 %v4812_v45, %v4462_v61  ;;  %v5754_v46 = vpop.f32.mrb[141].mxu0  ;;  %p6091_p0 = scmp.ne.s32.totalorder %s4587_s15, %s6090_s28  ;;  %p6096_p2 = scmp.lt.s32.totalorder %s6090_s28, %s6090_s28 }
0x11b7   :  { %v4465_v62 = vpop.f32.mrb[142].mxu0 }
0x11b8   :  { %v5755_v43 = vpop.f32.mrb[143].mxu0  ;;  %5761 = vmatmul.mubr.msk.f32.vlgmr.msra.gmra.mrb[140].mxu1 %vm4468_vm4, %v4463_v14  ;;  %4469 = vst.msk [vmem:[#allocation7] sm:$0xff] %vm4468_vm4, %v4463_v14  ;;  %v4472_v50 = vmul.f32 %v4463_v14, %v4463_v14  ;;  %p6097_p3 = por %p6096_p2, %p6095_p1 }
0x11ba   :  { %v4473_v6 = vsel %vm4468_vm4, %v4472_v50, 0.0  ;;  %p6098_p4 = pnand %p6097_p3, %p6091_p0 }
0x11bb   :  { %4474 = vadd.xlane.f32.xlu0 %v4473_v6 }
0x1248   :  { %v4475_v56 = vpop.xlane.xlu0 %4474 }
0x128b   :  { %v4557_v26 = vpop.f32.mrb[140].mxu1 }
0x128c   :  { %v4561_v52 = vmul.f32 2.0, %v4557_v26  ;;  %v5762_v63 = vpop.f32.mrb[141].mxu1 }
0x128e   :  { %v4562_v57 = vsub.f32 %v4475_v56, %v4561_v52 }
0x1290   :  { %v4563_v31 = vadd.f32 %v4562_v57, %v4487_v54 }
0x1292   :  { %v4564_v24 = vsel %vm4478_vm5, %v4563_v31, inf }
0x1293   :  { %4565 = vmin.xlane.f32.xlu0 %v4564_v24 }
0x1320   :  { %v4566_v53 = vpop.xlane.xlu0 %4565 }
0x1321   :  { %vm4570_vm6 = vcmp.le.f32.partialorder %v4563_v31, %v4566_v53 }
0x1322   :  { %v4571_v49 = vsel %vm4570_vm6, %v4569_v33, 3.0 }
0x1323   :  { %v4572_v17 = vsel %vm4478_vm5, %v4571_v49, inf }
0x1324   :  { %4573 = vmin.xlane.f32.xlu1 %v4572_v17 }
0x1325   :  { %6101 = shalt.err (!%p6098_p4)
}
0x1326   :  { %s6102_s3 = scalar_lea.hbm %s7487_s16, 128 }
0x1327   :  { %p6103_p5 = scmp.ne.s32.totalorder %s7487_s16, %s6102_s3  ;;  %p6106_p6 = scmp.lt.u32.totalorder %s6102_s3, %s7487_s16 }
0x1329   :  { %p6108_p7 = pnand %p6106_p6, %p6103_p5 }
0x132b   :  { %6111 = shalt.err (!%p6108_p7)
}
0x132c   :  { %4589 = dma.vmem_to_hbm [thread:$0]  %s4587_s15, 128, %s7487_s16, [#allocation8]   ;;  %vm4576_vm7 = vcmask 7168  }
0x13b1   :  { %v4574_v48 = vpop.xlane.xlu1 %4573 }
0x13b2   :  { %v5865_v59 = vtrunc.f32 %v4574_v48 }
0x13b4   :  { %v5866_v25 = vcvt.f32.s32 %v5865_v59 }
0x13b6   :  { %4577 = vst.msk [vmem:[%s7488_s17] sm:$0xff] %vm4576_vm7, %v5866_v25 }
0x13b7   :  { %6112 = dma.done.wait [#allocation8], 128  }
0x13b8   :  { %6113 = vsyncadd [#allocation8], 4294967168 }
0x13b9   :  { %4599 = vsyncpa [#allocation8], 1 }

</bundles_post_ra>
